<compile_context>
chip_gen: v5e
topology: v5e:2x2
jax: 0.10.0
libtpu: 0.0.40
codegen_flags: <defaults>
</compile_context>

<pallas_src>
import functools

import jax
import jax.numpy as jnp
from jax.experimental import pallas as pl
from jax.experimental.pallas import tpu as pltpu


_VMEM_LIMIT = 48 * 1024 * 1024  # above the 32 MiB default, within v7x's 64 MiB physical VMEM


# ----------------------------- tiling helper -----------------------------

def _pick_tile(dim, pref, align):
    """Largest tile <= pref that divides dim and is a multiple of `align`; else the full dim."""
    if dim <= pref:
        return dim
    t = (pref // align) * align
    while t >= align:
        if dim % t == 0:
            return t
        t -= align
    # TODO(synk): pad + mask instead of falling back to a full-dim block for pathological dims.
    return dim


# ----------------------------- Pallas kernels -----------------------------

def _linear_kernel(*refs, fuse_ln, fuse_res, single_k, eps):
    """Tiled matmul with optional fused LayerNorm (input side) and fused residual add (output).

    Grid: (M/tm, N/tn, K/tk), K innermost ("arbitrary").
    bf16 MXU operands, f32 accumulation.  When fuse_ln the wrapper guarantees tk == K and the
    normalized row tile is cached in a bf16 VMEM scratch (computed once at j == 0).
    When single_k (K grid extent == 1) no accumulator scratch is used.
    """
    it = iter(refs)
    x_ref = next(it)
    w_ref = next(it)
    b_ref = next(it)
    g_ref = beta_ref = r_ref = None
    if fuse_ln:
        g_ref = next(it)
        beta_ref = next(it)
    if fuse_res:
        r_ref = next(it)
    o_ref = next(it)
    xn_ref = next(it) if fuse_ln else None
    acc_ref = None if single_k else next(it)

    j = pl.program_id(1)
    k = pl.program_id(2)

    if fuse_ln:
        @pl.when(j == 0)
        def _():
            xf = x_ref[...].astype(jnp.float32)
            mean = jnp.mean(xf, axis=-1, keepdims=True)
            var = jnp.mean((xf - mean) ** 2, axis=-1, keepdims=True)  # biased var (PyTorch LN)
            xn = (xf - mean) * jax.lax.rsqrt(var + eps)
            xn = xn * g_ref[...].astype(jnp.float32) + beta_ref[...].astype(jnp.float32)
            xn_ref[...] = xn.astype(xn_ref.dtype)

        x_op = xn_ref[...]                       # bf16 normalized rows, reused across N tiles
    else:
        x_op = x_ref[...].astype(w_ref.dtype)    # bf16 operand, f32 accumulation below

    partial = jnp.dot(x_op, w_ref[...], preferred_element_type=jnp.float32)

    if single_k:
        out = partial + b_ref[...].astype(jnp.float32)
        if fuse_res:
            out = out + r_ref[...].astype(jnp.float32)
        o_ref[...] = out.astype(o_ref.dtype)
    else:
        @pl.when(k == 0)
        def _():
            acc_ref[...] = jnp.zeros_like(acc_ref)

        acc_ref[...] += partial

        @pl.when(k == pl.num_programs(2) - 1)
        def _():
            out = acc_ref[...] + b_ref[...].astype(jnp.float32)
            if fuse_res:
                out = out + r_ref[...].astype(jnp.float32)
            o_ref[...] = out.astype(o_ref.dtype)


def _flash_attn_kernel(q_ref, kv_ref, o_ref, m_sc, l_sc, acc_sc, *, n_heads, attn_dim):
    """Flash (online-softmax) attention, heads packed along the lane axis.

    Grid: (B, L/tq, Lc/tkv) with the kv axis innermost ("arbitrary").
    q_ref:  (1, tq,  A)  — scale already folded into the q projection weights.
    kv_ref: (1, tkv, 2A) — k at lanes [0, A), v at lanes [A, 2A).
    Scratch: per-head m/l (n_heads, tq, 1) f32 and per-head acc (n_heads, tq, dh) f32.
    """
    A = attn_dim
    dh = A // n_heads
    kv_step = pl.program_id(2)

    @pl.when(kv_step == 0)
    def _():
        m_sc[...] = jnp.full_like(m_sc, -jnp.inf)
        l_sc[...] = jnp.zeros_like(l_sc)
        acc_sc[...] = jnp.zeros_like(acc_sc)

    q = q_ref[0].astype(jnp.bfloat16)                 # (tq, A)
    k = kv_ref[0, :, 0:A].astype(jnp.bfloat16)        # (tkv, A)
    v = kv_ref[0, :, A:2 * A].astype(jnp.bfloat16)    # (tkv, A)

    for h in range(n_heads):                          # static unroll over heads
        lo = h * dh
        qh = q[:, lo:lo + dh]
        kh = k[:, lo:lo + dh]
        vh = v[:, lo:lo + dh]
        # scores: contract the last dims of both operands (no explicit transpose)
        s = jax.lax.dot_general(qh, kh, (((1,), (1,)), ((), ())),
                                preferred_element_type=jnp.float32)   # (tq, tkv) f32
        m_prev = m_sc[h]                                              # (tq, 1)
        m_new = jnp.maximum(m_prev, jnp.max(s, axis=-1, keepdims=True))
        alpha = jnp.exp(m_prev - m_new)
        p = jnp.exp(s - m_new)
        l_sc[h] = alpha * l_sc[h] + jnp.sum(p, axis=-1, keepdims=True)
        acc_sc[h] = alpha * acc_sc[h] + jnp.dot(p.astype(jnp.bfloat16), vh,
                                                preferred_element_type=jnp.float32)
        m_sc[h] = m_new

    @pl.when(kv_step == pl.num_programs(2) - 1)
    def _():
        for h in range(n_heads):
            lo = h * dh
            # approx reciprocal: fine for inference; deviates slightly from exact softmax
            inv = pl.reciprocal(l_sc[h], approx=True)                 # (tq, 1)
            o_ref[0, :, lo:lo + dh] = (acc_sc[h] * inv).astype(o_ref.dtype)


# ----------------------------- wrappers -----------------------------

def linear(x, w, b, *, ln=None, residual=None, eps=1e-5,
           tm_pref=256, tn_pref=256, tk_pref=512):
    """y = (LN(x) if ln else x) @ w + b (+ residual), tiled over (M, N, K).

    w is expected in bf16 (f32 also works); accumulation is always f32.
    """
    orig_shape = x.shape
    K = orig_shape[-1]
    N = w.shape[1]
    x2 = x.reshape(-1, K)
    M = x2.shape[0]

    fuse_ln = ln is not None
    fuse_res = residual is not None

    tm = _pick_tile(M, tm_pref, 8)
    tn = _pick_tile(N, tn_pref, 128)
    tk = K if fuse_ln else _pick_tile(K, tk_pref, 128)  # fused LN needs the full row per tile
    grid = (M // tm, N // tn, K // tk)
    single_k = grid[2] == 1

    inputs = [x2, w, b.reshape(1, N)]
    in_specs = [
        pl.BlockSpec((tm, tk), lambda i, j, k: (i, k)),
        pl.BlockSpec((tk, tn), lambda i, j, k: (k, j)),
        pl.BlockSpec((1, tn), lambda i, j, k: (0, j)),   # bias resident across M and K
    ]
    if fuse_ln:
        g, beta = ln
        inputs += [g.reshape(1, K), beta.reshape(1, K)]
        in_specs += [pl.BlockSpec((1, tk), lambda i, j, k: (0, k)),
                     pl.BlockSpec((1, tk), lambda i, j, k: (0, k))]
    io_alias = {}
    if fuse_res:
        inputs.append(residual.reshape(-1, N))
        in_specs.append(pl.BlockSpec((tm, tn), lambda i, j, k: (i, j)))
        io_alias = {len(inputs) - 1: 0}   # reuse the residual HBM buffer for the output

    scratch = []
    if fuse_ln:
        scratch.append(pltpu.VMEM((tm, tk), w.dtype))       # cached normalized rows (bf16)
    if not single_k:
        scratch.append(pltpu.VMEM((tm, tn), jnp.float32))   # f32 accumulator

    # With the LN scratch cached at j == 0 the N axis must not be split across cores.
    dims = ("parallel", "arbitrary" if fuse_ln else "parallel", "arbitrary")

    w_bytes = w.dtype.itemsize if hasattr(w.dtype, "itemsize") else 2
    flops = 2 * M * N * K
    bytes_accessed = 4 * M * K + w_bytes * K * N + 4 * M * N + (4 * M * N if fuse_res else 0)

    out = pl.pallas_call(
        functools.partial(_linear_kernel, fuse_ln=fuse_ln, fuse_res=fuse_res,
                          single_k=single_k, eps=eps),
        out_shape=jax.ShapeDtypeStruct((M, N), x.dtype),
        grid=grid,
        in_specs=in_specs,
        out_specs=pl.BlockSpec((tm, tn), lambda i, j, k: (i, j)),
        scratch_shapes=scratch,
        input_output_aliases=io_alias,
        compiler_params=pltpu.CompilerParams(
            dimension_semantics=dims, vmem_limit_bytes=_VMEM_LIMIT),
        cost_estimate=pl.CostEstimate(flops=flops, transcendentals=0,
                                      bytes_accessed=bytes_accessed),
    )(*inputs)
    return out.reshape(orig_shape[:-1] + (N,))


def multihead_attention(q, kv, n_heads, *, tq_pref=256, tkv_pref=512):
    """q: (B, L, A); kv: (B, Lc, 2A) with k at lanes [0, A) and v at [A, 2A).

    Heads are packed along the last axis; output is (B, L, A) ('b n l d -> b l (n d)').
    """
    B, L, A = q.shape
    Lc = kv.shape[1]
    dh = A // n_heads
    tq = _pick_tile(L, tq_pref, 8)
    tkv = _pick_tile(Lc, tkv_pref, 8)
    grid = (B, L // tq, Lc // tkv)

    flops = 4 * B * L * Lc * A
    bytes_accessed = 4 * (B * L * A + B * Lc * 2 * A + B * L * A)

    return pl.pallas_call(
        functools.partial(_flash_attn_kernel, n_heads=n_heads, attn_dim=A),
        out_shape=jax.ShapeDtypeStruct((B, L, A), q.dtype),
        grid=grid,
        in_specs=[
            pl.BlockSpec((1, tq, A), lambda b, i, j: (b, i, 0)),
            pl.BlockSpec((1, tkv, 2 * A), lambda b, i, j: (b, j, 0)),
        ],
        out_specs=pl.BlockSpec((1, tq, A), lambda b, i, j: (b, i, 0)),
        scratch_shapes=[
            pltpu.VMEM((n_heads, tq, 1), jnp.float32),    # running max m
            pltpu.VMEM((n_heads, tq, 1), jnp.float32),    # running denom l
            pltpu.VMEM((n_heads, tq, dh), jnp.float32),   # running output acc
        ],
        compiler_params=pltpu.CompilerParams(
            dimension_semantics=("parallel", "parallel", "arbitrary"),
            vmem_limit_bytes=_VMEM_LIMIT),
        cost_estimate=pl.CostEstimate(flops=flops,
                                      transcendentals=B * n_heads * L * Lc,
                                      bytes_accessed=bytes_accessed),
    )(q, kv)


# ----------------------------- module forward -----------------------------

def self_attention_block(x, ap, ln_g, ln_b, n_heads, attn_dim):
    """CrossAttention(LN1(x)) + x  — fused QKV projection, LN and residual folded into matmuls."""
    qkv = linear(x, ap["qkv_w"], ap["qkv_b"], ln=(ln_g, ln_b))       # (B, L, 3A)
    q = qkv[..., :attn_dim]
    kv = qkv[..., attn_dim:]
    attn = multihead_attention(q, kv, n_heads)                       # (B, L, A)
    return linear(attn, ap["out_w"], ap["out_b"], residual=x)        # out proj + residual


def cross_attention_block(x, cond, ap, ln_g, ln_b, n_heads, attn_dim):
    """CrossAttention(LN2(x), cond) + x — fused KV projection on cond."""
    q = linear(x, ap["q_w"], ap["q_b"], ln=(ln_g, ln_b))             # (B, L, A)
    kv = linear(cond, ap["kv_w"], ap["kv_b"])                        # (B, Lc, 2A)
    attn = multihead_attention(q, kv, n_heads)
    return linear(attn, ap["out_w"], ap["out_b"], residual=x)


def basic_transformer(x, cond, params, n_heads, attn_dim):
    x = self_attention_block(x, params["attn1"],
                             params["ln1_g"], params["ln1_b"], n_heads, attn_dim)
    x = cross_attention_block(x, cond, params["attn2"],
                              params["ln2_g"], params["ln2_b"], n_heads, attn_dim)
    h = linear(x, params["ffn1_w"], params["ffn1_b"],
               ln=(params["ln3_g"], params["ln3_b"]))                # LN3 fused into FFN1
    # nn.Dropout() -> identity (eval mode)
    x = linear(h, params["ffn2_w"], params["ffn2_b"], residual=x)    # FFN2 + residual fused
    return x


# ----------------------------- parameter init -----------------------------

def _init_linear(key, in_f, out_f):
    kw, kb = jax.random.split(key)
    bound = 1.0 / (in_f ** 0.5)                # PyTorch nn.Linear default init
    w = jax.random.uniform(kw, (in_f, out_f), jnp.float32, -bound, bound)
    b = jax.random.uniform(kb, (out_f,), jnp.float32, -bound, bound)
    return w, b


def init_params(key, in_dim, d_cond, attn_dim, n_heads):
    """Builds fused, bf16-weight parameters; the q scale is folded into the q weights/bias."""
    assert in_dim == d_cond, "reference attn1 feeds x into d_cond-sized k/v Linears"
    scale = (attn_dim / n_heads) ** 0.5
    keys = jax.random.split(key, 4)

    def attn_raw(k4):
        kq, kk, kv, ko = jax.random.split(k4, 4)
        qw, qb = _init_linear(kq, in_dim, attn_dim)
        kw_, kb_ = _init_linear(kk, d_cond, attn_dim)
        vw, vb = _init_linear(kv, d_cond, attn_dim)
        ow, ob = _init_linear(ko, attn_dim, in_dim)
        return qw, qb, kw_, kb_, vw, vb, ow, ob

    # attn1: self-attention -> fused QKV weight (in_dim, 3*attn_dim)
    qw, qb, kw_, kb_, vw, vb, ow, ob = attn_raw(keys[0])
    attn1 = dict(
        qkv_w=jnp.concatenate([qw * scale, kw_, vw], axis=1).astype(jnp.bfloat16),
        qkv_b=jnp.concatenate([qb * scale, kb_, vb], axis=0),
        out_w=ow.astype(jnp.bfloat16), out_b=ob)

    # attn2: cross-attention -> fused KV weight (d_cond, 2*attn_dim)
    qw, qb, kw_, kb_, vw, vb, ow, ob = attn_raw(keys[1])
    attn2 = dict(
        q_w=(qw * scale).astype(jnp.bfloat16), q_b=qb * scale,
        kv_w=jnp.concatenate([kw_, vw], axis=1).astype(jnp.bfloat16),
        kv_b=jnp.concatenate([kb_, vb], axis=0),
        out_w=ow.astype(jnp.bfloat16), out_b=ob)

    f1w, f1b = _init_linear(keys[2], in_dim, in_dim * 4)
    f2w, f2b = _init_linear(keys[3], in_dim * 4, in_dim)
    return dict(
        attn1=attn1, attn2=attn2,
        ffn1_w=f1w.astype(jnp.bfloat16), ffn1_b=f1b,
        ffn2_w=f2w.astype(jnp.bfloat16), ffn2_b=f2b,
        ln1_g=jnp.ones((in_dim,), jnp.float32), ln1_b=jnp.zeros((in_dim,), jnp.float32),
        ln2_g=jnp.ones((in_dim,), jnp.float32), ln2_b=jnp.zeros((in_dim,), jnp.float32),
        ln3_g=jnp.ones((in_dim,), jnp.float32), ln3_b=jnp.zeros((in_dim,), jnp.float32),
    )


# ----------------------------- main -----------------------------

if __name__ == "__main__":
    B, L, Lc = 2, 8, 16
    # The reference module only runs when in_dim == d_cond (attn1 feeds x into the d_cond-sized
    # k/v Linears), so the example uses matching dims.
    in_dim = d_cond = 32
    attn_dim, n_heads = 64, 8

    key = jax.random.PRNGKey(0)
    kx, kc, kp = jax.random.split(key, 3)
    x = jax.random.normal(kx, (B, L, in_dim), jnp.float32)
    cond = jax.random.normal(kc, (B, Lc, d_cond), jnp.float32)
    params = init_params(kp, in_dim, d_cond, attn_dim, n_heads)

    fwd = jax.jit(functools.partial(basic_transformer,
                                    n_heads=n_heads, attn_dim=attn_dim))
    out = jax.block_until_ready(fwd(x, cond, params))
    assert out.shape == (B, L, in_dim) and out.dtype == jnp.float32
    assert bool(jnp.all(jnp.isfinite(out)))
    print("KERNEL_OK")
</pallas_src>

<mosaic_0001>
module attributes {stable_mosaic.version = 11 : i64} {
  func.func @_linear_kernel(%arg0: i32, %arg1: i32, %arg2: i32, %arg3: memref<16x32xf32, #tpu.memory_space<vmem>>, %arg4: memref<32x192xbf16, #tpu.memory_space<vmem>>, %arg5: memref<1x192xf32, #tpu.memory_space<vmem>>, %arg6: memref<1x32xf32, #tpu.memory_space<vmem>>, %arg7: memref<1x32xf32, #tpu.memory_space<vmem>>, %arg8: memref<16x192xf32, #tpu.memory_space<vmem>>, %arg9: memref<16x32xbf16, #tpu.memory_space<vmem>>) attributes {dimension_semantics = [#tpu.dimension_semantics<parallel>, #tpu.dimension_semantics<arbitrary>, #tpu.dimension_semantics<arbitrary>], iteration_bounds = array<i64: 1, 1, 1>, scalar_prefetch = 0 : i64, scratch_operands = 1 : i64, tpu.core_type = #tpu.core_type<tc>, window_params = [{transform_indices = @transform_0, window_bounds = array<i64: 16, 32>}, {transform_indices = @transform_1, window_bounds = array<i64: 32, 192>}, {transform_indices = @transform_2, window_bounds = array<i64: 1, 192>}, {transform_indices = @transform_3, window_bounds = array<i64: 1, 32>}, {transform_indices = @transform_4, window_bounds = array<i64: 1, 32>}, {transform_indices = @transform_5, window_bounds = array<i64: 16, 192>}]} {
    %c0_i32 = arith.constant 0 : i32
    %0 = arith.cmpi eq, %arg1, %c0_i32 : i32
    %1 = arith.extui %0 : i1 to i32
    %c0_i32_0 = arith.constant 0 : i32
    %2 = arith.cmpi ne, %1, %c0_i32_0 : i32
    scf.if %2 {
      %c0_8 = arith.constant 0 : index
      %c0_9 = arith.constant 0 : index
      %10 = vector.load %arg3[%c0_8, %c0_9] : memref<16x32xf32, #tpu.memory_space<vmem>>, vector<16x32xf32>
      %cst_10 = arith.constant dense<0.000000e+00> : vector<16xf32>
      %11 = vector.multi_reduction <add>, %10, %cst_10 [1] : vector<16x32xf32> to vector<16xf32>
      %12 = vector.shape_cast %11 : vector<16xf32> to vector<16x1xf32>
      %cst_11 = arith.constant 3.200000e+01 : f32
      %13 = vector.broadcast %cst_11 : f32 to vector<16x1xf32>
      %14 = arith.divf %12, %13 : vector<16x1xf32>
      %15 = vector.broadcast %14 : vector<16x1xf32> to vector<16x32xf32>
      %16 = arith.subf %10, %15 : vector<16x32xf32>
      %17 = arith.mulf %16, %16 : vector<16x32xf32>
      %cst_12 = arith.constant dense<0.000000e+00> : vector<16xf32>
      %18 = vector.multi_reduction <add>, %17, %cst_12 [1] : vector<16x32xf32> to vector<16xf32>
      %19 = vector.shape_cast %18 : vector<16xf32> to vector<16x1xf32>
      %cst_13 = arith.constant 3.200000e+01 : f32
      %20 = vector.broadcast %cst_13 : f32 to vector<16x1xf32>
      %21 = arith.divf %19, %20 : vector<16x1xf32>
      %22 = vector.broadcast %14 : vector<16x1xf32> to vector<16x32xf32>
      %23 = arith.subf %10, %22 : vector<16x32xf32>
      %cst_14 = arith.constant 9.99999974E-6 : f32
      %24 = vector.broadcast %cst_14 : f32 to vector<16x1xf32>
      %25 = arith.addf %21, %24 : vector<16x1xf32>
      %26 = math.rsqrt %25 : vector<16x1xf32>
      %27 = vector.broadcast %26 : vector<16x1xf32> to vector<16x32xf32>
      %28 = arith.mulf %23, %27 : vector<16x32xf32>
      %c0_15 = arith.constant 0 : index
      %c0_16 = arith.constant 0 : index
      %29 = vector.load %arg6[%c0_15, %c0_16] : memref<1x32xf32, #tpu.memory_space<vmem>>, vector<1x32xf32>
      %30 = vector.broadcast %29 : vector<1x32xf32> to vector<16x32xf32>
      %31 = arith.mulf %28, %30 : vector<16x32xf32>
      %c0_17 = arith.constant 0 : index
      %c0_18 = arith.constant 0 : index
      %32 = vector.load %arg7[%c0_17, %c0_18] : memref<1x32xf32, #tpu.memory_space<vmem>>, vector<1x32xf32>
      %33 = vector.broadcast %32 : vector<1x32xf32> to vector<16x32xf32>
      %34 = arith.addf %31, %33 : vector<16x32xf32>
      %35 = arith.truncf %34 : vector<16x32xf32> to vector<16x32xbf16>
      %c0_19 = arith.constant 0 : index
      %c0_20 = arith.constant 0 : index
      %36 = vector.load %arg9[%c0_19, %c0_20] : memref<16x32xbf16, #tpu.memory_space<vmem>>, vector<16x32xbf16>
      tpu.vector_store %arg9[%c0_19, %c0_20], %35 {strides = array<i32>} : memref<16x32xbf16, #tpu.memory_space<vmem>>, vector<16x32xbf16>,
    } else {
    }
    %c0 = arith.constant 0 : index
    %c0_1 = arith.constant 0 : index
    %3 = vector.load %arg9[%c0, %c0_1] : memref<16x32xbf16, #tpu.memory_space<vmem>>, vector<16x32xbf16>
    %c0_2 = arith.constant 0 : index
    %c0_3 = arith.constant 0 : index
    %4 = vector.load %arg4[%c0_2, %c0_3] : memref<32x192xbf16, #tpu.memory_space<vmem>>, vector<32x192xbf16>
    %cst = arith.constant dense<0.000000e+00> : vector<16x192xf32>
    %5 = tpu.matmul %3, %4, %cst {dimension_numbers = #tpu.dot_dimension_numbers<[1], [0], [0], [1], [0, 0, 1, 1], [], []>} : vector<16x32xbf16>, vector<32x192xbf16>, vector<16x192xf32> -> vector<16x192xf32>
    %c0_4 = arith.constant 0 : index
    %c0_5 = arith.constant 0 : index
    %6 = vector.load %arg5[%c0_4, %c0_5] : memref<1x192xf32, #tpu.memory_space<vmem>>, vector<1x192xf32>
    %7 = vector.broadcast %6 : vector<1x192xf32> to vector<16x192xf32>
    %8 = arith.addf %5, %7 : vector<16x192xf32>
    %c0_6 = arith.constant 0 : index
    %c0_7 = arith.constant 0 : index
    %9 = vector.load %arg8[%c0_6, %c0_7] : memref<16x192xf32, #tpu.memory_space<vmem>>, vector<16x192xf32>
    tpu.vector_store %arg8[%c0_6, %c0_7], %8 {strides = array<i32>} : memref<16x192xf32, #tpu.memory_space<vmem>>, vector<16x192xf32>,
    return
  }
  func.func @transform_0(%arg0: i32, %arg1: i32, %arg2: i32) -> (i32, i32) {
    %c0_i32 = arith.constant 0 : i32
    return %arg0, %arg2 : i32, i32
  }
  func.func @transform_1(%arg0: i32, %arg1: i32, %arg2: i32) -> (i32, i32) {
    %c0_i32 = arith.constant 0 : i32
    return %arg2, %arg1 : i32, i32
  }
  func.func @transform_2(%arg0: i32, %arg1: i32, %arg2: i32) -> (i32, i32) {
    %c0_i32 = arith.constant 0 : i32
    %c0_i32_0 = arith.constant 0 : i32
    return %c0_i32, %arg1 : i32, i32
  }
  func.func @transform_3(%arg0: i32, %arg1: i32, %arg2: i32) -> (i32, i32) {
    %c0_i32 = arith.constant 0 : i32
    %c0_i32_0 = arith.constant 0 : i32
    return %c0_i32, %arg2 : i32, i32
  }
  func.func @transform_4(%arg0: i32, %arg1: i32, %arg2: i32) -> (i32, i32) {
    %c0_i32 = arith.constant 0 : i32
    %c0_i32_0 = arith.constant 0 : i32
    return %c0_i32, %arg2 : i32, i32
  }
  func.func @transform_5(%arg0: i32, %arg1: i32, %arg2: i32) -> (i32, i32) {
    %c0_i32 = arith.constant 0 : i32
    return %arg0, %arg1 : i32, i32
  }
}

module attributes {stable_mosaic.version = 11 : i64} {
  func.func @_linear_kernel(%arg0: i32, %arg1: i32, %arg2: i32, %arg3: memref<32x32xf32, #tpu.memory_space<vmem>>, %arg4: memref<32x128xbf16, #tpu.memory_space<vmem>>, %arg5: memref<1x128xf32, #tpu.memory_space<vmem>>, %arg6: memref<32x128xf32, #tpu.memory_space<vmem>>) attributes {dimension_semantics = [#tpu.dimension_semantics<parallel>, #tpu.dimension_semantics<parallel>, #tpu.dimension_semantics<arbitrary>], iteration_bounds = array<i64: 1, 1, 1>, scalar_prefetch = 0 : i64, scratch_operands = 0 : i64, tpu.core_type = #tpu.core_type<tc>, window_params = [{transform_indices = @transform_0, window_bounds = array<i64: 32, 32>}, {transform_indices = @transform_1, window_bounds = array<i64: 32, 128>}, {transform_indices = @transform_2, window_bounds = array<i64: 1, 128>}, {transform_indices = @transform_3, window_bounds = array<i64: 32, 128>}]} {
    %c0 = arith.constant 0 : index
    %c0_0 = arith.constant 0 : index
    %0 = vector.load %arg3[%c0, %c0_0] : memref<32x32xf32, #tpu.memory_space<vmem>>, vector<32x32xf32>
    %1 = arith.truncf %0 : vector<32x32xf32> to vector<32x32xbf16>
    %c0_1 = arith.constant 0 : index
    %c0_2 = arith.constant 0 : index
    %2 = vector.load %arg4[%c0_1, %c0_2] : memref<32x128xbf16, #tpu.memory_space<vmem>>, vector<32x128xbf16>
    %cst = arith.constant dense<0.000000e+00> : vector<32x128xf32>
    %3 = tpu.matmul %1, %2, %cst {dimension_numbers = #tpu.dot_dimension_numbers<[1], [0], [0], [1], [0, 0, 1, 1], [], []>} : vector<32x32xbf16>, vector<32x128xbf16>, vector<32x128xf32> -> vector<32x128xf32>
    %c0_3 = arith.constant 0 : index
    %c0_4 = arith.constant 0 : index
    %4 = vector.load %arg5[%c0_3, %c0_4] : memref<1x128xf32, #tpu.memory_space<vmem>>, vector<1x128xf32>
    %5 = vector.broadcast %4 : vector<1x128xf32> to vector<32x128xf32>
    %6 = arith.addf %3, %5 : vector<32x128xf32>
    %c0_5 = arith.constant 0 : index
    %c0_6 = arith.constant 0 : index
    %7 = vector.load %arg6[%c0_5, %c0_6] : memref<32x128xf32, #tpu.memory_space<vmem>>, vector<32x128xf32>
    tpu.vector_store %arg6[%c0_5, %c0_6], %6 {strides = array<i32>} : memref<32x128xf32, #tpu.memory_space<vmem>>, vector<32x128xf32>,
    return
  }
  func.func @transform_0(%arg0: i32, %arg1: i32, %arg2: i32) -> (i32, i32) {
    %c0_i32 = arith.constant 0 : i32
    return %arg0, %arg2 : i32, i32
  }
  func.func @transform_1(%arg0: i32, %arg1: i32, %arg2: i32) -> (i32, i32) {
    %c0_i32 = arith.constant 0 : i32
    return %arg2, %arg1 : i32, i32
  }
  func.func @transform_2(%arg0: i32, %arg1: i32, %arg2: i32) -> (i32, i32) {
    %c0_i32 = arith.constant 0 : i32
    %c0_i32_0 = arith.constant 0 : i32
    return %c0_i32, %arg1 : i32, i32
  }
  func.func @transform_3(%arg0: i32, %arg1: i32, %arg2: i32) -> (i32, i32) {
    %c0_i32 = arith.constant 0 : i32
    return %arg0, %arg1 : i32, i32
  }
}

module attributes {stable_mosaic.version = 11 : i64} {
  func.func @_flash_attn_kernel(%arg0: i32, %arg1: i32, %arg2: i32, %arg3: memref<1x8x64xf32, #tpu.memory_space<vmem>>, %arg4: memref<1x8x128xf32, #tpu.memory_space<vmem>>, %arg5: memref<1x8x64xf32, #tpu.memory_space<vmem>>, %arg6: memref<8x8x1xf32, #tpu.memory_space<vmem>>, %arg7: memref<8x8x1xf32, #tpu.memory_space<vmem>>, %arg8: memref<8x8x8xf32, #tpu.memory_space<vmem>>) attributes {dimension_semantics = [#tpu.dimension_semantics<parallel>, #tpu.dimension_semantics<parallel>, #tpu.dimension_semantics<arbitrary>], iteration_bounds = array<i64: 2, 1, 1>, scalar_prefetch = 0 : i64, scratch_operands = 3 : i64, tpu.core_type = #tpu.core_type<tc>, window_params = [{transform_indices = @transform_0, window_bounds = array<i64: 1, 8, 64>}, {transform_indices = @transform_1, window_bounds = array<i64: 1, 8, 128>}, {transform_indices = @transform_2, window_bounds = array<i64: 1, 8, 64>}]} {
    %c0_i32 = arith.constant 0 : i32
    %0 = arith.cmpi eq, %arg2, %c0_i32 : i32
    %1 = arith.extui %0 : i1 to i32
    %c0_i32_0 = arith.constant 0 : i32
    %2 = arith.cmpi ne, %1, %c0_i32_0 : i32
    scf.if %2 {
      %cst_178 = arith.constant 0xFF800000 : f32
      %303 = vector.broadcast %cst_178 : f32 to vector<8x8x1xf32>
      %c0_179 = arith.constant 0 : index
      %c0_180 = arith.constant 0 : index
      %c0_181 = arith.constant 0 : index
      %304 = vector.load %arg6[%c0_179, %c0_180, %c0_181] : memref<8x8x1xf32, #tpu.memory_space<vmem>>, vector<8x8x1xf32>
      tpu.vector_store %arg6[%c0_179, %c0_180, %c0_181], %303 {strides = array<i32>} : memref<8x8x1xf32, #tpu.memory_space<vmem>>, vector<8x8x1xf32>,
      %cst_182 = arith.constant 0.000000e+00 : f32
      %305 = vector.broadcast %cst_182 : f32 to vector<8x8x1xf32>
      %c0_183 = arith.constant 0 : index
      %c0_184 = arith.constant 0 : index
      %c0_185 = arith.constant 0 : index
      %306 = vector.load %arg7[%c0_183, %c0_184, %c0_185] : memref<8x8x1xf32, #tpu.memory_space<vmem>>, vector<8x8x1xf32>
      tpu.vector_store %arg7[%c0_183, %c0_184, %c0_185], %305 {strides = array<i32>} : memref<8x8x1xf32, #tpu.memory_space<vmem>>, vector<8x8x1xf32>,
      %cst_186 = arith.constant 0.000000e+00 : f32
      %307 = vector.broadcast %cst_186 : f32 to vector<8x8x8xf32>
      %c0_187 = arith.constant 0 : index
      %c0_188 = arith.constant 0 : index
      %c0_189 = arith.constant 0 : index
      %308 = vector.load %arg8[%c0_187, %c0_188, %c0_189] : memref<8x8x8xf32, #tpu.memory_space<vmem>>, vector<8x8x8xf32>
      tpu.vector_store %arg8[%c0_187, %c0_188, %c0_189], %307 {strides = array<i32>} : memref<8x8x8xf32, #tpu.memory_space<vmem>>, vector<8x8x8xf32>,
    } else {
    }
    %c0 = arith.constant 0 : index
    %c0_1 = arith.constant 0 : index
    %c0_2 = arith.constant 0 : index
    %3 = vector.load %arg3[%c0, %c0_1, %c0_2] : memref<1x8x64xf32, #tpu.memory_space<vmem>>, vector<1x8x64xf32>
    %4 = vector.shape_cast %3 : vector<1x8x64xf32> to vector<8x64xf32>
    %5 = arith.truncf %4 : vector<8x64xf32> to vector<8x64xbf16>
    %c0_3 = arith.constant 0 : index
    %c0_4 = arith.constant 0 : index
    %c0_5 = arith.constant 0 : index
    %6 = vector.load %arg4[%c0_3, %c0_4, %c0_5] : memref<1x8x128xf32, #tpu.memory_space<vmem>>, vector<1x8x64xf32>
    %7 = vector.shape_cast %6 : vector<1x8x64xf32> to vector<8x64xf32>
    %8 = arith.truncf %7 : vector<8x64xf32> to vector<8x64xbf16>
    %c0_6 = arith.constant 0 : index
    %c0_7 = arith.constant 0 : index
    %c64 = arith.constant 64 : index
    %9 = vector.load %arg4[%c0_6, %c0_7, %c64] : memref<1x8x128xf32, #tpu.memory_space<vmem>>, vector<1x8x64xf32>
    %10 = vector.shape_cast %9 : vector<1x8x64xf32> to vector<8x64xf32>
    %11 = arith.truncf %10 : vector<8x64xf32> to vector<8x64xbf16>
    %12 = vector.extract_strided_slice %5 {offsets = [0, 0], sizes = [8, 8], strides = [1, 1]} : vector<8x64xbf16> to vector<8x8xbf16>
    %13 = vector.extract_strided_slice %8 {offsets = [0, 0], sizes = [8, 8], strides = [1, 1]} : vector<8x64xbf16> to vector<8x8xbf16>
    %14 = vector.extract_strided_slice %11 {offsets = [0, 0], sizes = [8, 8], strides = [1, 1]} : vector<8x64xbf16> to vector<8x8xbf16>
    %cst = arith.constant dense<0.000000e+00> : vector<8x8xf32>
    %15 = tpu.matmul %12, %13, %cst {dimension_numbers = #tpu.dot_dimension_numbers<[1], [1], [0], [0], [0, 0, 1, 0], [], []>} : vector<8x8xbf16>, vector<8x8xbf16>, vector<8x8xf32> -> vector<8x8xf32>
    %c0_8 = arith.constant 0 : index
    %c0_9 = arith.constant 0 : index
    %c0_10 = arith.constant 0 : index
    %16 = vector.load %arg6[%c0_8, %c0_9, %c0_10] : memref<8x8x1xf32, #tpu.memory_space<vmem>>, vector<1x8x1xf32>
    %17 = vector.shape_cast %16 : vector<1x8x1xf32> to vector<8x1xf32>
    %cst_11 = arith.constant dense<0xFF800000> : vector<8xf32>
    %18 = vector.multi_reduction <maximumf>, %15, %cst_11 [1] : vector<8x8xf32> to vector<8xf32>
    %19 = vector.shape_cast %18 : vector<8xf32> to vector<8x1xf32>
    %20 = arith.maximumf %17, %19 : vector<8x1xf32>
    %21 = arith.subf %17, %20 : vector<8x1xf32>
    %22 = math.exp %21 : vector<8x1xf32>
    %23 = vector.broadcast %20 : vector<8x1xf32> to vector<8x8xf32>
    %24 = arith.subf %15, %23 : vector<8x8xf32>
    %25 = math.exp %24 : vector<8x8xf32>
    %c0_12 = arith.constant 0 : index
    %c0_13 = arith.constant 0 : index
    %c0_14 = arith.constant 0 : index
    %26 = vector.load %arg7[%c0_12, %c0_13, %c0_14] : memref<8x8x1xf32, #tpu.memory_space<vmem>>, vector<1x8x1xf32>
    %27 = vector.shape_cast %26 : vector<1x8x1xf32> to vector<8x1xf32>
    %28 = arith.mulf %22, %27 : vector<8x1xf32>
    %cst_15 = arith.constant dense<0.000000e+00> : vector<8xf32>
    %29 = vector.multi_reduction <add>, %25, %cst_15 [1] : vector<8x8xf32> to vector<8xf32>
    %30 = vector.shape_cast %29 : vector<8xf32> to vector<8x1xf32>
    %31 = arith.addf %28, %30 : vector<8x1xf32>
    %c0_16 = arith.constant 0 : index
    %c0_17 = arith.constant 0 : index
    %c0_18 = arith.constant 0 : index
    %32 = vector.load %arg7[%c0_16, %c0_17, %c0_18] : memref<8x8x1xf32, #tpu.memory_space<vmem>>, vector<1x8x1xf32>
    %33 = vector.shape_cast %32 : vector<1x8x1xf32> to vector<8x1xf32>
    %34 = vector.shape_cast %31 : vector<8x1xf32> to vector<1x8x1xf32>
    tpu.vector_store %arg7[%c0_16, %c0_17, %c0_18], %34 {strides = array<i32>} : memref<8x8x1xf32, #tpu.memory_space<vmem>>, vector<1x8x1xf32>,
    %c0_19 = arith.constant 0 : index
    %c0_20 = arith.constant 0 : index
    %c0_21 = arith.constant 0 : index
    %35 = vector.load %arg8[%c0_19, %c0_20, %c0_21] : memref<8x8x8xf32, #tpu.memory_space<vmem>>, vector<1x8x8xf32>
    %36 = vector.shape_cast %35 : vector<1x8x8xf32> to vector<8x8xf32>
    %37 = vector.broadcast %22 : vector<8x1xf32> to vector<8x8xf32>
    %38 = arith.mulf %37, %36 : vector<8x8xf32>
    %39 = arith.truncf %25 : vector<8x8xf32> to vector<8x8xbf16>
    %cst_22 = arith.constant dense<0.000000e+00> : vector<8x8xf32>
    %40 = tpu.matmul %39, %14, %cst_22 {dimension_numbers = #tpu.dot_dimension_numbers<[1], [0], [0], [1], [0, 0, 1, 1], [], []>} : vector<8x8xbf16>, vector<8x8xbf16>, vector<8x8xf32> -> vector<8x8xf32>
    %41 = arith.addf %38, %40 : vector<8x8xf32>
    %c0_23 = arith.constant 0 : index
    %c0_24 = arith.constant 0 : index
    %c0_25 = arith.constant 0 : index
    %42 = vector.load %arg8[%c0_23, %c0_24, %c0_25] : memref<8x8x8xf32, #tpu.memory_space<vmem>>, vector<1x8x8xf32>
    %43 = vector.shape_cast %42 : vector<1x8x8xf32> to vector<8x8xf32>
    %44 = vector.shape_cast %41 : vector<8x8xf32> to vector<1x8x8xf32>
    tpu.vector_store %arg8[%c0_23, %c0_24, %c0_25], %44 {strides = array<i32>} : memref<8x8x8xf32, #tpu.memory_space<vmem>>, vector<1x8x8xf32>,
    %c0_26 = arith.constant 0 : index
    %c0_27 = arith.constant 0 : index
    %c0_28 = arith.constant 0 : index
    %45 = vector.load %arg6[%c0_26, %c0_27, %c0_28] : memref<8x8x1xf32, #tpu.memory_space<vmem>>, vector<1x8x1xf32>
    %46 = vector.shape_cast %45 : vector<1x8x1xf32> to vector<8x1xf32>
    %47 = vector.shape_cast %20 : vector<8x1xf32> to vector<1x8x1xf32>
    tpu.vector_store %arg6[%c0_26, %c0_27, %c0_28], %47 {strides = array<i32>} : memref<8x8x1xf32, #tpu.memory_space<vmem>>, vector<1x8x1xf32>,
    %48 = vector.extract_strided_slice %5 {offsets = [0, 8], sizes = [8, 8], strides = [1, 1]} : vector<8x64xbf16> to vector<8x8xbf16>
    %49 = vector.extract_strided_slice %8 {offsets = [0, 8], sizes = [8, 8], strides = [1, 1]} : vector<8x64xbf16> to vector<8x8xbf16>
    %50 = vector.extract_strided_slice %11 {offsets = [0, 8], sizes = [8, 8], strides = [1, 1]} : vector<8x64xbf16> to vector<8x8xbf16>
    %cst_29 = arith.constant dense<0.000000e+00> : vector<8x8xf32>
    %51 = tpu.matmul %48, %49, %cst_29 {dimension_numbers = #tpu.dot_dimension_numbers<[1], [1], [0], [0], [0, 0, 1, 0], [], []>} : vector<8x8xbf16>, vector<8x8xbf16>, vector<8x8xf32> -> vector<8x8xf32>
    %c1 = arith.constant 1 : index
    %c0_30 = arith.constant 0 : index
    %c0_31 = arith.constant 0 : index
    %52 = vector.load %arg6[%c1, %c0_30, %c0_31] : memref<8x8x1xf32, #tpu.memory_space<vmem>>, vector<1x8x1xf32>
    %53 = vector.shape_cast %52 : vector<1x8x1xf32> to vector<8x1xf32>
    %cst_32 = arith.constant dense<0xFF800000> : vector<8xf32>
    %54 = vector.multi_reduction <maximumf>, %51, %cst_32 [1] : vector<8x8xf32> to vector<8xf32>
    %55 = vector.shape_cast %54 : vector<8xf32> to vector<8x1xf32>
    %56 = arith.maximumf %53, %55 : vector<8x1xf32>
    %57 = arith.subf %53, %56 : vector<8x1xf32>
    %58 = math.exp %57 : vector<8x1xf32>
    %59 = vector.broadcast %56 : vector<8x1xf32> to vector<8x8xf32>
    %60 = arith.subf %51, %59 : vector<8x8xf32>
    %61 = math.exp %60 : vector<8x8xf32>
    %c1_33 = arith.constant 1 : index
    %c0_34 = arith.constant 0 : index
    %c0_35 = arith.constant 0 : index
    %62 = vector.load %arg7[%c1_33, %c0_34, %c0_35] : memref<8x8x1xf32, #tpu.memory_space<vmem>>, vector<1x8x1xf32>
    %63 = vector.shape_cast %62 : vector<1x8x1xf32> to vector<8x1xf32>
    %64 = arith.mulf %58, %63 : vector<8x1xf32>
    %cst_36 = arith.constant dense<0.000000e+00> : vector<8xf32>
    %65 = vector.multi_reduction <add>, %61, %cst_36 [1] : vector<8x8xf32> to vector<8xf32>
    %66 = vector.shape_cast %65 : vector<8xf32> to vector<8x1xf32>
    %67 = arith.addf %64, %66 : vector<8x1xf32>
    %c1_37 = arith.constant 1 : index
    %c0_38 = arith.constant 0 : index
    %c0_39 = arith.constant 0 : index
    %68 = vector.load %arg7[%c1_37, %c0_38, %c0_39] : memref<8x8x1xf32, #tpu.memory_space<vmem>>, vector<1x8x1xf32>
    %69 = vector.shape_cast %68 : vector<1x8x1xf32> to vector<8x1xf32>
    %70 = vector.shape_cast %67 : vector<8x1xf32> to vector<1x8x1xf32>
    tpu.vector_store %arg7[%c1_37, %c0_38, %c0_39], %70 {strides = array<i32>} : memref<8x8x1xf32, #tpu.memory_space<vmem>>, vector<1x8x1xf32>,
    %c1_40 = arith.constant 1 : index
    %c0_41 = arith.constant 0 : index
    %c0_42 = arith.constant 0 : index
    %71 = vector.load %arg8[%c1_40, %c0_41, %c0_42] : memref<8x8x8xf32, #tpu.memory_space<vmem>>, vector<1x8x8xf32>
    %72 = vector.shape_cast %71 : vector<1x8x8xf32> to vector<8x8xf32>
    %73 = vector.broadcast %58 : vector<8x1xf32> to vector<8x8xf32>
    %74 = arith.mulf %73, %72 : vector<8x8xf32>
    %75 = arith.truncf %61 : vector<8x8xf32> to vector<8x8xbf16>
    %cst_43 = arith.constant dense<0.000000e+00> : vector<8x8xf32>
    %76 = tpu.matmul %75, %50, %cst_43 {dimension_numbers = #tpu.dot_dimension_numbers<[1], [0], [0], [1], [0, 0, 1, 1], [], []>} : vector<8x8xbf16>, vector<8x8xbf16>, vector<8x8xf32> -> vector<8x8xf32>
    %77 = arith.addf %74, %76 : vector<8x8xf32>
    %c1_44 = arith.constant 1 : index
    %c0_45 = arith.constant 0 : index
    %c0_46 = arith.constant 0 : index
    %78 = vector.load %arg8[%c1_44, %c0_45, %c0_46] : memref<8x8x8xf32, #tpu.memory_space<vmem>>, vector<1x8x8xf32>
    %79 = vector.shape_cast %78 : vector<1x8x8xf32> to vector<8x8xf32>
    %80 = vector.shape_cast %77 : vector<8x8xf32> to vector<1x8x8xf32>
    tpu.vector_store %arg8[%c1_44, %c0_45, %c0_46], %80 {strides = array<i32>} : memref<8x8x8xf32, #tpu.memory_space<vmem>>, vector<1x8x8xf32>,
    %c1_47 = arith.constant 1 : index
    %c0_48 = arith.constant 0 : index
    %c0_49 = arith.constant 0 : index
    %81 = vector.load %arg6[%c1_47, %c0_48, %c0_49] : memref<8x8x1xf32, #tpu.memory_space<vmem>>, vector<1x8x1xf32>
    %82 = vector.shape_cast %81 : vector<1x8x1xf32> to vector<8x1xf32>
    %83 = vector.shape_cast %56 : vector<8x1xf32> to vector<1x8x1xf32>
    tpu.vector_store %arg6[%c1_47, %c0_48, %c0_49], %83 {strides = array<i32>} : memref<8x8x1xf32, #tpu.memory_space<vmem>>, vector<1x8x1xf32>,
    %84 = vector.extract_strided_slice %5 {offsets = [0, 16], sizes = [8, 8], strides = [1, 1]} : vector<8x64xbf16> to vector<8x8xbf16>
    %85 = vector.extract_strided_slice %8 {offsets = [0, 16], sizes = [8, 8], strides = [1, 1]} : vector<8x64xbf16> to vector<8x8xbf16>
    %86 = vector.extract_strided_slice %11 {offsets = [0, 16], sizes = [8, 8], strides = [1, 1]} : vector<8x64xbf16> to vector<8x8xbf16>
    %cst_50 = arith.constant dense<0.000000e+00> : vector<8x8xf32>
    %87 = tpu.matmul %84, %85, %cst_50 {dimension_numbers = #tpu.dot_dimension_numbers<[1], [1], [0], [0], [0, 0, 1, 0], [], []>} : vector<8x8xbf16>, vector<8x8xbf16>, vector<8x8xf32> -> vector<8x8xf32>
    %c2 = arith.constant 2 : index
    %c0_51 = arith.constant 0 : index
    %c0_52 = arith.constant 0 : index
    %88 = vector.load %arg6[%c2, %c0_51, %c0_52] : memref<8x8x1xf32, #tpu.memory_space<vmem>>, vector<1x8x1xf32>
    %89 = vector.shape_cast %88 : vector<1x8x1xf32> to vector<8x1xf32>
    %cst_53 = arith.constant dense<0xFF800000> : vector<8xf32>
    %90 = vector.multi_reduction <maximumf>, %87, %cst_53 [1] : vector<8x8xf32> to vector<8xf32>
    %91 = vector.shape_cast %90 : vector<8xf32> to vector<8x1xf32>
    %92 = arith.maximumf %89, %91 : vector<8x1xf32>
    %93 = arith.subf %89, %92 : vector<8x1xf32>
    %94 = math.exp %93 : vector<8x1xf32>
    %95 = vector.broadcast %92 : vector<8x1xf32> to vector<8x8xf32>
    %96 = arith.subf %87, %95 : vector<8x8xf32>
    %97 = math.exp %96 : vector<8x8xf32>
    %c2_54 = arith.constant 2 : index
    %c0_55 = arith.constant 0 : index
    %c0_56 = arith.constant 0 : index
    %98 = vector.load %arg7[%c2_54, %c0_55, %c0_56] : memref<8x8x1xf32, #tpu.memory_space<vmem>>, vector<1x8x1xf32>
    %99 = vector.shape_cast %98 : vector<1x8x1xf32> to vector<8x1xf32>
    %100 = arith.mulf %94, %99 : vector<8x1xf32>
    %cst_57 = arith.constant dense<0.000000e+00> : vector<8xf32>
    %101 = vector.multi_reduction <add>, %97, %cst_57 [1] : vector<8x8xf32> to vector<8xf32>
    %102 = vector.shape_cast %101 : vector<8xf32> to vector<8x1xf32>
    %103 = arith.addf %100, %102 : vector<8x1xf32>
    %c2_58 = arith.constant 2 : index
    %c0_59 = arith.constant 0 : index
    %c0_60 = arith.constant 0 : index
    %104 = vector.load %arg7[%c2_58, %c0_59, %c0_60] : memref<8x8x1xf32, #tpu.memory_space<vmem>>, vector<1x8x1xf32>
    %105 = vector.shape_cast %104 : vector<1x8x1xf32> to vector<8x1xf32>
    %106 = vector.shape_cast %103 : vector<8x1xf32> to vector<1x8x1xf32>
    tpu.vector_store %arg7[%c2_58, %c0_59, %c0_60], %106 {strides = array<i32>} : memref<8x8x1xf32, #tpu.memory_space<vmem>>, vector<1x8x1xf32>,
    %c2_61 = arith.constant 2 : index
    %c0_62 = arith.constant 0 : index
    %c0_63 = arith.constant 0 : index
    %107 = vector.load %arg8[%c2_61, %c0_62, %c0_63] : memref<8x8x8xf32, #tpu.memory_space<vmem>>, vector<1x8x8xf32>
    %108 = vector.shape_cast %107 : vector<1x8x8xf32> to vector<8x8xf32>
    %109 = vector.broadcast %94 : vector<8x1xf32> to vector<8x8xf32>
    %110 = arith.mulf %109, %108 : vector<8x8xf32>
    %111 = arith.truncf %97 : vector<8x8xf32> to vector<8x8xbf16>
    %cst_64 = arith.constant dense<0.000000e+00> : vector<8x8xf32>
    %112 = tpu.matmul %111, %86, %cst_64 {dimension_numbers = #tpu.dot_dimension_numbers<[1], [0], [0], [1], [0, 0, 1, 1], [], []>} : vector<8x8xbf16>, vector<8x8xbf16>, vector<8x8xf32> -> vector<8x8xf32>
    %113 = arith.addf %110, %112 : vector<8x8xf32>
    %c2_65 = arith.constant 2 : index
    %c0_66 = arith.constant 0 : index
    %c0_67 = arith.constant 0 : index
    %114 = vector.load %arg8[%c2_65, %c0_66, %c0_67] : memref<8x8x8xf32, #tpu.memory_space<vmem>>, vector<1x8x8xf32>
    %115 = vector.shape_cast %114 : vector<1x8x8xf32> to vector<8x8xf32>
    %116 = vector.shape_cast %113 : vector<8x8xf32> to vector<1x8x8xf32>
    tpu.vector_store %arg8[%c2_65, %c0_66, %c0_67], %116 {strides = array<i32>} : memref<8x8x8xf32, #tpu.memory_space<vmem>>, vector<1x8x8xf32>,
    %c2_68 = arith.constant 2 : index
    %c0_69 = arith.constant 0 : index
    %c0_70 = arith.constant 0 : index
    %117 = vector.load %arg6[%c2_68, %c0_69, %c0_70] : memref<8x8x1xf32, #tpu.memory_space<vmem>>, vector<1x8x1xf32>
    %118 = vector.shape_cast %117 : vector<1x8x1xf32> to vector<8x1xf32>
    %119 = vector.shape_cast %92 : vector<8x1xf32> to vector<1x8x1xf32>
    tpu.vector_store %arg6[%c2_68, %c0_69, %c0_70], %119 {strides = array<i32>} : memref<8x8x1xf32, #tpu.memory_space<vmem>>, vector<1x8x1xf32>,
    %120 = vector.extract_strided_slice %5 {offsets = [0, 24], sizes = [8, 8], strides = [1, 1]} : vector<8x64xbf16> to vector<8x8xbf16>
    %121 = vector.extract_strided_slice %8 {offsets = [0, 24], sizes = [8, 8], strides = [1, 1]} : vector<8x64xbf16> to vector<8x8xbf16>
    %122 = vector.extract_strided_slice %11 {offsets = [0, 24], sizes = [8, 8], strides = [1, 1]} : vector<8x64xbf16> to vector<8x8xbf16>
    %cst_71 = arith.constant dense<0.000000e+00> : vector<8x8xf32>
    %123 = tpu.matmul %120, %121, %cst_71 {dimension_numbers = #tpu.dot_dimension_numbers<[1], [1], [0], [0], [0, 0, 1, 0], [], []>} : vector<8x8xbf16>, vector<8x8xbf16>, vector<8x8xf32> -> vector<8x8xf32>
    %c3 = arith.constant 3 : index
    %c0_72 = arith.constant 0 : index
    %c0_73 = arith.constant 0 : index
    %124 = vector.load %arg6[%c3, %c0_72, %c0_73] : memref<8x8x1xf32, #tpu.memory_space<vmem>>, vector<1x8x1xf32>
    %125 = vector.shape_cast %124 : vector<1x8x1xf32> to vector<8x1xf32>
    %cst_74 = arith.constant dense<0xFF800000> : vector<8xf32>
    %126 = vector.multi_reduction <maximumf>, %123, %cst_74 [1] : vector<8x8xf32> to vector<8xf32>
    %127 = vector.shape_cast %126 : vector<8xf32> to vector<8x1xf32>
    %128 = arith.maximumf %125, %127 : vector<8x1xf32>
    %129 = arith.subf %125, %128 : vector<8x1xf32>
    %130 = math.exp %129 : vector<8x1xf32>
    %131 = vector.broadcast %128 : vector<8x1xf32> to vector<8x8xf32>
    %132 = arith.subf %123, %131 : vector<8x8xf32>
    %133 = math.exp %132 : vector<8x8xf32>
    %c3_75 = arith.constant 3 : index
    %c0_76 = arith.constant 0 : index
    %c0_77 = arith.constant 0 : index
    %134 = vector.load %arg7[%c3_75, %c0_76, %c0_77] : memref<8x8x1xf32, #tpu.memory_space<vmem>>, vector<1x8x1xf32>
    %135 = vector.shape_cast %134 : vector<1x8x1xf32> to vector<8x1xf32>
    %136 = arith.mulf %130, %135 : vector<8x1xf32>
    %cst_78 = arith.constant dense<0.000000e+00> : vector<8xf32>
    %137 = vector.multi_reduction <add>, %133, %cst_78 [1] : vector<8x8xf32> to vector<8xf32>
    %138 = vector.shape_cast %137 : vector<8xf32> to vector<8x1xf32>
    %139 = arith.addf %136, %138 : vector<8x1xf32>
    %c3_79 = arith.constant 3 : index
    %c0_80 = arith.constant 0 : index
    %c0_81 = arith.constant 0 : index
    %140 = vector.load %arg7[%c3_79, %c0_80, %c0_81] : memref<8x8x1xf32, #tpu.memory_space<vmem>>, vector<1x8x1xf32>
    %141 = vector.shape_cast %140 : vector<1x8x1xf32> to vector<8x1xf32>
    %142 = vector.shape_cast %139 : vector<8x1xf32> to vector<1x8x1xf32>
    tpu.vector_store %arg7[%c3_79, %c0_80, %c0_81], %142 {strides = array<i32>} : memref<8x8x1xf32, #tpu.memory_space<vmem>>, vector<1x8x1xf32>,
    %c3_82 = arith.constant 3 : index
    %c0_83 = arith.constant 0 : index
    %c0_84 = arith.constant 0 : index
    %143 = vector.load %arg8[%c3_82, %c0_83, %c0_84] : memref<8x8x8xf32, #tpu.memory_space<vmem>>, vector<1x8x8xf32>
    %144 = vector.shape_cast %143 : vector<1x8x8xf32> to vector<8x8xf32>
    %145 = vector.broadcast %130 : vector<8x1xf32> to vector<8x8xf32>
    %146 = arith.mulf %145, %144 : vector<8x8xf32>
    %147 = arith.truncf %133 : vector<8x8xf32> to vector<8x8xbf16>
    %cst_85 = arith.constant dense<0.000000e+00> : vector<8x8xf32>
    %148 = tpu.matmul %147, %122, %cst_85 {dimension_numbers = #tpu.dot_dimension_numbers<[1], [0], [0], [1], [0, 0, 1, 1], [], []>} : vector<8x8xbf16>, vector<8x8xbf16>, vector<8x8xf32> -> vector<8x8xf32>
    %149 = arith.addf %146, %148 : vector<8x8xf32>
    %c3_86 = arith.constant 3 : index
    %c0_87 = arith.constant 0 : index
    %c0_88 = arith.constant 0 : index
    %150 = vector.load %arg8[%c3_86, %c0_87, %c0_88] : memref<8x8x8xf32, #tpu.memory_space<vmem>>, vector<1x8x8xf32>
    %151 = vector.shape_cast %150 : vector<1x8x8xf32> to vector<8x8xf32>
    %152 = vector.shape_cast %149 : vector<8x8xf32> to vector<1x8x8xf32>
    tpu.vector_store %arg8[%c3_86, %c0_87, %c0_88], %152 {strides = array<i32>} : memref<8x8x8xf32, #tpu.memory_space<vmem>>, vector<1x8x8xf32>,
    %c3_89 = arith.constant 3 : index
    %c0_90 = arith.constant 0 : index
    %c0_91 = arith.constant 0 : index
    %153 = vector.load %arg6[%c3_89, %c0_90, %c0_91] : memref<8x8x1xf32, #tpu.memory_space<vmem>>, vector<1x8x1xf32>
    %154 = vector.shape_cast %153 : vector<1x8x1xf32> to vector<8x1xf32>
    %155 = vector.shape_cast %128 : vector<8x1xf32> to vector<1x8x1xf32>
    tpu.vector_store %arg6[%c3_89, %c0_90, %c0_91], %155 {strides = array<i32>} : memref<8x8x1xf32, #tpu.memory_space<vmem>>, vector<1x8x1xf32>,
    %156 = vector.extract_strided_slice %5 {offsets = [0, 32], sizes = [8, 8], strides = [1, 1]} : vector<8x64xbf16> to vector<8x8xbf16>
    %157 = vector.extract_strided_slice %8 {offsets = [0, 32], sizes = [8, 8], strides = [1, 1]} : vector<8x64xbf16> to vector<8x8xbf16>
    %158 = vector.extract_strided_slice %11 {offsets = [0, 32], sizes = [8, 8], strides = [1, 1]} : vector<8x64xbf16> to vector<8x8xbf16>
    %cst_92 = arith.constant dense<0.000000e+00> : vector<8x8xf32>
    %159 = tpu.matmul %156, %157, %cst_92 {dimension_numbers = #tpu.dot_dimension_numbers<[1], [1], [0], [0], [0, 0, 1, 0], [], []>} : vector<8x8xbf16>, vector<8x8xbf16>, vector<8x8xf32> -> vector<8x8xf32>
    %c4 = arith.constant 4 : index
    %c0_93 = arith.constant 0 : index
    %c0_94 = arith.constant 0 : index
    %160 = vector.load %arg6[%c4, %c0_93, %c0_94] : memref<8x8x1xf32, #tpu.memory_space<vmem>>, vector<1x8x1xf32>
    %161 = vector.shape_cast %160 : vector<1x8x1xf32> to vector<8x1xf32>
    %cst_95 = arith.constant dense<0xFF800000> : vector<8xf32>
    %162 = vector.multi_reduction <maximumf>, %159, %cst_95 [1] : vector<8x8xf32> to vector<8xf32>
    %163 = vector.shape_cast %162 : vector<8xf32> to vector<8x1xf32>
    %164 = arith.maximumf %161, %163 : vector<8x1xf32>
    %165 = arith.subf %161, %164 : vector<8x1xf32>
    %166 = math.exp %165 : vector<8x1xf32>
    %167 = vector.broadcast %164 : vector<8x1xf32> to vector<8x8xf32>
    %168 = arith.subf %159, %167 : vector<8x8xf32>
    %169 = math.exp %168 : vector<8x8xf32>
    %c4_96 = arith.constant 4 : index
    %c0_97 = arith.constant 0 : index
    %c0_98 = arith.constant 0 : index
    %170 = vector.load %arg7[%c4_96, %c0_97, %c0_98] : memref<8x8x1xf32, #tpu.memory_space<vmem>>, vector<1x8x1xf32>
    %171 = vector.shape_cast %170 : vector<1x8x1xf32> to vector<8x1xf32>
    %172 = arith.mulf %166, %171 : vector<8x1xf32>
    %cst_99 = arith.constant dense<0.000000e+00> : vector<8xf32>
    %173 = vector.multi_reduction <add>, %169, %cst_99 [1] : vector<8x8xf32> to vector<8xf32>
    %174 = vector.shape_cast %173 : vector<8xf32> to vector<8x1xf32>
    %175 = arith.addf %172, %174 : vector<8x1xf32>
    %c4_100 = arith.constant 4 : index
    %c0_101 = arith.constant 0 : index
    %c0_102 = arith.constant 0 : index
    %176 = vector.load %arg7[%c4_100, %c0_101, %c0_102] : memref<8x8x1xf32, #tpu.memory_space<vmem>>, vector<1x8x1xf32>
    %177 = vector.shape_cast %176 : vector<1x8x1xf32> to vector<8x1xf32>
    %178 = vector.shape_cast %175 : vector<8x1xf32> to vector<1x8x1xf32>
    tpu.vector_store %arg7[%c4_100, %c0_101, %c0_102], %178 {strides = array<i32>} : memref<8x8x1xf32, #tpu.memory_space<vmem>>, vector<1x8x1xf32>,
    %c4_103 = arith.constant 4 : index
    %c0_104 = arith.constant 0 : index
    %c0_105 = arith.constant 0 : index
    %179 = vector.load %arg8[%c4_103, %c0_104, %c0_105] : memref<8x8x8xf32, #tpu.memory_space<vmem>>, vector<1x8x8xf32>
    %180 = vector.shape_cast %179 : vector<1x8x8xf32> to vector<8x8xf32>
    %181 = vector.broadcast %166 : vector<8x1xf32> to vector<8x8xf32>
    %182 = arith.mulf %181, %180 : vector<8x8xf32>
    %183 = arith.truncf %169 : vector<8x8xf32> to vector<8x8xbf16>
    %cst_106 = arith.constant dense<0.000000e+00> : vector<8x8xf32>
    %184 = tpu.matmul %183, %158, %cst_106 {dimension_numbers = #tpu.dot_dimension_numbers<[1], [0], [0], [1], [0, 0, 1, 1], [], []>} : vector<8x8xbf16>, vector<8x8xbf16>, vector<8x8xf32> -> vector<8x8xf32>
    %185 = arith.addf %182, %184 : vector<8x8xf32>
    %c4_107 = arith.constant 4 : index
    %c0_108 = arith.constant 0 : index
    %c0_109 = arith.constant 0 : index
    %186 = vector.load %arg8[%c4_107, %c0_108, %c0_109] : memref<8x8x8xf32, #tpu.memory_space<vmem>>, vector<1x8x8xf32>
    %187 = vector.shape_cast %186 : vector<1x8x8xf32> to vector<8x8xf32>
    %188 = vector.shape_cast %185 : vector<8x8xf32> to vector<1x8x8xf32>
    tpu.vector_store %arg8[%c4_107, %c0_108, %c0_109], %188 {strides = array<i32>} : memref<8x8x8xf32, #tpu.memory_space<vmem>>, vector<1x8x8xf32>,
    %c4_110 = arith.constant 4 : index
    %c0_111 = arith.constant 0 : index
    %c0_112 = arith.constant 0 : index
    %189 = vector.load %arg6[%c4_110, %c0_111, %c0_112] : memref<8x8x1xf32, #tpu.memory_space<vmem>>, vector<1x8x1xf32>
    %190 = vector.shape_cast %189 : vector<1x8x1xf32> to vector<8x1xf32>
    %191 = vector.shape_cast %164 : vector<8x1xf32> to vector<1x8x1xf32>
    tpu.vector_store %arg6[%c4_110, %c0_111, %c0_112], %191 {strides = array<i32>} : memref<8x8x1xf32, #tpu.memory_space<vmem>>, vector<1x8x1xf32>,
    %192 = vector.extract_strided_slice %5 {offsets = [0, 40], sizes = [8, 8], strides = [1, 1]} : vector<8x64xbf16> to vector<8x8xbf16>
    %193 = vector.extract_strided_slice %8 {offsets = [0, 40], sizes = [8, 8], strides = [1, 1]} : vector<8x64xbf16> to vector<8x8xbf16>
    %194 = vector.extract_strided_slice %11 {offsets = [0, 40], sizes = [8, 8], strides = [1, 1]} : vector<8x64xbf16> to vector<8x8xbf16>
    %cst_113 = arith.constant dense<0.000000e+00> : vector<8x8xf32>
    %195 = tpu.matmul %192, %193, %cst_113 {dimension_numbers = #tpu.dot_dimension_numbers<[1], [1], [0], [0], [0, 0, 1, 0], [], []>} : vector<8x8xbf16>, vector<8x8xbf16>, vector<8x8xf32> -> vector<8x8xf32>
    %c5 = arith.constant 5 : index
    %c0_114 = arith.constant 0 : index
    %c0_115 = arith.constant 0 : index
    %196 = vector.load %arg6[%c5, %c0_114, %c0_115] : memref<8x8x1xf32, #tpu.memory_space<vmem>>, vector<1x8x1xf32>
    %197 = vector.shape_cast %196 : vector<1x8x1xf32> to vector<8x1xf32>
    %cst_116 = arith.constant dense<0xFF800000> : vector<8xf32>
    %198 = vector.multi_reduction <maximumf>, %195, %cst_116 [1] : vector<8x8xf32> to vector<8xf32>
    %199 = vector.shape_cast %198 : vector<8xf32> to vector<8x1xf32>
    %200 = arith.maximumf %197, %199 : vector<8x1xf32>
    %201 = arith.subf %197, %200 : vector<8x1xf32>
    %202 = math.exp %201 : vector<8x1xf32>
    %203 = vector.broadcast %200 : vector<8x1xf32> to vector<8x8xf32>
    %204 = arith.subf %195, %203 : vector<8x8xf32>
    %205 = math.exp %204 : vector<8x8xf32>
    %c5_117 = arith.constant 5 : index
    %c0_118 = arith.constant 0 : index
    %c0_119 = arith.constant 0 : index
    %206 = vector.load %arg7[%c5_117, %c0_118, %c0_119] : memref<8x8x1xf32, #tpu.memory_space<vmem>>, vector<1x8x1xf32>
    %207 = vector.shape_cast %206 : vector<1x8x1xf32> to vector<8x1xf32>
    %208 = arith.mulf %202, %207 : vector<8x1xf32>
    %cst_120 = arith.constant dense<0.000000e+00> : vector<8xf32>
    %209 = vector.multi_reduction <add>, %205, %cst_120 [1] : vector<8x8xf32> to vector<8xf32>
    %210 = vector.shape_cast %209 : vector<8xf32> to vector<8x1xf32>
    %211 = arith.addf %208, %210 : vector<8x1xf32>
    %c5_121 = arith.constant 5 : index
    %c0_122 = arith.constant 0 : index
    %c0_123 = arith.constant 0 : index
    %212 = vector.load %arg7[%c5_121, %c0_122, %c0_123] : memref<8x8x1xf32, #tpu.memory_space<vmem>>, vector<1x8x1xf32>
    %213 = vector.shape_cast %212 : vector<1x8x1xf32> to vector<8x1xf32>
    %214 = vector.shape_cast %211 : vector<8x1xf32> to vector<1x8x1xf32>
    tpu.vector_store %arg7[%c5_121, %c0_122, %c0_123], %214 {strides = array<i32>} : memref<8x8x1xf32, #tpu.memory_space<vmem>>, vector<1x8x1xf32>,
    %c5_124 = arith.constant 5 : index
    %c0_125 = arith.constant 0 : index
    %c0_126 = arith.constant 0 : index
    %215 = vector.load %arg8[%c5_124, %c0_125, %c0_126] : memref<8x8x8xf32, #tpu.memory_space<vmem>>, vector<1x8x8xf32>
    %216 = vector.shape_cast %215 : vector<1x8x8xf32> to vector<8x8xf32>
    %217 = vector.broadcast %202 : vector<8x1xf32> to vector<8x8xf32>
    %218 = arith.mulf %217, %216 : vector<8x8xf32>
    %219 = arith.truncf %205 : vector<8x8xf32> to vector<8x8xbf16>
    %cst_127 = arith.constant dense<0.000000e+00> : vector<8x8xf32>
    %220 = tpu.matmul %219, %194, %cst_127 {dimension_numbers = #tpu.dot_dimension_numbers<[1], [0], [0], [1], [0, 0, 1, 1], [], []>} : vector<8x8xbf16>, vector<8x8xbf16>, vector<8x8xf32> -> vector<8x8xf32>
    %221 = arith.addf %218, %220 : vector<8x8xf32>
    %c5_128 = arith.constant 5 : index
    %c0_129 = arith.constant 0 : index
    %c0_130 = arith.constant 0 : index
    %222 = vector.load %arg8[%c5_128, %c0_129, %c0_130] : memref<8x8x8xf32, #tpu.memory_space<vmem>>, vector<1x8x8xf32>
    %223 = vector.shape_cast %222 : vector<1x8x8xf32> to vector<8x8xf32>
    %224 = vector.shape_cast %221 : vector<8x8xf32> to vector<1x8x8xf32>
    tpu.vector_store %arg8[%c5_128, %c0_129, %c0_130], %224 {strides = array<i32>} : memref<8x8x8xf32, #tpu.memory_space<vmem>>, vector<1x8x8xf32>,
    %c5_131 = arith.constant 5 : index
    %c0_132 = arith.constant 0 : index
    %c0_133 = arith.constant 0 : index
    %225 = vector.load %arg6[%c5_131, %c0_132, %c0_133] : memref<8x8x1xf32, #tpu.memory_space<vmem>>, vector<1x8x1xf32>
    %226 = vector.shape_cast %225 : vector<1x8x1xf32> to vector<8x1xf32>
    %227 = vector.shape_cast %200 : vector<8x1xf32> to vector<1x8x1xf32>
    tpu.vector_store %arg6[%c5_131, %c0_132, %c0_133], %227 {strides = array<i32>} : memref<8x8x1xf32, #tpu.memory_space<vmem>>, vector<1x8x1xf32>,
    %228 = vector.extract_strided_slice %5 {offsets = [0, 48], sizes = [8, 8], strides = [1, 1]} : vector<8x64xbf16> to vector<8x8xbf16>
    %229 = vector.extract_strided_slice %8 {offsets = [0, 48], sizes = [8, 8], strides = [1, 1]} : vector<8x64xbf16> to vector<8x8xbf16>
    %230 = vector.extract_strided_slice %11 {offsets = [0, 48], sizes = [8, 8], strides = [1, 1]} : vector<8x64xbf16> to vector<8x8xbf16>
    %cst_134 = arith.constant dense<0.000000e+00> : vector<8x8xf32>
    %231 = tpu.matmul %228, %229, %cst_134 {dimension_numbers = #tpu.dot_dimension_numbers<[1], [1], [0], [0], [0, 0, 1, 0], [], []>} : vector<8x8xbf16>, vector<8x8xbf16>, vector<8x8xf32> -> vector<8x8xf32>
    %c6 = arith.constant 6 : index
    %c0_135 = arith.constant 0 : index
    %c0_136 = arith.constant 0 : index
    %232 = vector.load %arg6[%c6, %c0_135, %c0_136] : memref<8x8x1xf32, #tpu.memory_space<vmem>>, vector<1x8x1xf32>
    %233 = vector.shape_cast %232 : vector<1x8x1xf32> to vector<8x1xf32>
    %cst_137 = arith.constant dense<0xFF800000> : vector<8xf32>
    %234 = vector.multi_reduction <maximumf>, %231, %cst_137 [1] : vector<8x8xf32> to vector<8xf32>
    %235 = vector.shape_cast %234 : vector<8xf32> to vector<8x1xf32>
    %236 = arith.maximumf %233, %235 : vector<8x1xf32>
    %237 = arith.subf %233, %236 : vector<8x1xf32>
    %238 = math.exp %237 : vector<8x1xf32>
    %239 = vector.broadcast %236 : vector<8x1xf32> to vector<8x8xf32>
    %240 = arith.subf %231, %239 : vector<8x8xf32>
    %241 = math.exp %240 : vector<8x8xf32>
    %c6_138 = arith.constant 6 : index
    %c0_139 = arith.constant 0 : index
    %c0_140 = arith.constant 0 : index
    %242 = vector.load %arg7[%c6_138, %c0_139, %c0_140] : memref<8x8x1xf32, #tpu.memory_space<vmem>>, vector<1x8x1xf32>
    %243 = vector.shape_cast %242 : vector<1x8x1xf32> to vector<8x1xf32>
    %244 = arith.mulf %238, %243 : vector<8x1xf32>
    %cst_141 = arith.constant dense<0.000000e+00> : vector<8xf32>
    %245 = vector.multi_reduction <add>, %241, %cst_141 [1] : vector<8x8xf32> to vector<8xf32>
    %246 = vector.shape_cast %245 : vector<8xf32> to vector<8x1xf32>
    %247 = arith.addf %244, %246 : vector<8x1xf32>
    %c6_142 = arith.constant 6 : index
    %c0_143 = arith.constant 0 : index
    %c0_144 = arith.constant 0 : index
    %248 = vector.load %arg7[%c6_142, %c0_143, %c0_144] : memref<8x8x1xf32, #tpu.memory_space<vmem>>, vector<1x8x1xf32>
    %249 = vector.shape_cast %248 : vector<1x8x1xf32> to vector<8x1xf32>
    %250 = vector.shape_cast %247 : vector<8x1xf32> to vector<1x8x1xf32>
    tpu.vector_store %arg7[%c6_142, %c0_143, %c0_144], %250 {strides = array<i32>} : memref<8x8x1xf32, #tpu.memory_space<vmem>>, vector<1x8x1xf32>,
    %c6_145 = arith.constant 6 : index
    %c0_146 = arith.constant 0 : index
    %c0_147 = arith.constant 0 : index
    %251 = vector.load %arg8[%c6_145, %c0_146, %c0_147] : memref<8x8x8xf32, #tpu.memory_space<vmem>>, vector<1x8x8xf32>
    %252 = vector.shape_cast %251 : vector<1x8x8xf32> to vector<8x8xf32>
    %253 = vector.broadcast %238 : vector<8x1xf32> to vector<8x8xf32>
    %254 = arith.mulf %253, %252 : vector<8x8xf32>
    %255 = arith.truncf %241 : vector<8x8xf32> to vector<8x8xbf16>
    %cst_148 = arith.constant dense<0.000000e+00> : vector<8x8xf32>
    %256 = tpu.matmul %255, %230, %cst_148 {dimension_numbers = #tpu.dot_dimension_numbers<[1], [0], [0], [1], [0, 0, 1, 1], [], []>} : vector<8x8xbf16>, vector<8x8xbf16>, vector<8x8xf32> -> vector<8x8xf32>
    %257 = arith.addf %254, %256 : vector<8x8xf32>
    %c6_149 = arith.constant 6 : index
    %c0_150 = arith.constant 0 : index
    %c0_151 = arith.constant 0 : index
    %258 = vector.load %arg8[%c6_149, %c0_150, %c0_151] : memref<8x8x8xf32, #tpu.memory_space<vmem>>, vector<1x8x8xf32>
    %259 = vector.shape_cast %258 : vector<1x8x8xf32> to vector<8x8xf32>
    %260 = vector.shape_cast %257 : vector<8x8xf32> to vector<1x8x8xf32>
    tpu.vector_store %arg8[%c6_149, %c0_150, %c0_151], %260 {strides = array<i32>} : memref<8x8x8xf32, #tpu.memory_space<vmem>>, vector<1x8x8xf32>,
    %c6_152 = arith.constant 6 : index
    %c0_153 = arith.constant 0 : index
    %c0_154 = arith.constant 0 : index
    %261 = vector.load %arg6[%c6_152, %c0_153, %c0_154] : memref<8x8x1xf32, #tpu.memory_space<vmem>>, vector<1x8x1xf32>
    %262 = vector.shape_cast %261 : vector<1x8x1xf32> to vector<8x1xf32>
    %263 = vector.shape_cast %236 : vector<8x1xf32> to vector<1x8x1xf32>
    tpu.vector_store %arg6[%c6_152, %c0_153, %c0_154], %263 {strides = array<i32>} : memref<8x8x1xf32, #tpu.memory_space<vmem>>, vector<1x8x1xf32>,
    %264 = vector.extract_strided_slice %5 {offsets = [0, 56], sizes = [8, 8], strides = [1, 1]} : vector<8x64xbf16> to vector<8x8xbf16>
    %265 = vector.extract_strided_slice %8 {offsets = [0, 56], sizes = [8, 8], strides = [1, 1]} : vector<8x64xbf16> to vector<8x8xbf16>
    %266 = vector.extract_strided_slice %11 {offsets = [0, 56], sizes = [8, 8], strides = [1, 1]} : vector<8x64xbf16> to vector<8x8xbf16>
    %cst_155 = arith.constant dense<0.000000e+00> : vector<8x8xf32>
    %267 = tpu.matmul %264, %265, %cst_155 {dimension_numbers = #tpu.dot_dimension_numbers<[1], [1], [0], [0], [0, 0, 1, 0], [], []>} : vector<8x8xbf16>, vector<8x8xbf16>, vector<8x8xf32> -> vector<8x8xf32>
    %c7 = arith.constant 7 : index
    %c0_156 = arith.constant 0 : index
    %c0_157 = arith.constant 0 : index
    %268 = vector.load %arg6[%c7, %c0_156, %c0_157] : memref<8x8x1xf32, #tpu.memory_space<vmem>>, vector<1x8x1xf32>
    %269 = vector.shape_cast %268 : vector<1x8x1xf32> to vector<8x1xf32>
    %cst_158 = arith.constant dense<0xFF800000> : vector<8xf32>
    %270 = vector.multi_reduction <maximumf>, %267, %cst_158 [1] : vector<8x8xf32> to vector<8xf32>
    %271 = vector.shape_cast %270 : vector<8xf32> to vector<8x1xf32>
    %272 = arith.maximumf %269, %271 : vector<8x1xf32>
    %273 = arith.subf %269, %272 : vector<8x1xf32>
    %274 = math.exp %273 : vector<8x1xf32>
    %275 = vector.broadcast %272 : vector<8x1xf32> to vector<8x8xf32>
    %276 = arith.subf %267, %275 : vector<8x8xf32>
    %277 = math.exp %276 : vector<8x8xf32>
    %c7_159 = arith.constant 7 : index
    %c0_160 = arith.constant 0 : index
    %c0_161 = arith.constant 0 : index
    %278 = vector.load %arg7[%c7_159, %c0_160, %c0_161] : memref<8x8x1xf32, #tpu.memory_space<vmem>>, vector<1x8x1xf32>
    %279 = vector.shape_cast %278 : vector<1x8x1xf32> to vector<8x1xf32>
    %280 = arith.mulf %274, %279 : vector<8x1xf32>
    %cst_162 = arith.constant dense<0.000000e+00> : vector<8xf32>
    %281 = vector.multi_reduction <add>, %277, %cst_162 [1] : vector<8x8xf32> to vector<8xf32>
    %282 = vector.shape_cast %281 : vector<8xf32> to vector<8x1xf32>
    %283 = arith.addf %280, %282 : vector<8x1xf32>
    %c7_163 = arith.constant 7 : index
    %c0_164 = arith.constant 0 : index
    %c0_165 = arith.constant 0 : index
    %284 = vector.load %arg7[%c7_163, %c0_164, %c0_165] : memref<8x8x1xf32, #tpu.memory_space<vmem>>, vector<1x8x1xf32>
    %285 = vector.shape_cast %284 : vector<1x8x1xf32> to vector<8x1xf32>
    %286 = vector.shape_cast %283 : vector<8x1xf32> to vector<1x8x1xf32>
    tpu.vector_store %arg7[%c7_163, %c0_164, %c0_165], %286 {strides = array<i32>} : memref<8x8x1xf32, #tpu.memory_space<vmem>>, vector<1x8x1xf32>,
    %c7_166 = arith.constant 7 : index
    %c0_167 = arith.constant 0 : index
    %c0_168 = arith.constant 0 : index
    %287 = vector.load %arg8[%c7_166, %c0_167, %c0_168] : memref<8x8x8xf32, #tpu.memory_space<vmem>>, vector<1x8x8xf32>
    %288 = vector.shape_cast %287 : vector<1x8x8xf32> to vector<8x8xf32>
    %289 = vector.broadcast %274 : vector<8x1xf32> to vector<8x8xf32>
    %290 = arith.mulf %289, %288 : vector<8x8xf32>
    %291 = arith.truncf %277 : vector<8x8xf32> to vector<8x8xbf16>
    %cst_169 = arith.constant dense<0.000000e+00> : vector<8x8xf32>
    %292 = tpu.matmul %291, %266, %cst_169 {dimension_numbers = #tpu.dot_dimension_numbers<[1], [0], [0], [1], [0, 0, 1, 1], [], []>} : vector<8x8xbf16>, vector<8x8xbf16>, vector<8x8xf32> -> vector<8x8xf32>
    %293 = arith.addf %290, %292 : vector<8x8xf32>
    %c7_170 = arith.constant 7 : index
    %c0_171 = arith.constant 0 : index
    %c0_172 = arith.constant 0 : index
    %294 = vector.load %arg8[%c7_170, %c0_171, %c0_172] : memref<8x8x8xf32, #tpu.memory_space<vmem>>, vector<1x8x8xf32>
    %295 = vector.shape_cast %294 : vector<1x8x8xf32> to vector<8x8xf32>
    %296 = vector.shape_cast %293 : vector<8x8xf32> to vector<1x8x8xf32>
    tpu.vector_store %arg8[%c7_170, %c0_171, %c0_172], %296 {strides = array<i32>} : memref<8x8x8xf32, #tpu.memory_space<vmem>>, vector<1x8x8xf32>,
    %c7_173 = arith.constant 7 : index
    %c0_174 = arith.constant 0 : index
    %c0_175 = arith.constant 0 : index
    %297 = vector.load %arg6[%c7_173, %c0_174, %c0_175] : memref<8x8x1xf32, #tpu.memory_space<vmem>>, vector<1x8x1xf32>
    %298 = vector.shape_cast %297 : vector<1x8x1xf32> to vector<8x1xf32>
    %299 = vector.shape_cast %272 : vector<8x1xf32> to vector<1x8x1xf32>
    tpu.vector_store %arg6[%c7_173, %c0_174, %c0_175], %299 {strides = array<i32>} : memref<8x8x1xf32, #tpu.memory_space<vmem>>, vector<1x8x1xf32>,
    %c0_i32_176 = arith.constant 0 : i32
    %300 = arith.cmpi eq, %arg2, %c0_i32_176 : i32
    %301 = arith.extui %300 : i1 to i32
    %c0_i32_177 = arith.constant 0 : i32
    %302 = arith.cmpi ne, %301, %c0_i32_177 : i32
    scf.if %302 {
      %c0_178 = arith.constant 0 : index
      %c0_179 = arith.constant 0 : index
      %c0_180 = arith.constant 0 : index
      %303 = vector.load %arg7[%c0_178, %c0_179, %c0_180] : memref<8x8x1xf32, #tpu.memory_space<vmem>>, vector<1x8x1xf32>
      %304 = vector.shape_cast %303 : vector<1x8x1xf32> to vector<8x1xf32>
      %305 = tpu.reciprocal %304 {approx = true} : vector<8x1xf32> -> vector<8x1xf32>
      %c0_181 = arith.constant 0 : index
      %c0_182 = arith.constant 0 : index
      %c0_183 = arith.constant 0 : index
      %306 = vector.load %arg8[%c0_181, %c0_182, %c0_183] : memref<8x8x8xf32, #tpu.memory_space<vmem>>, vector<1x8x8xf32>
      %307 = vector.shape_cast %306 : vector<1x8x8xf32> to vector<8x8xf32>
      %308 = vector.broadcast %305 : vector<8x1xf32> to vector<8x8xf32>
      %309 = arith.mulf %307, %308 : vector<8x8xf32>
      %c0_184 = arith.constant 0 : index
      %c0_185 = arith.constant 0 : index
      %c0_186 = arith.constant 0 : index
      %310 = vector.load %arg5[%c0_184, %c0_185, %c0_186] : memref<1x8x64xf32, #tpu.memory_space<vmem>>, vector<1x8x8xf32>
      %311 = vector.shape_cast %310 : vector<1x8x8xf32> to vector<8x8xf32>
      %312 = vector.shape_cast %309 : vector<8x8xf32> to vector<1x8x8xf32>
      tpu.vector_store %arg5[%c0_184, %c0_185, %c0_186], %312 {strides = array<i32>} : memref<1x8x64xf32, #tpu.memory_space<vmem>>, vector<1x8x8xf32>,
      %c1_187 = arith.constant 1 : index
      %c0_188 = arith.constant 0 : index
      %c0_189 = arith.constant 0 : index
      %313 = vector.load %arg7[%c1_187, %c0_188, %c0_189] : memref<8x8x1xf32, #tpu.memory_space<vmem>>, vector<1x8x1xf32>
      %314 = vector.shape_cast %313 : vector<1x8x1xf32> to vector<8x1xf32>
      %315 = tpu.reciprocal %314 {approx = true} : vector<8x1xf32> -> vector<8x1xf32>
      %c1_190 = arith.constant 1 : index
      %c0_191 = arith.constant 0 : index
      %c0_192 = arith.constant 0 : index
      %316 = vector.load %arg8[%c1_190, %c0_191, %c0_192] : memref<8x8x8xf32, #tpu.memory_space<vmem>>, vector<1x8x8xf32>
      %317 = vector.shape_cast %316 : vector<1x8x8xf32> to vector<8x8xf32>
      %318 = vector.broadcast %315 : vector<8x1xf32> to vector<8x8xf32>
      %319 = arith.mulf %317, %318 : vector<8x8xf32>
      %c0_193 = arith.constant 0 : index
      %c0_194 = arith.constant 0 : index
      %c8 = arith.constant 8 : index
      %320 = vector.load %arg5[%c0_193, %c0_194, %c8] : memref<1x8x64xf32, #tpu.memory_space<vmem>>, vector<1x8x8xf32>
      %321 = vector.shape_cast %320 : vector<1x8x8xf32> to vector<8x8xf32>
      %322 = vector.shape_cast %319 : vector<8x8xf32> to vector<1x8x8xf32>
      tpu.vector_store %arg5[%c0_193, %c0_194, %c8], %322 {strides = array<i32>} : memref<1x8x64xf32, #tpu.memory_space<vmem>>, vector<1x8x8xf32>,
      %c2_195 = arith.constant 2 : index
      %c0_196 = arith.constant 0 : index
      %c0_197 = arith.constant 0 : index
      %323 = vector.load %arg7[%c2_195, %c0_196, %c0_197] : memref<8x8x1xf32, #tpu.memory_space<vmem>>, vector<1x8x1xf32>
      %324 = vector.shape_cast %323 : vector<1x8x1xf32> to vector<8x1xf32>
      %325 = tpu.reciprocal %324 {approx = true} : vector<8x1xf32> -> vector<8x1xf32>
      %c2_198 = arith.constant 2 : index
      %c0_199 = arith.constant 0 : index
      %c0_200 = arith.constant 0 : index
      %326 = vector.load %arg8[%c2_198, %c0_199, %c0_200] : memref<8x8x8xf32, #tpu.memory_space<vmem>>, vector<1x8x8xf32>
      %327 = vector.shape_cast %326 : vector<1x8x8xf32> to vector<8x8xf32>
      %328 = vector.broadcast %325 : vector<8x1xf32> to vector<8x8xf32>
      %329 = arith.mulf %327, %328 : vector<8x8xf32>
      %c0_201 = arith.constant 0 : index
      %c0_202 = arith.constant 0 : index
      %c16 = arith.constant 16 : index
      %330 = vector.load %arg5[%c0_201, %c0_202, %c16] : memref<1x8x64xf32, #tpu.memory_space<vmem>>, vector<1x8x8xf32>
      %331 = vector.shape_cast %330 : vector<1x8x8xf32> to vector<8x8xf32>
      %332 = vector.shape_cast %329 : vector<8x8xf32> to vector<1x8x8xf32>
      tpu.vector_store %arg5[%c0_201, %c0_202, %c16], %332 {strides = array<i32>} : memref<1x8x64xf32, #tpu.memory_space<vmem>>, vector<1x8x8xf32>,
      %c3_203 = arith.constant 3 : index
      %c0_204 = arith.constant 0 : index
      %c0_205 = arith.constant 0 : index
      %333 = vector.load %arg7[%c3_203, %c0_204, %c0_205] : memref<8x8x1xf32, #tpu.memory_space<vmem>>, vector<1x8x1xf32>
      %334 = vector.shape_cast %333 : vector<1x8x1xf32> to vector<8x1xf32>
      %335 = tpu.reciprocal %334 {approx = true} : vector<8x1xf32> -> vector<8x1xf32>
      %c3_206 = arith.constant 3 : index
      %c0_207 = arith.constant 0 : index
      %c0_208 = arith.constant 0 : index
      %336 = vector.load %arg8[%c3_206, %c0_207, %c0_208] : memref<8x8x8xf32, #tpu.memory_space<vmem>>, vector<1x8x8xf32>
      %337 = vector.shape_cast %336 : vector<1x8x8xf32> to vector<8x8xf32>
      %338 = vector.broadcast %335 : vector<8x1xf32> to vector<8x8xf32>
      %339 = arith.mulf %337, %338 : vector<8x8xf32>
      %c0_209 = arith.constant 0 : index
      %c0_210 = arith.constant 0 : index
      %c24 = arith.constant 24 : index
      %340 = vector.load %arg5[%c0_209, %c0_210, %c24] : memref<1x8x64xf32, #tpu.memory_space<vmem>>, vector<1x8x8xf32>
      %341 = vector.shape_cast %340 : vector<1x8x8xf32> to vector<8x8xf32>
      %342 = vector.shape_cast %339 : vector<8x8xf32> to vector<1x8x8xf32>
      tpu.vector_store %arg5[%c0_209, %c0_210, %c24], %342 {strides = array<i32>} : memref<1x8x64xf32, #tpu.memory_space<vmem>>, vector<1x8x8xf32>,
      %c4_211 = arith.constant 4 : index
      %c0_212 = arith.constant 0 : index
      %c0_213 = arith.constant 0 : index
      %343 = vector.load %arg7[%c4_211, %c0_212, %c0_213] : memref<8x8x1xf32, #tpu.memory_space<vmem>>, vector<1x8x1xf32>
      %344 = vector.shape_cast %343 : vector<1x8x1xf32> to vector<8x1xf32>
      %345 = tpu.reciprocal %344 {approx = true} : vector<8x1xf32> -> vector<8x1xf32>
      %c4_214 = arith.constant 4 : index
      %c0_215 = arith.constant 0 : index
      %c0_216 = arith.constant 0 : index
      %346 = vector.load %arg8[%c4_214, %c0_215, %c0_216] : memref<8x8x8xf32, #tpu.memory_space<vmem>>, vector<1x8x8xf32>
      %347 = vector.shape_cast %346 : vector<1x8x8xf32> to vector<8x8xf32>
      %348 = vector.broadcast %345 : vector<8x1xf32> to vector<8x8xf32>
      %349 = arith.mulf %347, %348 : vector<8x8xf32>
      %c0_217 = arith.constant 0 : index
      %c0_218 = arith.constant 0 : index
      %c32 = arith.constant 32 : index
      %350 = vector.load %arg5[%c0_217, %c0_218, %c32] : memref<1x8x64xf32, #tpu.memory_space<vmem>>, vector<1x8x8xf32>
      %351 = vector.shape_cast %350 : vector<1x8x8xf32> to vector<8x8xf32>
      %352 = vector.shape_cast %349 : vector<8x8xf32> to vector<1x8x8xf32>
      tpu.vector_store %arg5[%c0_217, %c0_218, %c32], %352 {strides = array<i32>} : memref<1x8x64xf32, #tpu.memory_space<vmem>>, vector<1x8x8xf32>,
      %c5_219 = arith.constant 5 : index
      %c0_220 = arith.constant 0 : index
      %c0_221 = arith.constant 0 : index
      %353 = vector.load %arg7[%c5_219, %c0_220, %c0_221] : memref<8x8x1xf32, #tpu.memory_space<vmem>>, vector<1x8x1xf32>
      %354 = vector.shape_cast %353 : vector<1x8x1xf32> to vector<8x1xf32>
      %355 = tpu.reciprocal %354 {approx = true} : vector<8x1xf32> -> vector<8x1xf32>
      %c5_222 = arith.constant 5 : index
      %c0_223 = arith.constant 0 : index
      %c0_224 = arith.constant 0 : index
      %356 = vector.load %arg8[%c5_222, %c0_223, %c0_224] : memref<8x8x8xf32, #tpu.memory_space<vmem>>, vector<1x8x8xf32>
      %357 = vector.shape_cast %356 : vector<1x8x8xf32> to vector<8x8xf32>
      %358 = vector.broadcast %355 : vector<8x1xf32> to vector<8x8xf32>
      %359 = arith.mulf %357, %358 : vector<8x8xf32>
      %c0_225 = arith.constant 0 : index
      %c0_226 = arith.constant 0 : index
      %c40 = arith.constant 40 : index
      %360 = vector.load %arg5[%c0_225, %c0_226, %c40] : memref<1x8x64xf32, #tpu.memory_space<vmem>>, vector<1x8x8xf32>
      %361 = vector.shape_cast %360 : vector<1x8x8xf32> to vector<8x8xf32>
      %362 = vector.shape_cast %359 : vector<8x8xf32> to vector<1x8x8xf32>
      tpu.vector_store %arg5[%c0_225, %c0_226, %c40], %362 {strides = array<i32>} : memref<1x8x64xf32, #tpu.memory_space<vmem>>, vector<1x8x8xf32>,
      %c6_227 = arith.constant 6 : index
      %c0_228 = arith.constant 0 : index
      %c0_229 = arith.constant 0 : index
      %363 = vector.load %arg7[%c6_227, %c0_228, %c0_229] : memref<8x8x1xf32, #tpu.memory_space<vmem>>, vector<1x8x1xf32>
      %364 = vector.shape_cast %363 : vector<1x8x1xf32> to vector<8x1xf32>
      %365 = tpu.reciprocal %364 {approx = true} : vector<8x1xf32> -> vector<8x1xf32>
      %c6_230 = arith.constant 6 : index
      %c0_231 = arith.constant 0 : index
      %c0_232 = arith.constant 0 : index
      %366 = vector.load %arg8[%c6_230, %c0_231, %c0_232] : memref<8x8x8xf32, #tpu.memory_space<vmem>>, vector<1x8x8xf32>
      %367 = vector.shape_cast %366 : vector<1x8x8xf32> to vector<8x8xf32>
      %368 = vector.broadcast %365 : vector<8x1xf32> to vector<8x8xf32>
      %369 = arith.mulf %367, %368 : vector<8x8xf32>
      %c0_233 = arith.constant 0 : index
      %c0_234 = arith.constant 0 : index
      %c48 = arith.constant 48 : index
      %370 = vector.load %arg5[%c0_233, %c0_234, %c48] : memref<1x8x64xf32, #tpu.memory_space<vmem>>, vector<1x8x8xf32>
      %371 = vector.shape_cast %370 : vector<1x8x8xf32> to vector<8x8xf32>
      %372 = vector.shape_cast %369 : vector<8x8xf32> to vector<1x8x8xf32>
      tpu.vector_store %arg5[%c0_233, %c0_234, %c48], %372 {strides = array<i32>} : memref<1x8x64xf32, #tpu.memory_space<vmem>>, vector<1x8x8xf32>,
      %c7_235 = arith.constant 7 : index
      %c0_236 = arith.constant 0 : index
      %c0_237 = arith.constant 0 : index
      %373 = vector.load %arg7[%c7_235, %c0_236, %c0_237] : memref<8x8x1xf32, #tpu.memory_space<vmem>>, vector<1x8x1xf32>
      %374 = vector.shape_cast %373 : vector<1x8x1xf32> to vector<8x1xf32>
      %375 = tpu.reciprocal %374 {approx = true} : vector<8x1xf32> -> vector<8x1xf32>
      %c7_238 = arith.constant 7 : index
      %c0_239 = arith.constant 0 : index
      %c0_240 = arith.constant 0 : index
      %376 = vector.load %arg8[%c7_238, %c0_239, %c0_240] : memref<8x8x8xf32, #tpu.memory_space<vmem>>, vector<1x8x8xf32>
      %377 = vector.shape_cast %376 : vector<1x8x8xf32> to vector<8x8xf32>
      %378 = vector.broadcast %375 : vector<8x1xf32> to vector<8x8xf32>
      %379 = arith.mulf %377, %378 : vector<8x8xf32>
      %c0_241 = arith.constant 0 : index
      %c0_242 = arith.constant 0 : index
      %c56 = arith.constant 56 : index
      %380 = vector.load %arg5[%c0_241, %c0_242, %c56] : memref<1x8x64xf32, #tpu.memory_space<vmem>>, vector<1x8x8xf32>
      %381 = vector.shape_cast %380 : vector<1x8x8xf32> to vector<8x8xf32>
      %382 = vector.shape_cast %379 : vector<8x8xf32> to vector<1x8x8xf32>
      tpu.vector_store %arg5[%c0_241, %c0_242, %c56], %382 {strides = array<i32>} : memref<1x8x64xf32, #tpu.memory_space<vmem>>, vector<1x8x8xf32>,
    } else {
    }
    return
  }
  func.func @transform_0(%arg0: i32, %arg1: i32, %arg2: i32) -> (i32, i32, i32) {
    %c0_i32 = arith.constant 0 : i32
    %c0_i32_0 = arith.constant 0 : i32
    return %arg0, %arg1, %c0_i32 : i32, i32, i32
  }
  func.func @transform_1(%arg0: i32, %arg1: i32, %arg2: i32) -> (i32, i32, i32) {
    %c0_i32 = arith.constant 0 : i32
    %c0_i32_0 = arith.constant 0 : i32
    return %arg0, %arg2, %c0_i32 : i32, i32, i32
  }
  func.func @transform_2(%arg0: i32, %arg1: i32, %arg2: i32) -> (i32, i32, i32) {
    %c0_i32 = arith.constant 0 : i32
    %c0_i32_0 = arith.constant 0 : i32
    return %arg0, %arg1, %c0_i32 : i32, i32, i32
  }
}

module attributes {stable_mosaic.version = 11 : i64} {
  func.func @_linear_kernel(%arg0: i32, %arg1: i32, %arg2: i32, %arg3: memref<16x64xf32, #tpu.memory_space<vmem>>, %arg4: memref<64x32xbf16, #tpu.memory_space<vmem>>, %arg5: memref<1x32xf32, #tpu.memory_space<vmem>>, %arg6: memref<16x32xf32, #tpu.memory_space<vmem>>, %arg7: memref<16x32xf32, #tpu.memory_space<vmem>>) attributes {dimension_semantics = [#tpu.dimension_semantics<parallel>, #tpu.dimension_semantics<parallel>, #tpu.dimension_semantics<arbitrary>], iteration_bounds = array<i64: 1, 1, 1>, scalar_prefetch = 0 : i64, scratch_operands = 0 : i64, tpu.core_type = #tpu.core_type<tc>, window_params = [{transform_indices = @transform_0, window_bounds = array<i64: 16, 64>}, {transform_indices = @transform_1, window_bounds = array<i64: 64, 32>}, {transform_indices = @transform_2, window_bounds = array<i64: 1, 32>}, {transform_indices = @transform_3, window_bounds = array<i64: 16, 32>}, {transform_indices = @transform_4, window_bounds = array<i64: 16, 32>}]} {
    %c0 = arith.constant 0 : index
    %c0_0 = arith.constant 0 : index
    %0 = vector.load %arg3[%c0, %c0_0] : memref<16x64xf32, #tpu.memory_space<vmem>>, vector<16x64xf32>
    %1 = arith.truncf %0 : vector<16x64xf32> to vector<16x64xbf16>
    %c0_1 = arith.constant 0 : index
    %c0_2 = arith.constant 0 : index
    %2 = vector.load %arg4[%c0_1, %c0_2] : memref<64x32xbf16, #tpu.memory_space<vmem>>, vector<64x32xbf16>
    %cst = arith.constant dense<0.000000e+00> : vector<16x32xf32>
    %3 = tpu.matmul %1, %2, %cst {dimension_numbers = #tpu.dot_dimension_numbers<[1], [0], [0], [1], [0, 0, 1, 1], [], []>} : vector<16x64xbf16>, vector<64x32xbf16>, vector<16x32xf32> -> vector<16x32xf32>
    %c0_3 = arith.constant 0 : index
    %c0_4 = arith.constant 0 : index
    %4 = vector.load %arg5[%c0_3, %c0_4] : memref<1x32xf32, #tpu.memory_space<vmem>>, vector<1x32xf32>
    %5 = vector.broadcast %4 : vector<1x32xf32> to vector<16x32xf32>
    %6 = arith.addf %3, %5 : vector<16x32xf32>
    %c0_5 = arith.constant 0 : index
    %c0_6 = arith.constant 0 : index
    %7 = vector.load %arg6[%c0_5, %c0_6] : memref<16x32xf32, #tpu.memory_space<vmem>>, vector<16x32xf32>
    %8 = arith.addf %6, %7 : vector<16x32xf32>
    %c0_7 = arith.constant 0 : index
    %c0_8 = arith.constant 0 : index
    %9 = vector.load %arg7[%c0_7, %c0_8] : memref<16x32xf32, #tpu.memory_space<vmem>>, vector<16x32xf32>
    tpu.vector_store %arg7[%c0_7, %c0_8], %8 {strides = array<i32>} : memref<16x32xf32, #tpu.memory_space<vmem>>, vector<16x32xf32>,
    return
  }
  func.func @transform_0(%arg0: i32, %arg1: i32, %arg2: i32) -> (i32, i32) {
    %c0_i32 = arith.constant 0 : i32
    return %arg0, %arg2 : i32, i32
  }
  func.func @transform_1(%arg0: i32, %arg1: i32, %arg2: i32) -> (i32, i32) {
    %c0_i32 = arith.constant 0 : i32
    return %arg2, %arg1 : i32, i32
  }
  func.func @transform_2(%arg0: i32, %arg1: i32, %arg2: i32) -> (i32, i32) {
    %c0_i32 = arith.constant 0 : i32
    %c0_i32_0 = arith.constant 0 : i32
    return %c0_i32, %arg1 : i32, i32
  }
  func.func @transform_3(%arg0: i32, %arg1: i32, %arg2: i32) -> (i32, i32) {
    %c0_i32 = arith.constant 0 : i32
    return %arg0, %arg1 : i32, i32
  }
  func.func @transform_4(%arg0: i32, %arg1: i32, %arg2: i32) -> (i32, i32) {
    %c0_i32 = arith.constant 0 : i32
    return %arg0, %arg1 : i32, i32
  }
}

module attributes {stable_mosaic.version = 11 : i64} {
  func.func @_linear_kernel(%arg0: i32, %arg1: i32, %arg2: i32, %arg3: memref<16x32xf32, #tpu.memory_space<vmem>>, %arg4: memref<32x64xbf16, #tpu.memory_space<vmem>>, %arg5: memref<1x64xf32, #tpu.memory_space<vmem>>, %arg6: memref<1x32xf32, #tpu.memory_space<vmem>>, %arg7: memref<1x32xf32, #tpu.memory_space<vmem>>, %arg8: memref<16x64xf32, #tpu.memory_space<vmem>>, %arg9: memref<16x32xbf16, #tpu.memory_space<vmem>>) attributes {dimension_semantics = [#tpu.dimension_semantics<parallel>, #tpu.dimension_semantics<arbitrary>, #tpu.dimension_semantics<arbitrary>], iteration_bounds = array<i64: 1, 1, 1>, scalar_prefetch = 0 : i64, scratch_operands = 1 : i64, tpu.core_type = #tpu.core_type<tc>, window_params = [{transform_indices = @transform_0, window_bounds = array<i64: 16, 32>}, {transform_indices = @transform_1, window_bounds = array<i64: 32, 64>}, {transform_indices = @transform_2, window_bounds = array<i64: 1, 64>}, {transform_indices = @transform_3, window_bounds = array<i64: 1, 32>}, {transform_indices = @transform_4, window_bounds = array<i64: 1, 32>}, {transform_indices = @transform_5, window_bounds = array<i64: 16, 64>}]} {
    %c0_i32 = arith.constant 0 : i32
    %0 = arith.cmpi eq, %arg1, %c0_i32 : i32
    %1 = arith.extui %0 : i1 to i32
    %c0_i32_0 = arith.constant 0 : i32
    %2 = arith.cmpi ne, %1, %c0_i32_0 : i32
    scf.if %2 {
      %c0_8 = arith.constant 0 : index
      %c0_9 = arith.constant 0 : index
      %10 = vector.load %arg3[%c0_8, %c0_9] : memref<16x32xf32, #tpu.memory_space<vmem>>, vector<16x32xf32>
      %cst_10 = arith.constant dense<0.000000e+00> : vector<16xf32>
      %11 = vector.multi_reduction <add>, %10, %cst_10 [1] : vector<16x32xf32> to vector<16xf32>
      %12 = vector.shape_cast %11 : vector<16xf32> to vector<16x1xf32>
      %cst_11 = arith.constant 3.200000e+01 : f32
      %13 = vector.broadcast %cst_11 : f32 to vector<16x1xf32>
      %14 = arith.divf %12, %13 : vector<16x1xf32>
      %15 = vector.broadcast %14 : vector<16x1xf32> to vector<16x32xf32>
      %16 = arith.subf %10, %15 : vector<16x32xf32>
      %17 = arith.mulf %16, %16 : vector<16x32xf32>
      %cst_12 = arith.constant dense<0.000000e+00> : vector<16xf32>
      %18 = vector.multi_reduction <add>, %17, %cst_12 [1] : vector<16x32xf32> to vector<16xf32>
      %19 = vector.shape_cast %18 : vector<16xf32> to vector<16x1xf32>
      %cst_13 = arith.constant 3.200000e+01 : f32
      %20 = vector.broadcast %cst_13 : f32 to vector<16x1xf32>
      %21 = arith.divf %19, %20 : vector<16x1xf32>
      %22 = vector.broadcast %14 : vector<16x1xf32> to vector<16x32xf32>
      %23 = arith.subf %10, %22 : vector<16x32xf32>
      %cst_14 = arith.constant 9.99999974E-6 : f32
      %24 = vector.broadcast %cst_14 : f32 to vector<16x1xf32>
      %25 = arith.addf %21, %24 : vector<16x1xf32>
      %26 = math.rsqrt %25 : vector<16x1xf32>
      %27 = vector.broadcast %26 : vector<16x1xf32> to vector<16x32xf32>
      %28 = arith.mulf %23, %27 : vector<16x32xf32>
      %c0_15 = arith.constant 0 : index
      %c0_16 = arith.constant 0 : index
      %29 = vector.load %arg6[%c0_15, %c0_16] : memref<1x32xf32, #tpu.memory_space<vmem>>, vector<1x32xf32>
      %30 = vector.broadcast %29 : vector<1x32xf32> to vector<16x32xf32>
      %31 = arith.mulf %28, %30 : vector<16x32xf32>
      %c0_17 = arith.constant 0 : index
      %c0_18 = arith.constant 0 : index
      %32 = vector.load %arg7[%c0_17, %c0_18] : memref<1x32xf32, #tpu.memory_space<vmem>>, vector<1x32xf32>
      %33 = vector.broadcast %32 : vector<1x32xf32> to vector<16x32xf32>
      %34 = arith.addf %31, %33 : vector<16x32xf32>
      %35 = arith.truncf %34 : vector<16x32xf32> to vector<16x32xbf16>
      %c0_19 = arith.constant 0 : index
      %c0_20 = arith.constant 0 : index
      %36 = vector.load %arg9[%c0_19, %c0_20] : memref<16x32xbf16, #tpu.memory_space<vmem>>, vector<16x32xbf16>
      tpu.vector_store %arg9[%c0_19, %c0_20], %35 {strides = array<i32>} : memref<16x32xbf16, #tpu.memory_space<vmem>>, vector<16x32xbf16>,
    } else {
    }
    %c0 = arith.constant 0 : index
    %c0_1 = arith.constant 0 : index
    %3 = vector.load %arg9[%c0, %c0_1] : memref<16x32xbf16, #tpu.memory_space<vmem>>, vector<16x32xbf16>
    %c0_2 = arith.constant 0 : index
    %c0_3 = arith.constant 0 : index
    %4 = vector.load %arg4[%c0_2, %c0_3] : memref<32x64xbf16, #tpu.memory_space<vmem>>, vector<32x64xbf16>
    %cst = arith.constant dense<0.000000e+00> : vector<16x64xf32>
    %5 = tpu.matmul %3, %4, %cst {dimension_numbers = #tpu.dot_dimension_numbers<[1], [0], [0], [1], [0, 0, 1, 1], [], []>} : vector<16x32xbf16>, vector<32x64xbf16>, vector<16x64xf32> -> vector<16x64xf32>
    %c0_4 = arith.constant 0 : index
    %c0_5 = arith.constant 0 : index
    %6 = vector.load %arg5[%c0_4, %c0_5] : memref<1x64xf32, #tpu.memory_space<vmem>>, vector<1x64xf32>
    %7 = vector.broadcast %6 : vector<1x64xf32> to vector<16x64xf32>
    %8 = arith.addf %5, %7 : vector<16x64xf32>
    %c0_6 = arith.constant 0 : index
    %c0_7 = arith.constant 0 : index
    %9 = vector.load %arg8[%c0_6, %c0_7] : memref<16x64xf32, #tpu.memory_space<vmem>>, vector<16x64xf32>
    tpu.vector_store %arg8[%c0_6, %c0_7], %8 {strides = array<i32>} : memref<16x64xf32, #tpu.memory_space<vmem>>, vector<16x64xf32>,
    return
  }
  func.func @transform_0(%arg0: i32, %arg1: i32, %arg2: i32) -> (i32, i32) {
    %c0_i32 = arith.constant 0 : i32
    return %arg0, %arg2 : i32, i32
  }
  func.func @transform_1(%arg0: i32, %arg1: i32, %arg2: i32) -> (i32, i32) {
    %c0_i32 = arith.constant 0 : i32
    return %arg2, %arg1 : i32, i32
  }
  func.func @transform_2(%arg0: i32, %arg1: i32, %arg2: i32) -> (i32, i32) {
    %c0_i32 = arith.constant 0 : i32
    %c0_i32_0 = arith.constant 0 : i32
    return %c0_i32, %arg1 : i32, i32
  }
  func.func @transform_3(%arg0: i32, %arg1: i32, %arg2: i32) -> (i32, i32) {
    %c0_i32 = arith.constant 0 : i32
    %c0_i32_0 = arith.constant 0 : i32
    return %c0_i32, %arg2 : i32, i32
  }
  func.func @transform_4(%arg0: i32, %arg1: i32, %arg2: i32) -> (i32, i32) {
    %c0_i32 = arith.constant 0 : i32
    %c0_i32_0 = arith.constant 0 : i32
    return %c0_i32, %arg2 : i32, i32
  }
  func.func @transform_5(%arg0: i32, %arg1: i32, %arg2: i32) -> (i32, i32) {
    %c0_i32 = arith.constant 0 : i32
    return %arg0, %arg1 : i32, i32
  }
}

module attributes {stable_mosaic.version = 11 : i64} {
  func.func @_flash_attn_kernel(%arg0: i32, %arg1: i32, %arg2: i32, %arg3: memref<1x8x64xf32, #tpu.memory_space<vmem>>, %arg4: memref<1x16x128xf32, #tpu.memory_space<vmem>>, %arg5: memref<1x8x64xf32, #tpu.memory_space<vmem>>, %arg6: memref<8x8x1xf32, #tpu.memory_space<vmem>>, %arg7: memref<8x8x1xf32, #tpu.memory_space<vmem>>, %arg8: memref<8x8x8xf32, #tpu.memory_space<vmem>>) attributes {dimension_semantics = [#tpu.dimension_semantics<parallel>, #tpu.dimension_semantics<parallel>, #tpu.dimension_semantics<arbitrary>], iteration_bounds = array<i64: 2, 1, 1>, scalar_prefetch = 0 : i64, scratch_operands = 3 : i64, tpu.core_type = #tpu.core_type<tc>, window_params = [{transform_indices = @transform_0, window_bounds = array<i64: 1, 8, 64>}, {transform_indices = @transform_1, window_bounds = array<i64: 1, 16, 128>}, {transform_indices = @transform_2, window_bounds = array<i64: 1, 8, 64>}]} {
    %c0_i32 = arith.constant 0 : i32
    %0 = arith.cmpi eq, %arg2, %c0_i32 : i32
    %1 = arith.extui %0 : i1 to i32
    %c0_i32_0 = arith.constant 0 : i32
    %2 = arith.cmpi ne, %1, %c0_i32_0 : i32
    scf.if %2 {
      %cst_178 = arith.constant 0xFF800000 : f32
      %303 = vector.broadcast %cst_178 : f32 to vector<8x8x1xf32>
      %c0_179 = arith.constant 0 : index
      %c0_180 = arith.constant 0 : index
      %c0_181 = arith.constant 0 : index
      %304 = vector.load %arg6[%c0_179, %c0_180, %c0_181] : memref<8x8x1xf32, #tpu.memory_space<vmem>>, vector<8x8x1xf32>
      tpu.vector_store %arg6[%c0_179, %c0_180, %c0_181], %303 {strides = array<i32>} : memref<8x8x1xf32, #tpu.memory_space<vmem>>, vector<8x8x1xf32>,
      %cst_182 = arith.constant 0.000000e+00 : f32
      %305 = vector.broadcast %cst_182 : f32 to vector<8x8x1xf32>
      %c0_183 = arith.constant 0 : index
      %c0_184 = arith.constant 0 : index
      %c0_185 = arith.constant 0 : index
      %306 = vector.load %arg7[%c0_183, %c0_184, %c0_185] : memref<8x8x1xf32, #tpu.memory_space<vmem>>, vector<8x8x1xf32>
      tpu.vector_store %arg7[%c0_183, %c0_184, %c0_185], %305 {strides = array<i32>} : memref<8x8x1xf32, #tpu.memory_space<vmem>>, vector<8x8x1xf32>,
      %cst_186 = arith.constant 0.000000e+00 : f32
      %307 = vector.broadcast %cst_186 : f32 to vector<8x8x8xf32>
      %c0_187 = arith.constant 0 : index
      %c0_188 = arith.constant 0 : index
      %c0_189 = arith.constant 0 : index
      %308 = vector.load %arg8[%c0_187, %c0_188, %c0_189] : memref<8x8x8xf32, #tpu.memory_space<vmem>>, vector<8x8x8xf32>
      tpu.vector_store %arg8[%c0_187, %c0_188, %c0_189], %307 {strides = array<i32>} : memref<8x8x8xf32, #tpu.memory_space<vmem>>, vector<8x8x8xf32>,
    } else {
    }
    %c0 = arith.constant 0 : index
    %c0_1 = arith.constant 0 : index
    %c0_2 = arith.constant 0 : index
    %3 = vector.load %arg3[%c0, %c0_1, %c0_2] : memref<1x8x64xf32, #tpu.memory_space<vmem>>, vector<1x8x64xf32>
    %4 = vector.shape_cast %3 : vector<1x8x64xf32> to vector<8x64xf32>
    %5 = arith.truncf %4 : vector<8x64xf32> to vector<8x64xbf16>
    %c0_3 = arith.constant 0 : index
    %c0_4 = arith.constant 0 : index
    %c0_5 = arith.constant 0 : index
    %6 = vector.load %arg4[%c0_3, %c0_4, %c0_5] : memref<1x16x128xf32, #tpu.memory_space<vmem>>, vector<1x16x64xf32>
    %7 = vector.shape_cast %6 : vector<1x16x64xf32> to vector<16x64xf32>
    %8 = arith.truncf %7 : vector<16x64xf32> to vector<16x64xbf16>
    %c0_6 = arith.constant 0 : index
    %c0_7 = arith.constant 0 : index
    %c64 = arith.constant 64 : index
    %9 = vector.load %arg4[%c0_6, %c0_7, %c64] : memref<1x16x128xf32, #tpu.memory_space<vmem>>, vector<1x16x64xf32>
    %10 = vector.shape_cast %9 : vector<1x16x64xf32> to vector<16x64xf32>
    %11 = arith.truncf %10 : vector<16x64xf32> to vector<16x64xbf16>
    %12 = vector.extract_strided_slice %5 {offsets = [0, 0], sizes = [8, 8], strides = [1, 1]} : vector<8x64xbf16> to vector<8x8xbf16>
    %13 = vector.extract_strided_slice %8 {offsets = [0, 0], sizes = [16, 8], strides = [1, 1]} : vector<16x64xbf16> to vector<16x8xbf16>
    %14 = vector.extract_strided_slice %11 {offsets = [0, 0], sizes = [16, 8], strides = [1, 1]} : vector<16x64xbf16> to vector<16x8xbf16>
    %cst = arith.constant dense<0.000000e+00> : vector<8x16xf32>
    %15 = tpu.matmul %12, %13, %cst {dimension_numbers = #tpu.dot_dimension_numbers<[1], [1], [0], [0], [0, 0, 1, 0], [], []>} : vector<8x8xbf16>, vector<16x8xbf16>, vector<8x16xf32> -> vector<8x16xf32>
    %c0_8 = arith.constant 0 : index
    %c0_9 = arith.constant 0 : index
    %c0_10 = arith.constant 0 : index
    %16 = vector.load %arg6[%c0_8, %c0_9, %c0_10] : memref<8x8x1xf32, #tpu.memory_space<vmem>>, vector<1x8x1xf32>
    %17 = vector.shape_cast %16 : vector<1x8x1xf32> to vector<8x1xf32>
    %cst_11 = arith.constant dense<0xFF800000> : vector<8xf32>
    %18 = vector.multi_reduction <maximumf>, %15, %cst_11 [1] : vector<8x16xf32> to vector<8xf32>
    %19 = vector.shape_cast %18 : vector<8xf32> to vector<8x1xf32>
    %20 = arith.maximumf %17, %19 : vector<8x1xf32>
    %21 = arith.subf %17, %20 : vector<8x1xf32>
    %22 = math.exp %21 : vector<8x1xf32>
    %23 = vector.broadcast %20 : vector<8x1xf32> to vector<8x16xf32>
    %24 = arith.subf %15, %23 : vector<8x16xf32>
    %25 = math.exp %24 : vector<8x16xf32>
    %c0_12 = arith.constant 0 : index
    %c0_13 = arith.constant 0 : index
    %c0_14 = arith.constant 0 : index
    %26 = vector.load %arg7[%c0_12, %c0_13, %c0_14] : memref<8x8x1xf32, #tpu.memory_space<vmem>>, vector<1x8x1xf32>
    %27 = vector.shape_cast %26 : vector<1x8x1xf32> to vector<8x1xf32>
    %28 = arith.mulf %22, %27 : vector<8x1xf32>
    %cst_15 = arith.constant dense<0.000000e+00> : vector<8xf32>
    %29 = vector.multi_reduction <add>, %25, %cst_15 [1] : vector<8x16xf32> to vector<8xf32>
    %30 = vector.shape_cast %29 : vector<8xf32> to vector<8x1xf32>
    %31 = arith.addf %28, %30 : vector<8x1xf32>
    %c0_16 = arith.constant 0 : index
    %c0_17 = arith.constant 0 : index
    %c0_18 = arith.constant 0 : index
    %32 = vector.load %arg7[%c0_16, %c0_17, %c0_18] : memref<8x8x1xf32, #tpu.memory_space<vmem>>, vector<1x8x1xf32>
    %33 = vector.shape_cast %32 : vector<1x8x1xf32> to vector<8x1xf32>
    %34 = vector.shape_cast %31 : vector<8x1xf32> to vector<1x8x1xf32>
    tpu.vector_store %arg7[%c0_16, %c0_17, %c0_18], %34 {strides = array<i32>} : memref<8x8x1xf32, #tpu.memory_space<vmem>>, vector<1x8x1xf32>,
    %c0_19 = arith.constant 0 : index
    %c0_20 = arith.constant 0 : index
    %c0_21 = arith.constant 0 : index
    %35 = vector.load %arg8[%c0_19, %c0_20, %c0_21] : memref<8x8x8xf32, #tpu.memory_space<vmem>>, vector<1x8x8xf32>
    %36 = vector.shape_cast %35 : vector<1x8x8xf32> to vector<8x8xf32>
    %37 = vector.broadcast %22 : vector<8x1xf32> to vector<8x8xf32>
    %38 = arith.mulf %37, %36 : vector<8x8xf32>
    %39 = arith.truncf %25 : vector<8x16xf32> to vector<8x16xbf16>
    %cst_22 = arith.constant dense<0.000000e+00> : vector<8x8xf32>
    %40 = tpu.matmul %39, %14, %cst_22 {dimension_numbers = #tpu.dot_dimension_numbers<[1], [0], [0], [1], [0, 0, 1, 1], [], []>} : vector<8x16xbf16>, vector<16x8xbf16>, vector<8x8xf32> -> vector<8x8xf32>
    %41 = arith.addf %38, %40 : vector<8x8xf32>
    %c0_23 = arith.constant 0 : index
    %c0_24 = arith.constant 0 : index
    %c0_25 = arith.constant 0 : index
    %42 = vector.load %arg8[%c0_23, %c0_24, %c0_25] : memref<8x8x8xf32, #tpu.memory_space<vmem>>, vector<1x8x8xf32>
    %43 = vector.shape_cast %42 : vector<1x8x8xf32> to vector<8x8xf32>
    %44 = vector.shape_cast %41 : vector<8x8xf32> to vector<1x8x8xf32>
    tpu.vector_store %arg8[%c0_23, %c0_24, %c0_25], %44 {strides = array<i32>} : memref<8x8x8xf32, #tpu.memory_space<vmem>>, vector<1x8x8xf32>,
    %c0_26 = arith.constant 0 : index
    %c0_27 = arith.constant 0 : index
    %c0_28 = arith.constant 0 : index
    %45 = vector.load %arg6[%c0_26, %c0_27, %c0_28] : memref<8x8x1xf32, #tpu.memory_space<vmem>>, vector<1x8x1xf32>
    %46 = vector.shape_cast %45 : vector<1x8x1xf32> to vector<8x1xf32>
    %47 = vector.shape_cast %20 : vector<8x1xf32> to vector<1x8x1xf32>
    tpu.vector_store %arg6[%c0_26, %c0_27, %c0_28], %47 {strides = array<i32>} : memref<8x8x1xf32, #tpu.memory_space<vmem>>, vector<1x8x1xf32>,
    %48 = vector.extract_strided_slice %5 {offsets = [0, 8], sizes = [8, 8], strides = [1, 1]} : vector<8x64xbf16> to vector<8x8xbf16>
    %49 = vector.extract_strided_slice %8 {offsets = [0, 8], sizes = [16, 8], strides = [1, 1]} : vector<16x64xbf16> to vector<16x8xbf16>
    %50 = vector.extract_strided_slice %11 {offsets = [0, 8], sizes = [16, 8], strides = [1, 1]} : vector<16x64xbf16> to vector<16x8xbf16>
    %cst_29 = arith.constant dense<0.000000e+00> : vector<8x16xf32>
    %51 = tpu.matmul %48, %49, %cst_29 {dimension_numbers = #tpu.dot_dimension_numbers<[1], [1], [0], [0], [0, 0, 1, 0], [], []>} : vector<8x8xbf16>, vector<16x8xbf16>, vector<8x16xf32> -> vector<8x16xf32>
    %c1 = arith.constant 1 : index
    %c0_30 = arith.constant 0 : index
    %c0_31 = arith.constant 0 : index
    %52 = vector.load %arg6[%c1, %c0_30, %c0_31] : memref<8x8x1xf32, #tpu.memory_space<vmem>>, vector<1x8x1xf32>
    %53 = vector.shape_cast %52 : vector<1x8x1xf32> to vector<8x1xf32>
    %cst_32 = arith.constant dense<0xFF800000> : vector<8xf32>
    %54 = vector.multi_reduction <maximumf>, %51, %cst_32 [1] : vector<8x16xf32> to vector<8xf32>
    %55 = vector.shape_cast %54 : vector<8xf32> to vector<8x1xf32>
    %56 = arith.maximumf %53, %55 : vector<8x1xf32>
    %57 = arith.subf %53, %56 : vector<8x1xf32>
    %58 = math.exp %57 : vector<8x1xf32>
    %59 = vector.broadcast %56 : vector<8x1xf32> to vector<8x16xf32>
    %60 = arith.subf %51, %59 : vector<8x16xf32>
    %61 = math.exp %60 : vector<8x16xf32>
    %c1_33 = arith.constant 1 : index
    %c0_34 = arith.constant 0 : index
    %c0_35 = arith.constant 0 : index
    %62 = vector.load %arg7[%c1_33, %c0_34, %c0_35] : memref<8x8x1xf32, #tpu.memory_space<vmem>>, vector<1x8x1xf32>
    %63 = vector.shape_cast %62 : vector<1x8x1xf32> to vector<8x1xf32>
    %64 = arith.mulf %58, %63 : vector<8x1xf32>
    %cst_36 = arith.constant dense<0.000000e+00> : vector<8xf32>
    %65 = vector.multi_reduction <add>, %61, %cst_36 [1] : vector<8x16xf32> to vector<8xf32>
    %66 = vector.shape_cast %65 : vector<8xf32> to vector<8x1xf32>
    %67 = arith.addf %64, %66 : vector<8x1xf32>
    %c1_37 = arith.constant 1 : index
    %c0_38 = arith.constant 0 : index
    %c0_39 = arith.constant 0 : index
    %68 = vector.load %arg7[%c1_37, %c0_38, %c0_39] : memref<8x8x1xf32, #tpu.memory_space<vmem>>, vector<1x8x1xf32>
    %69 = vector.shape_cast %68 : vector<1x8x1xf32> to vector<8x1xf32>
    %70 = vector.shape_cast %67 : vector<8x1xf32> to vector<1x8x1xf32>
    tpu.vector_store %arg7[%c1_37, %c0_38, %c0_39], %70 {strides = array<i32>} : memref<8x8x1xf32, #tpu.memory_space<vmem>>, vector<1x8x1xf32>,
    %c1_40 = arith.constant 1 : index
    %c0_41 = arith.constant 0 : index
    %c0_42 = arith.constant 0 : index
    %71 = vector.load %arg8[%c1_40, %c0_41, %c0_42] : memref<8x8x8xf32, #tpu.memory_space<vmem>>, vector<1x8x8xf32>
    %72 = vector.shape_cast %71 : vector<1x8x8xf32> to vector<8x8xf32>
    %73 = vector.broadcast %58 : vector<8x1xf32> to vector<8x8xf32>
    %74 = arith.mulf %73, %72 : vector<8x8xf32>
    %75 = arith.truncf %61 : vector<8x16xf32> to vector<8x16xbf16>
    %cst_43 = arith.constant dense<0.000000e+00> : vector<8x8xf32>
    %76 = tpu.matmul %75, %50, %cst_43 {dimension_numbers = #tpu.dot_dimension_numbers<[1], [0], [0], [1], [0, 0, 1, 1], [], []>} : vector<8x16xbf16>, vector<16x8xbf16>, vector<8x8xf32> -> vector<8x8xf32>
    %77 = arith.addf %74, %76 : vector<8x8xf32>
    %c1_44 = arith.constant 1 : index
    %c0_45 = arith.constant 0 : index
    %c0_46 = arith.constant 0 : index
    %78 = vector.load %arg8[%c1_44, %c0_45, %c0_46] : memref<8x8x8xf32, #tpu.memory_space<vmem>>, vector<1x8x8xf32>
    %79 = vector.shape_cast %78 : vector<1x8x8xf32> to vector<8x8xf32>
    %80 = vector.shape_cast %77 : vector<8x8xf32> to vector<1x8x8xf32>
    tpu.vector_store %arg8[%c1_44, %c0_45, %c0_46], %80 {strides = array<i32>} : memref<8x8x8xf32, #tpu.memory_space<vmem>>, vector<1x8x8xf32>,
    %c1_47 = arith.constant 1 : index
    %c0_48 = arith.constant 0 : index
    %c0_49 = arith.constant 0 : index
    %81 = vector.load %arg6[%c1_47, %c0_48, %c0_49] : memref<8x8x1xf32, #tpu.memory_space<vmem>>, vector<1x8x1xf32>
    %82 = vector.shape_cast %81 : vector<1x8x1xf32> to vector<8x1xf32>
    %83 = vector.shape_cast %56 : vector<8x1xf32> to vector<1x8x1xf32>
    tpu.vector_store %arg6[%c1_47, %c0_48, %c0_49], %83 {strides = array<i32>} : memref<8x8x1xf32, #tpu.memory_space<vmem>>, vector<1x8x1xf32>,
    %84 = vector.extract_strided_slice %5 {offsets = [0, 16], sizes = [8, 8], strides = [1, 1]} : vector<8x64xbf16> to vector<8x8xbf16>
    %85 = vector.extract_strided_slice %8 {offsets = [0, 16], sizes = [16, 8], strides = [1, 1]} : vector<16x64xbf16> to vector<16x8xbf16>
    %86 = vector.extract_strided_slice %11 {offsets = [0, 16], sizes = [16, 8], strides = [1, 1]} : vector<16x64xbf16> to vector<16x8xbf16>
    %cst_50 = arith.constant dense<0.000000e+00> : vector<8x16xf32>
    %87 = tpu.matmul %84, %85, %cst_50 {dimension_numbers = #tpu.dot_dimension_numbers<[1], [1], [0], [0], [0, 0, 1, 0], [], []>} : vector<8x8xbf16>, vector<16x8xbf16>, vector<8x16xf32> -> vector<8x16xf32>
    %c2 = arith.constant 2 : index
    %c0_51 = arith.constant 0 : index
    %c0_52 = arith.constant 0 : index
    %88 = vector.load %arg6[%c2, %c0_51, %c0_52] : memref<8x8x1xf32, #tpu.memory_space<vmem>>, vector<1x8x1xf32>
    %89 = vector.shape_cast %88 : vector<1x8x1xf32> to vector<8x1xf32>
    %cst_53 = arith.constant dense<0xFF800000> : vector<8xf32>
    %90 = vector.multi_reduction <maximumf>, %87, %cst_53 [1] : vector<8x16xf32> to vector<8xf32>
    %91 = vector.shape_cast %90 : vector<8xf32> to vector<8x1xf32>
    %92 = arith.maximumf %89, %91 : vector<8x1xf32>
    %93 = arith.subf %89, %92 : vector<8x1xf32>
    %94 = math.exp %93 : vector<8x1xf32>
    %95 = vector.broadcast %92 : vector<8x1xf32> to vector<8x16xf32>
    %96 = arith.subf %87, %95 : vector<8x16xf32>
    %97 = math.exp %96 : vector<8x16xf32>
    %c2_54 = arith.constant 2 : index
    %c0_55 = arith.constant 0 : index
    %c0_56 = arith.constant 0 : index
    %98 = vector.load %arg7[%c2_54, %c0_55, %c0_56] : memref<8x8x1xf32, #tpu.memory_space<vmem>>, vector<1x8x1xf32>
    %99 = vector.shape_cast %98 : vector<1x8x1xf32> to vector<8x1xf32>
    %100 = arith.mulf %94, %99 : vector<8x1xf32>
    %cst_57 = arith.constant dense<0.000000e+00> : vector<8xf32>
    %101 = vector.multi_reduction <add>, %97, %cst_57 [1] : vector<8x16xf32> to vector<8xf32>
    %102 = vector.shape_cast %101 : vector<8xf32> to vector<8x1xf32>
    %103 = arith.addf %100, %102 : vector<8x1xf32>
    %c2_58 = arith.constant 2 : index
    %c0_59 = arith.constant 0 : index
    %c0_60 = arith.constant 0 : index
    %104 = vector.load %arg7[%c2_58, %c0_59, %c0_60] : memref<8x8x1xf32, #tpu.memory_space<vmem>>, vector<1x8x1xf32>
    %105 = vector.shape_cast %104 : vector<1x8x1xf32> to vector<8x1xf32>
    %106 = vector.shape_cast %103 : vector<8x1xf32> to vector<1x8x1xf32>
    tpu.vector_store %arg7[%c2_58, %c0_59, %c0_60], %106 {strides = array<i32>} : memref<8x8x1xf32, #tpu.memory_space<vmem>>, vector<1x8x1xf32>,
    %c2_61 = arith.constant 2 : index
    %c0_62 = arith.constant 0 : index
    %c0_63 = arith.constant 0 : index
    %107 = vector.load %arg8[%c2_61, %c0_62, %c0_63] : memref<8x8x8xf32, #tpu.memory_space<vmem>>, vector<1x8x8xf32>
    %108 = vector.shape_cast %107 : vector<1x8x8xf32> to vector<8x8xf32>
    %109 = vector.broadcast %94 : vector<8x1xf32> to vector<8x8xf32>
    %110 = arith.mulf %109, %108 : vector<8x8xf32>
    %111 = arith.truncf %97 : vector<8x16xf32> to vector<8x16xbf16>
    %cst_64 = arith.constant dense<0.000000e+00> : vector<8x8xf32>
    %112 = tpu.matmul %111, %86, %cst_64 {dimension_numbers = #tpu.dot_dimension_numbers<[1], [0], [0], [1], [0, 0, 1, 1], [], []>} : vector<8x16xbf16>, vector<16x8xbf16>, vector<8x8xf32> -> vector<8x8xf32>
    %113 = arith.addf %110, %112 : vector<8x8xf32>
    %c2_65 = arith.constant 2 : index
    %c0_66 = arith.constant 0 : index
    %c0_67 = arith.constant 0 : index
    %114 = vector.load %arg8[%c2_65, %c0_66, %c0_67] : memref<8x8x8xf32, #tpu.memory_space<vmem>>, vector<1x8x8xf32>
    %115 = vector.shape_cast %114 : vector<1x8x8xf32> to vector<8x8xf32>
    %116 = vector.shape_cast %113 : vector<8x8xf32> to vector<1x8x8xf32>
    tpu.vector_store %arg8[%c2_65, %c0_66, %c0_67], %116 {strides = array<i32>} : memref<8x8x8xf32, #tpu.memory_space<vmem>>, vector<1x8x8xf32>,
    %c2_68 = arith.constant 2 : index
    %c0_69 = arith.constant 0 : index
    %c0_70 = arith.constant 0 : index
    %117 = vector.load %arg6[%c2_68, %c0_69, %c0_70] : memref<8x8x1xf32, #tpu.memory_space<vmem>>, vector<1x8x1xf32>
    %118 = vector.shape_cast %117 : vector<1x8x1xf32> to vector<8x1xf32>
    %119 = vector.shape_cast %92 : vector<8x1xf32> to vector<1x8x1xf32>
    tpu.vector_store %arg6[%c2_68, %c0_69, %c0_70], %119 {strides = array<i32>} : memref<8x8x1xf32, #tpu.memory_space<vmem>>, vector<1x8x1xf32>,
    %120 = vector.extract_strided_slice %5 {offsets = [0, 24], sizes = [8, 8], strides = [1, 1]} : vector<8x64xbf16> to vector<8x8xbf16>
    %121 = vector.extract_strided_slice %8 {offsets = [0, 24], sizes = [16, 8], strides = [1, 1]} : vector<16x64xbf16> to vector<16x8xbf16>
    %122 = vector.extract_strided_slice %11 {offsets = [0, 24], sizes = [16, 8], strides = [1, 1]} : vector<16x64xbf16> to vector<16x8xbf16>
    %cst_71 = arith.constant dense<0.000000e+00> : vector<8x16xf32>
    %123 = tpu.matmul %120, %121, %cst_71 {dimension_numbers = #tpu.dot_dimension_numbers<[1], [1], [0], [0], [0, 0, 1, 0], [], []>} : vector<8x8xbf16>, vector<16x8xbf16>, vector<8x16xf32> -> vector<8x16xf32>
    %c3 = arith.constant 3 : index
    %c0_72 = arith.constant 0 : index
    %c0_73 = arith.constant 0 : index
    %124 = vector.load %arg6[%c3, %c0_72, %c0_73] : memref<8x8x1xf32, #tpu.memory_space<vmem>>, vector<1x8x1xf32>
    %125 = vector.shape_cast %124 : vector<1x8x1xf32> to vector<8x1xf32>
    %cst_74 = arith.constant dense<0xFF800000> : vector<8xf32>
    %126 = vector.multi_reduction <maximumf>, %123, %cst_74 [1] : vector<8x16xf32> to vector<8xf32>
    %127 = vector.shape_cast %126 : vector<8xf32> to vector<8x1xf32>
    %128 = arith.maximumf %125, %127 : vector<8x1xf32>
    %129 = arith.subf %125, %128 : vector<8x1xf32>
    %130 = math.exp %129 : vector<8x1xf32>
    %131 = vector.broadcast %128 : vector<8x1xf32> to vector<8x16xf32>
    %132 = arith.subf %123, %131 : vector<8x16xf32>
    %133 = math.exp %132 : vector<8x16xf32>
    %c3_75 = arith.constant 3 : index
    %c0_76 = arith.constant 0 : index
    %c0_77 = arith.constant 0 : index
    %134 = vector.load %arg7[%c3_75, %c0_76, %c0_77] : memref<8x8x1xf32, #tpu.memory_space<vmem>>, vector<1x8x1xf32>
    %135 = vector.shape_cast %134 : vector<1x8x1xf32> to vector<8x1xf32>
    %136 = arith.mulf %130, %135 : vector<8x1xf32>
    %cst_78 = arith.constant dense<0.000000e+00> : vector<8xf32>
    %137 = vector.multi_reduction <add>, %133, %cst_78 [1] : vector<8x16xf32> to vector<8xf32>
    %138 = vector.shape_cast %137 : vector<8xf32> to vector<8x1xf32>
    %139 = arith.addf %136, %138 : vector<8x1xf32>
    %c3_79 = arith.constant 3 : index
    %c0_80 = arith.constant 0 : index
    %c0_81 = arith.constant 0 : index
    %140 = vector.load %arg7[%c3_79, %c0_80, %c0_81] : memref<8x8x1xf32, #tpu.memory_space<vmem>>, vector<1x8x1xf32>
    %141 = vector.shape_cast %140 : vector<1x8x1xf32> to vector<8x1xf32>
    %142 = vector.shape_cast %139 : vector<8x1xf32> to vector<1x8x1xf32>
    tpu.vector_store %arg7[%c3_79, %c0_80, %c0_81], %142 {strides = array<i32>} : memref<8x8x1xf32, #tpu.memory_space<vmem>>, vector<1x8x1xf32>,
    %c3_82 = arith.constant 3 : index
    %c0_83 = arith.constant 0 : index
    %c0_84 = arith.constant 0 : index
    %143 = vector.load %arg8[%c3_82, %c0_83, %c0_84] : memref<8x8x8xf32, #tpu.memory_space<vmem>>, vector<1x8x8xf32>
    %144 = vector.shape_cast %143 : vector<1x8x8xf32> to vector<8x8xf32>
    %145 = vector.broadcast %130 : vector<8x1xf32> to vector<8x8xf32>
    %146 = arith.mulf %145, %144 : vector<8x8xf32>
    %147 = arith.truncf %133 : vector<8x16xf32> to vector<8x16xbf16>
    %cst_85 = arith.constant dense<0.000000e+00> : vector<8x8xf32>
    %148 = tpu.matmul %147, %122, %cst_85 {dimension_numbers = #tpu.dot_dimension_numbers<[1], [0], [0], [1], [0, 0, 1, 1], [], []>} : vector<8x16xbf16>, vector<16x8xbf16>, vector<8x8xf32> -> vector<8x8xf32>
    %149 = arith.addf %146, %148 : vector<8x8xf32>
    %c3_86 = arith.constant 3 : index
    %c0_87 = arith.constant 0 : index
    %c0_88 = arith.constant 0 : index
    %150 = vector.load %arg8[%c3_86, %c0_87, %c0_88] : memref<8x8x8xf32, #tpu.memory_space<vmem>>, vector<1x8x8xf32>
    %151 = vector.shape_cast %150 : vector<1x8x8xf32> to vector<8x8xf32>
    %152 = vector.shape_cast %149 : vector<8x8xf32> to vector<1x8x8xf32>
    tpu.vector_store %arg8[%c3_86, %c0_87, %c0_88], %152 {strides = array<i32>} : memref<8x8x8xf32, #tpu.memory_space<vmem>>, vector<1x8x8xf32>,
    %c3_89 = arith.constant 3 : index
    %c0_90 = arith.constant 0 : index
    %c0_91 = arith.constant 0 : index
    %153 = vector.load %arg6[%c3_89, %c0_90, %c0_91] : memref<8x8x1xf32, #tpu.memory_space<vmem>>, vector<1x8x1xf32>
    %154 = vector.shape_cast %153 : vector<1x8x1xf32> to vector<8x1xf32>
    %155 = vector.shape_cast %128 : vector<8x1xf32> to vector<1x8x1xf32>
    tpu.vector_store %arg6[%c3_89, %c0_90, %c0_91], %155 {strides = array<i32>} : memref<8x8x1xf32, #tpu.memory_space<vmem>>, vector<1x8x1xf32>,
    %156 = vector.extract_strided_slice %5 {offsets = [0, 32], sizes = [8, 8], strides = [1, 1]} : vector<8x64xbf16> to vector<8x8xbf16>
    %157 = vector.extract_strided_slice %8 {offsets = [0, 32], sizes = [16, 8], strides = [1, 1]} : vector<16x64xbf16> to vector<16x8xbf16>
    %158 = vector.extract_strided_slice %11 {offsets = [0, 32], sizes = [16, 8], strides = [1, 1]} : vector<16x64xbf16> to vector<16x8xbf16>
    %cst_92 = arith.constant dense<0.000000e+00> : vector<8x16xf32>
    %159 = tpu.matmul %156, %157, %cst_92 {dimension_numbers = #tpu.dot_dimension_numbers<[1], [1], [0], [0], [0, 0, 1, 0], [], []>} : vector<8x8xbf16>, vector<16x8xbf16>, vector<8x16xf32> -> vector<8x16xf32>
    %c4 = arith.constant 4 : index
    %c0_93 = arith.constant 0 : index
    %c0_94 = arith.constant 0 : index
    %160 = vector.load %arg6[%c4, %c0_93, %c0_94] : memref<8x8x1xf32, #tpu.memory_space<vmem>>, vector<1x8x1xf32>
    %161 = vector.shape_cast %160 : vector<1x8x1xf32> to vector<8x1xf32>
    %cst_95 = arith.constant dense<0xFF800000> : vector<8xf32>
    %162 = vector.multi_reduction <maximumf>, %159, %cst_95 [1] : vector<8x16xf32> to vector<8xf32>
    %163 = vector.shape_cast %162 : vector<8xf32> to vector<8x1xf32>
    %164 = arith.maximumf %161, %163 : vector<8x1xf32>
    %165 = arith.subf %161, %164 : vector<8x1xf32>
    %166 = math.exp %165 : vector<8x1xf32>
    %167 = vector.broadcast %164 : vector<8x1xf32> to vector<8x16xf32>
    %168 = arith.subf %159, %167 : vector<8x16xf32>
    %169 = math.exp %168 : vector<8x16xf32>
    %c4_96 = arith.constant 4 : index
    %c0_97 = arith.constant 0 : index
    %c0_98 = arith.constant 0 : index
    %170 = vector.load %arg7[%c4_96, %c0_97, %c0_98] : memref<8x8x1xf32, #tpu.memory_space<vmem>>, vector<1x8x1xf32>
    %171 = vector.shape_cast %170 : vector<1x8x1xf32> to vector<8x1xf32>
    %172 = arith.mulf %166, %171 : vector<8x1xf32>
    %cst_99 = arith.constant dense<0.000000e+00> : vector<8xf32>
    %173 = vector.multi_reduction <add>, %169, %cst_99 [1] : vector<8x16xf32> to vector<8xf32>
    %174 = vector.shape_cast %173 : vector<8xf32> to vector<8x1xf32>
    %175 = arith.addf %172, %174 : vector<8x1xf32>
    %c4_100 = arith.constant 4 : index
    %c0_101 = arith.constant 0 : index
    %c0_102 = arith.constant 0 : index
    %176 = vector.load %arg7[%c4_100, %c0_101, %c0_102] : memref<8x8x1xf32, #tpu.memory_space<vmem>>, vector<1x8x1xf32>
    %177 = vector.shape_cast %176 : vector<1x8x1xf32> to vector<8x1xf32>
    %178 = vector.shape_cast %175 : vector<8x1xf32> to vector<1x8x1xf32>
    tpu.vector_store %arg7[%c4_100, %c0_101, %c0_102], %178 {strides = array<i32>} : memref<8x8x1xf32, #tpu.memory_space<vmem>>, vector<1x8x1xf32>,
    %c4_103 = arith.constant 4 : index
    %c0_104 = arith.constant 0 : index
    %c0_105 = arith.constant 0 : index
    %179 = vector.load %arg8[%c4_103, %c0_104, %c0_105] : memref<8x8x8xf32, #tpu.memory_space<vmem>>, vector<1x8x8xf32>
    %180 = vector.shape_cast %179 : vector<1x8x8xf32> to vector<8x8xf32>
    %181 = vector.broadcast %166 : vector<8x1xf32> to vector<8x8xf32>
    %182 = arith.mulf %181, %180 : vector<8x8xf32>
    %183 = arith.truncf %169 : vector<8x16xf32> to vector<8x16xbf16>
    %cst_106 = arith.constant dense<0.000000e+00> : vector<8x8xf32>
    %184 = tpu.matmul %183, %158, %cst_106 {dimension_numbers = #tpu.dot_dimension_numbers<[1], [0], [0], [1], [0, 0, 1, 1], [], []>} : vector<8x16xbf16>, vector<16x8xbf16>, vector<8x8xf32> -> vector<8x8xf32>
    %185 = arith.addf %182, %184 : vector<8x8xf32>
    %c4_107 = arith.constant 4 : index
    %c0_108 = arith.constant 0 : index
    %c0_109 = arith.constant 0 : index
    %186 = vector.load %arg8[%c4_107, %c0_108, %c0_109] : memref<8x8x8xf32, #tpu.memory_space<vmem>>, vector<1x8x8xf32>
    %187 = vector.shape_cast %186 : vector<1x8x8xf32> to vector<8x8xf32>
    %188 = vector.shape_cast %185 : vector<8x8xf32> to vector<1x8x8xf32>
    tpu.vector_store %arg8[%c4_107, %c0_108, %c0_109], %188 {strides = array<i32>} : memref<8x8x8xf32, #tpu.memory_space<vmem>>, vector<1x8x8xf32>,
    %c4_110 = arith.constant 4 : index
    %c0_111 = arith.constant 0 : index
    %c0_112 = arith.constant 0 : index
    %189 = vector.load %arg6[%c4_110, %c0_111, %c0_112] : memref<8x8x1xf32, #tpu.memory_space<vmem>>, vector<1x8x1xf32>
    %190 = vector.shape_cast %189 : vector<1x8x1xf32> to vector<8x1xf32>
    %191 = vector.shape_cast %164 : vector<8x1xf32> to vector<1x8x1xf32>
    tpu.vector_store %arg6[%c4_110, %c0_111, %c0_112], %191 {strides = array<i32>} : memref<8x8x1xf32, #tpu.memory_space<vmem>>, vector<1x8x1xf32>,
    %192 = vector.extract_strided_slice %5 {offsets = [0, 40], sizes = [8, 8], strides = [1, 1]} : vector<8x64xbf16> to vector<8x8xbf16>
    %193 = vector.extract_strided_slice %8 {offsets = [0, 40], sizes = [16, 8], strides = [1, 1]} : vector<16x64xbf16> to vector<16x8xbf16>
    %194 = vector.extract_strided_slice %11 {offsets = [0, 40], sizes = [16, 8], strides = [1, 1]} : vector<16x64xbf16> to vector<16x8xbf16>
    %cst_113 = arith.constant dense<0.000000e+00> : vector<8x16xf32>
    %195 = tpu.matmul %192, %193, %cst_113 {dimension_numbers = #tpu.dot_dimension_numbers<[1], [1], [0], [0], [0, 0, 1, 0], [], []>} : vector<8x8xbf16>, vector<16x8xbf16>, vector<8x16xf32> -> vector<8x16xf32>
    %c5 = arith.constant 5 : index
    %c0_114 = arith.constant 0 : index
    %c0_115 = arith.constant 0 : index
    %196 = vector.load %arg6[%c5, %c0_114, %c0_115] : memref<8x8x1xf32, #tpu.memory_space<vmem>>, vector<1x8x1xf32>
    %197 = vector.shape_cast %196 : vector<1x8x1xf32> to vector<8x1xf32>
    %cst_116 = arith.constant dense<0xFF800000> : vector<8xf32>
    %198 = vector.multi_reduction <maximumf>, %195, %cst_116 [1] : vector<8x16xf32> to vector<8xf32>
    %199 = vector.shape_cast %198 : vector<8xf32> to vector<8x1xf32>
    %200 = arith.maximumf %197, %199 : vector<8x1xf32>
    %201 = arith.subf %197, %200 : vector<8x1xf32>
    %202 = math.exp %201 : vector<8x1xf32>
    %203 = vector.broadcast %200 : vector<8x1xf32> to vector<8x16xf32>
    %204 = arith.subf %195, %203 : vector<8x16xf32>
    %205 = math.exp %204 : vector<8x16xf32>
    %c5_117 = arith.constant 5 : index
    %c0_118 = arith.constant 0 : index
    %c0_119 = arith.constant 0 : index
    %206 = vector.load %arg7[%c5_117, %c0_118, %c0_119] : memref<8x8x1xf32, #tpu.memory_space<vmem>>, vector<1x8x1xf32>
    %207 = vector.shape_cast %206 : vector<1x8x1xf32> to vector<8x1xf32>
    %208 = arith.mulf %202, %207 : vector<8x1xf32>
    %cst_120 = arith.constant dense<0.000000e+00> : vector<8xf32>
    %209 = vector.multi_reduction <add>, %205, %cst_120 [1] : vector<8x16xf32> to vector<8xf32>
    %210 = vector.shape_cast %209 : vector<8xf32> to vector<8x1xf32>
    %211 = arith.addf %208, %210 : vector<8x1xf32>
    %c5_121 = arith.constant 5 : index
    %c0_122 = arith.constant 0 : index
    %c0_123 = arith.constant 0 : index
    %212 = vector.load %arg7[%c5_121, %c0_122, %c0_123] : memref<8x8x1xf32, #tpu.memory_space<vmem>>, vector<1x8x1xf32>
    %213 = vector.shape_cast %212 : vector<1x8x1xf32> to vector<8x1xf32>
    %214 = vector.shape_cast %211 : vector<8x1xf32> to vector<1x8x1xf32>
    tpu.vector_store %arg7[%c5_121, %c0_122, %c0_123], %214 {strides = array<i32>} : memref<8x8x1xf32, #tpu.memory_space<vmem>>, vector<1x8x1xf32>,
    %c5_124 = arith.constant 5 : index
    %c0_125 = arith.constant 0 : index
    %c0_126 = arith.constant 0 : index
    %215 = vector.load %arg8[%c5_124, %c0_125, %c0_126] : memref<8x8x8xf32, #tpu.memory_space<vmem>>, vector<1x8x8xf32>
    %216 = vector.shape_cast %215 : vector<1x8x8xf32> to vector<8x8xf32>
    %217 = vector.broadcast %202 : vector<8x1xf32> to vector<8x8xf32>
    %218 = arith.mulf %217, %216 : vector<8x8xf32>
    %219 = arith.truncf %205 : vector<8x16xf32> to vector<8x16xbf16>
    %cst_127 = arith.constant dense<0.000000e+00> : vector<8x8xf32>
    %220 = tpu.matmul %219, %194, %cst_127 {dimension_numbers = #tpu.dot_dimension_numbers<[1], [0], [0], [1], [0, 0, 1, 1], [], []>} : vector<8x16xbf16>, vector<16x8xbf16>, vector<8x8xf32> -> vector<8x8xf32>
    %221 = arith.addf %218, %220 : vector<8x8xf32>
    %c5_128 = arith.constant 5 : index
    %c0_129 = arith.constant 0 : index
    %c0_130 = arith.constant 0 : index
    %222 = vector.load %arg8[%c5_128, %c0_129, %c0_130] : memref<8x8x8xf32, #tpu.memory_space<vmem>>, vector<1x8x8xf32>
    %223 = vector.shape_cast %222 : vector<1x8x8xf32> to vector<8x8xf32>
    %224 = vector.shape_cast %221 : vector<8x8xf32> to vector<1x8x8xf32>
    tpu.vector_store %arg8[%c5_128, %c0_129, %c0_130], %224 {strides = array<i32>} : memref<8x8x8xf32, #tpu.memory_space<vmem>>, vector<1x8x8xf32>,
    %c5_131 = arith.constant 5 : index
    %c0_132 = arith.constant 0 : index
    %c0_133 = arith.constant 0 : index
    %225 = vector.load %arg6[%c5_131, %c0_132, %c0_133] : memref<8x8x1xf32, #tpu.memory_space<vmem>>, vector<1x8x1xf32>
    %226 = vector.shape_cast %225 : vector<1x8x1xf32> to vector<8x1xf32>
    %227 = vector.shape_cast %200 : vector<8x1xf32> to vector<1x8x1xf32>
    tpu.vector_store %arg6[%c5_131, %c0_132, %c0_133], %227 {strides = array<i32>} : memref<8x8x1xf32, #tpu.memory_space<vmem>>, vector<1x8x1xf32>,
    %228 = vector.extract_strided_slice %5 {offsets = [0, 48], sizes = [8, 8], strides = [1, 1]} : vector<8x64xbf16> to vector<8x8xbf16>
    %229 = vector.extract_strided_slice %8 {offsets = [0, 48], sizes = [16, 8], strides = [1, 1]} : vector<16x64xbf16> to vector<16x8xbf16>
    %230 = vector.extract_strided_slice %11 {offsets = [0, 48], sizes = [16, 8], strides = [1, 1]} : vector<16x64xbf16> to vector<16x8xbf16>
    %cst_134 = arith.constant dense<0.000000e+00> : vector<8x16xf32>
    %231 = tpu.matmul %228, %229, %cst_134 {dimension_numbers = #tpu.dot_dimension_numbers<[1], [1], [0], [0], [0, 0, 1, 0], [], []>} : vector<8x8xbf16>, vector<16x8xbf16>, vector<8x16xf32> -> vector<8x16xf32>
    %c6 = arith.constant 6 : index
    %c0_135 = arith.constant 0 : index
    %c0_136 = arith.constant 0 : index
    %232 = vector.load %arg6[%c6, %c0_135, %c0_136] : memref<8x8x1xf32, #tpu.memory_space<vmem>>, vector<1x8x1xf32>
    %233 = vector.shape_cast %232 : vector<1x8x1xf32> to vector<8x1xf32>
    %cst_137 = arith.constant dense<0xFF800000> : vector<8xf32>
    %234 = vector.multi_reduction <maximumf>, %231, %cst_137 [1] : vector<8x16xf32> to vector<8xf32>
    %235 = vector.shape_cast %234 : vector<8xf32> to vector<8x1xf32>
    %236 = arith.maximumf %233, %235 : vector<8x1xf32>
    %237 = arith.subf %233, %236 : vector<8x1xf32>
    %238 = math.exp %237 : vector<8x1xf32>
    %239 = vector.broadcast %236 : vector<8x1xf32> to vector<8x16xf32>
    %240 = arith.subf %231, %239 : vector<8x16xf32>
    %241 = math.exp %240 : vector<8x16xf32>
    %c6_138 = arith.constant 6 : index
    %c0_139 = arith.constant 0 : index
    %c0_140 = arith.constant 0 : index
    %242 = vector.load %arg7[%c6_138, %c0_139, %c0_140] : memref<8x8x1xf32, #tpu.memory_space<vmem>>, vector<1x8x1xf32>
    %243 = vector.shape_cast %242 : vector<1x8x1xf32> to vector<8x1xf32>
    %244 = arith.mulf %238, %243 : vector<8x1xf32>
    %cst_141 = arith.constant dense<0.000000e+00> : vector<8xf32>
    %245 = vector.multi_reduction <add>, %241, %cst_141 [1] : vector<8x16xf32> to vector<8xf32>
    %246 = vector.shape_cast %245 : vector<8xf32> to vector<8x1xf32>
    %247 = arith.addf %244, %246 : vector<8x1xf32>
    %c6_142 = arith.constant 6 : index
    %c0_143 = arith.constant 0 : index
    %c0_144 = arith.constant 0 : index
    %248 = vector.load %arg7[%c6_142, %c0_143, %c0_144] : memref<8x8x1xf32, #tpu.memory_space<vmem>>, vector<1x8x1xf32>
    %249 = vector.shape_cast %248 : vector<1x8x1xf32> to vector<8x1xf32>
    %250 = vector.shape_cast %247 : vector<8x1xf32> to vector<1x8x1xf32>
    tpu.vector_store %arg7[%c6_142, %c0_143, %c0_144], %250 {strides = array<i32>} : memref<8x8x1xf32, #tpu.memory_space<vmem>>, vector<1x8x1xf32>,
    %c6_145 = arith.constant 6 : index
    %c0_146 = arith.constant 0 : index
    %c0_147 = arith.constant 0 : index
    %251 = vector.load %arg8[%c6_145, %c0_146, %c0_147] : memref<8x8x8xf32, #tpu.memory_space<vmem>>, vector<1x8x8xf32>
    %252 = vector.shape_cast %251 : vector<1x8x8xf32> to vector<8x8xf32>
    %253 = vector.broadcast %238 : vector<8x1xf32> to vector<8x8xf32>
    %254 = arith.mulf %253, %252 : vector<8x8xf32>
    %255 = arith.truncf %241 : vector<8x16xf32> to vector<8x16xbf16>
    %cst_148 = arith.constant dense<0.000000e+00> : vector<8x8xf32>
    %256 = tpu.matmul %255, %230, %cst_148 {dimension_numbers = #tpu.dot_dimension_numbers<[1], [0], [0], [1], [0, 0, 1, 1], [], []>} : vector<8x16xbf16>, vector<16x8xbf16>, vector<8x8xf32> -> vector<8x8xf32>
    %257 = arith.addf %254, %256 : vector<8x8xf32>
    %c6_149 = arith.constant 6 : index
    %c0_150 = arith.constant 0 : index
    %c0_151 = arith.constant 0 : index
    %258 = vector.load %arg8[%c6_149, %c0_150, %c0_151] : memref<8x8x8xf32, #tpu.memory_space<vmem>>, vector<1x8x8xf32>
    %259 = vector.shape_cast %258 : vector<1x8x8xf32> to vector<8x8xf32>
    %260 = vector.shape_cast %257 : vector<8x8xf32> to vector<1x8x8xf32>
    tpu.vector_store %arg8[%c6_149, %c0_150, %c0_151], %260 {strides = array<i32>} : memref<8x8x8xf32, #tpu.memory_space<vmem>>, vector<1x8x8xf32>,
    %c6_152 = arith.constant 6 : index
    %c0_153 = arith.constant 0 : index
    %c0_154 = arith.constant 0 : index
    %261 = vector.load %arg6[%c6_152, %c0_153, %c0_154] : memref<8x8x1xf32, #tpu.memory_space<vmem>>, vector<1x8x1xf32>
    %262 = vector.shape_cast %261 : vector<1x8x1xf32> to vector<8x1xf32>
    %263 = vector.shape_cast %236 : vector<8x1xf32> to vector<1x8x1xf32>
    tpu.vector_store %arg6[%c6_152, %c0_153, %c0_154], %263 {strides = array<i32>} : memref<8x8x1xf32, #tpu.memory_space<vmem>>, vector<1x8x1xf32>,
    %264 = vector.extract_strided_slice %5 {offsets = [0, 56], sizes = [8, 8], strides = [1, 1]} : vector<8x64xbf16> to vector<8x8xbf16>
    %265 = vector.extract_strided_slice %8 {offsets = [0, 56], sizes = [16, 8], strides = [1, 1]} : vector<16x64xbf16> to vector<16x8xbf16>
    %266 = vector.extract_strided_slice %11 {offsets = [0, 56], sizes = [16, 8], strides = [1, 1]} : vector<16x64xbf16> to vector<16x8xbf16>
    %cst_155 = arith.constant dense<0.000000e+00> : vector<8x16xf32>
    %267 = tpu.matmul %264, %265, %cst_155 {dimension_numbers = #tpu.dot_dimension_numbers<[1], [1], [0], [0], [0, 0, 1, 0], [], []>} : vector<8x8xbf16>, vector<16x8xbf16>, vector<8x16xf32> -> vector<8x16xf32>
    %c7 = arith.constant 7 : index
    %c0_156 = arith.constant 0 : index
    %c0_157 = arith.constant 0 : index
    %268 = vector.load %arg6[%c7, %c0_156, %c0_157] : memref<8x8x1xf32, #tpu.memory_space<vmem>>, vector<1x8x1xf32>
    %269 = vector.shape_cast %268 : vector<1x8x1xf32> to vector<8x1xf32>
    %cst_158 = arith.constant dense<0xFF800000> : vector<8xf32>
    %270 = vector.multi_reduction <maximumf>, %267, %cst_158 [1] : vector<8x16xf32> to vector<8xf32>
    %271 = vector.shape_cast %270 : vector<8xf32> to vector<8x1xf32>
    %272 = arith.maximumf %269, %271 : vector<8x1xf32>
    %273 = arith.subf %269, %272 : vector<8x1xf32>
    %274 = math.exp %273 : vector<8x1xf32>
    %275 = vector.broadcast %272 : vector<8x1xf32> to vector<8x16xf32>
    %276 = arith.subf %267, %275 : vector<8x16xf32>
    %277 = math.exp %276 : vector<8x16xf32>
    %c7_159 = arith.constant 7 : index
    %c0_160 = arith.constant 0 : index
    %c0_161 = arith.constant 0 : index
    %278 = vector.load %arg7[%c7_159, %c0_160, %c0_161] : memref<8x8x1xf32, #tpu.memory_space<vmem>>, vector<1x8x1xf32>
    %279 = vector.shape_cast %278 : vector<1x8x1xf32> to vector<8x1xf32>
    %280 = arith.mulf %274, %279 : vector<8x1xf32>
    %cst_162 = arith.constant dense<0.000000e+00> : vector<8xf32>
    %281 = vector.multi_reduction <add>, %277, %cst_162 [1] : vector<8x16xf32> to vector<8xf32>
    %282 = vector.shape_cast %281 : vector<8xf32> to vector<8x1xf32>
    %283 = arith.addf %280, %282 : vector<8x1xf32>
    %c7_163 = arith.constant 7 : index
    %c0_164 = arith.constant 0 : index
    %c0_165 = arith.constant 0 : index
    %284 = vector.load %arg7[%c7_163, %c0_164, %c0_165] : memref<8x8x1xf32, #tpu.memory_space<vmem>>, vector<1x8x1xf32>
    %285 = vector.shape_cast %284 : vector<1x8x1xf32> to vector<8x1xf32>
    %286 = vector.shape_cast %283 : vector<8x1xf32> to vector<1x8x1xf32>
    tpu.vector_store %arg7[%c7_163, %c0_164, %c0_165], %286 {strides = array<i32>} : memref<8x8x1xf32, #tpu.memory_space<vmem>>, vector<1x8x1xf32>,
    %c7_166 = arith.constant 7 : index
    %c0_167 = arith.constant 0 : index
    %c0_168 = arith.constant 0 : index
    %287 = vector.load %arg8[%c7_166, %c0_167, %c0_168] : memref<8x8x8xf32, #tpu.memory_space<vmem>>, vector<1x8x8xf32>
    %288 = vector.shape_cast %287 : vector<1x8x8xf32> to vector<8x8xf32>
    %289 = vector.broadcast %274 : vector<8x1xf32> to vector<8x8xf32>
    %290 = arith.mulf %289, %288 : vector<8x8xf32>
    %291 = arith.truncf %277 : vector<8x16xf32> to vector<8x16xbf16>
    %cst_169 = arith.constant dense<0.000000e+00> : vector<8x8xf32>
    %292 = tpu.matmul %291, %266, %cst_169 {dimension_numbers = #tpu.dot_dimension_numbers<[1], [0], [0], [1], [0, 0, 1, 1], [], []>} : vector<8x16xbf16>, vector<16x8xbf16>, vector<8x8xf32> -> vector<8x8xf32>
    %293 = arith.addf %290, %292 : vector<8x8xf32>
    %c7_170 = arith.constant 7 : index
    %c0_171 = arith.constant 0 : index
    %c0_172 = arith.constant 0 : index
    %294 = vector.load %arg8[%c7_170, %c0_171, %c0_172] : memref<8x8x8xf32, #tpu.memory_space<vmem>>, vector<1x8x8xf32>
    %295 = vector.shape_cast %294 : vector<1x8x8xf32> to vector<8x8xf32>
    %296 = vector.shape_cast %293 : vector<8x8xf32> to vector<1x8x8xf32>
    tpu.vector_store %arg8[%c7_170, %c0_171, %c0_172], %296 {strides = array<i32>} : memref<8x8x8xf32, #tpu.memory_space<vmem>>, vector<1x8x8xf32>,
    %c7_173 = arith.constant 7 : index
    %c0_174 = arith.constant 0 : index
    %c0_175 = arith.constant 0 : index
    %297 = vector.load %arg6[%c7_173, %c0_174, %c0_175] : memref<8x8x1xf32, #tpu.memory_space<vmem>>, vector<1x8x1xf32>
    %298 = vector.shape_cast %297 : vector<1x8x1xf32> to vector<8x1xf32>
    %299 = vector.shape_cast %272 : vector<8x1xf32> to vector<1x8x1xf32>
    tpu.vector_store %arg6[%c7_173, %c0_174, %c0_175], %299 {strides = array<i32>} : memref<8x8x1xf32, #tpu.memory_space<vmem>>, vector<1x8x1xf32>,
    %c0_i32_176 = arith.constant 0 : i32
    %300 = arith.cmpi eq, %arg2, %c0_i32_176 : i32
    %301 = arith.extui %300 : i1 to i32
    %c0_i32_177 = arith.constant 0 : i32
    %302 = arith.cmpi ne, %301, %c0_i32_177 : i32
    scf.if %302 {
      %c0_178 = arith.constant 0 : index
      %c0_179 = arith.constant 0 : index
      %c0_180 = arith.constant 0 : index
      %303 = vector.load %arg7[%c0_178, %c0_179, %c0_180] : memref<8x8x1xf32, #tpu.memory_space<vmem>>, vector<1x8x1xf32>
      %304 = vector.shape_cast %303 : vector<1x8x1xf32> to vector<8x1xf32>
      %305 = tpu.reciprocal %304 {approx = true} : vector<8x1xf32> -> vector<8x1xf32>
      %c0_181 = arith.constant 0 : index
      %c0_182 = arith.constant 0 : index
      %c0_183 = arith.constant 0 : index
      %306 = vector.load %arg8[%c0_181, %c0_182, %c0_183] : memref<8x8x8xf32, #tpu.memory_space<vmem>>, vector<1x8x8xf32>
      %307 = vector.shape_cast %306 : vector<1x8x8xf32> to vector<8x8xf32>
      %308 = vector.broadcast %305 : vector<8x1xf32> to vector<8x8xf32>
      %309 = arith.mulf %307, %308 : vector<8x8xf32>
      %c0_184 = arith.constant 0 : index
      %c0_185 = arith.constant 0 : index
      %c0_186 = arith.constant 0 : index
      %310 = vector.load %arg5[%c0_184, %c0_185, %c0_186] : memref<1x8x64xf32, #tpu.memory_space<vmem>>, vector<1x8x8xf32>
      %311 = vector.shape_cast %310 : vector<1x8x8xf32> to vector<8x8xf32>
      %312 = vector.shape_cast %309 : vector<8x8xf32> to vector<1x8x8xf32>
      tpu.vector_store %arg5[%c0_184, %c0_185, %c0_186], %312 {strides = array<i32>} : memref<1x8x64xf32, #tpu.memory_space<vmem>>, vector<1x8x8xf32>,
      %c1_187 = arith.constant 1 : index
      %c0_188 = arith.constant 0 : index
      %c0_189 = arith.constant 0 : index
      %313 = vector.load %arg7[%c1_187, %c0_188, %c0_189] : memref<8x8x1xf32, #tpu.memory_space<vmem>>, vector<1x8x1xf32>
      %314 = vector.shape_cast %313 : vector<1x8x1xf32> to vector<8x1xf32>
      %315 = tpu.reciprocal %314 {approx = true} : vector<8x1xf32> -> vector<8x1xf32>
      %c1_190 = arith.constant 1 : index
      %c0_191 = arith.constant 0 : index
      %c0_192 = arith.constant 0 : index
      %316 = vector.load %arg8[%c1_190, %c0_191, %c0_192] : memref<8x8x8xf32, #tpu.memory_space<vmem>>, vector<1x8x8xf32>
      %317 = vector.shape_cast %316 : vector<1x8x8xf32> to vector<8x8xf32>
      %318 = vector.broadcast %315 : vector<8x1xf32> to vector<8x8xf32>
      %319 = arith.mulf %317, %318 : vector<8x8xf32>
      %c0_193 = arith.constant 0 : index
      %c0_194 = arith.constant 0 : index
      %c8 = arith.constant 8 : index
      %320 = vector.load %arg5[%c0_193, %c0_194, %c8] : memref<1x8x64xf32, #tpu.memory_space<vmem>>, vector<1x8x8xf32>
      %321 = vector.shape_cast %320 : vector<1x8x8xf32> to vector<8x8xf32>
      %322 = vector.shape_cast %319 : vector<8x8xf32> to vector<1x8x8xf32>
      tpu.vector_store %arg5[%c0_193, %c0_194, %c8], %322 {strides = array<i32>} : memref<1x8x64xf32, #tpu.memory_space<vmem>>, vector<1x8x8xf32>,
      %c2_195 = arith.constant 2 : index
      %c0_196 = arith.constant 0 : index
      %c0_197 = arith.constant 0 : index
      %323 = vector.load %arg7[%c2_195, %c0_196, %c0_197] : memref<8x8x1xf32, #tpu.memory_space<vmem>>, vector<1x8x1xf32>
      %324 = vector.shape_cast %323 : vector<1x8x1xf32> to vector<8x1xf32>
      %325 = tpu.reciprocal %324 {approx = true} : vector<8x1xf32> -> vector<8x1xf32>
      %c2_198 = arith.constant 2 : index
      %c0_199 = arith.constant 0 : index
      %c0_200 = arith.constant 0 : index
      %326 = vector.load %arg8[%c2_198, %c0_199, %c0_200] : memref<8x8x8xf32, #tpu.memory_space<vmem>>, vector<1x8x8xf32>
      %327 = vector.shape_cast %326 : vector<1x8x8xf32> to vector<8x8xf32>
      %328 = vector.broadcast %325 : vector<8x1xf32> to vector<8x8xf32>
      %329 = arith.mulf %327, %328 : vector<8x8xf32>
      %c0_201 = arith.constant 0 : index
      %c0_202 = arith.constant 0 : index
      %c16 = arith.constant 16 : index
      %330 = vector.load %arg5[%c0_201, %c0_202, %c16] : memref<1x8x64xf32, #tpu.memory_space<vmem>>, vector<1x8x8xf32>
      %331 = vector.shape_cast %330 : vector<1x8x8xf32> to vector<8x8xf32>
      %332 = vector.shape_cast %329 : vector<8x8xf32> to vector<1x8x8xf32>
      tpu.vector_store %arg5[%c0_201, %c0_202, %c16], %332 {strides = array<i32>} : memref<1x8x64xf32, #tpu.memory_space<vmem>>, vector<1x8x8xf32>,
      %c3_203 = arith.constant 3 : index
      %c0_204 = arith.constant 0 : index
      %c0_205 = arith.constant 0 : index
      %333 = vector.load %arg7[%c3_203, %c0_204, %c0_205] : memref<8x8x1xf32, #tpu.memory_space<vmem>>, vector<1x8x1xf32>
      %334 = vector.shape_cast %333 : vector<1x8x1xf32> to vector<8x1xf32>
      %335 = tpu.reciprocal %334 {approx = true} : vector<8x1xf32> -> vector<8x1xf32>
      %c3_206 = arith.constant 3 : index
      %c0_207 = arith.constant 0 : index
      %c0_208 = arith.constant 0 : index
      %336 = vector.load %arg8[%c3_206, %c0_207, %c0_208] : memref<8x8x8xf32, #tpu.memory_space<vmem>>, vector<1x8x8xf32>
      %337 = vector.shape_cast %336 : vector<1x8x8xf32> to vector<8x8xf32>
      %338 = vector.broadcast %335 : vector<8x1xf32> to vector<8x8xf32>
      %339 = arith.mulf %337, %338 : vector<8x8xf32>
      %c0_209 = arith.constant 0 : index
      %c0_210 = arith.constant 0 : index
      %c24 = arith.constant 24 : index
      %340 = vector.load %arg5[%c0_209, %c0_210, %c24] : memref<1x8x64xf32, #tpu.memory_space<vmem>>, vector<1x8x8xf32>
      %341 = vector.shape_cast %340 : vector<1x8x8xf32> to vector<8x8xf32>
      %342 = vector.shape_cast %339 : vector<8x8xf32> to vector<1x8x8xf32>
      tpu.vector_store %arg5[%c0_209, %c0_210, %c24], %342 {strides = array<i32>} : memref<1x8x64xf32, #tpu.memory_space<vmem>>, vector<1x8x8xf32>,
      %c4_211 = arith.constant 4 : index
      %c0_212 = arith.constant 0 : index
      %c0_213 = arith.constant 0 : index
      %343 = vector.load %arg7[%c4_211, %c0_212, %c0_213] : memref<8x8x1xf32, #tpu.memory_space<vmem>>, vector<1x8x1xf32>
      %344 = vector.shape_cast %343 : vector<1x8x1xf32> to vector<8x1xf32>
      %345 = tpu.reciprocal %344 {approx = true} : vector<8x1xf32> -> vector<8x1xf32>
      %c4_214 = arith.constant 4 : index
      %c0_215 = arith.constant 0 : index
      %c0_216 = arith.constant 0 : index
      %346 = vector.load %arg8[%c4_214, %c0_215, %c0_216] : memref<8x8x8xf32, #tpu.memory_space<vmem>>, vector<1x8x8xf32>
      %347 = vector.shape_cast %346 : vector<1x8x8xf32> to vector<8x8xf32>
      %348 = vector.broadcast %345 : vector<8x1xf32> to vector<8x8xf32>
      %349 = arith.mulf %347, %348 : vector<8x8xf32>
      %c0_217 = arith.constant 0 : index
      %c0_218 = arith.constant 0 : index
      %c32 = arith.constant 32 : index
      %350 = vector.load %arg5[%c0_217, %c0_218, %c32] : memref<1x8x64xf32, #tpu.memory_space<vmem>>, vector<1x8x8xf32>
      %351 = vector.shape_cast %350 : vector<1x8x8xf32> to vector<8x8xf32>
      %352 = vector.shape_cast %349 : vector<8x8xf32> to vector<1x8x8xf32>
      tpu.vector_store %arg5[%c0_217, %c0_218, %c32], %352 {strides = array<i32>} : memref<1x8x64xf32, #tpu.memory_space<vmem>>, vector<1x8x8xf32>,
      %c5_219 = arith.constant 5 : index
      %c0_220 = arith.constant 0 : index
      %c0_221 = arith.constant 0 : index
      %353 = vector.load %arg7[%c5_219, %c0_220, %c0_221] : memref<8x8x1xf32, #tpu.memory_space<vmem>>, vector<1x8x1xf32>
      %354 = vector.shape_cast %353 : vector<1x8x1xf32> to vector<8x1xf32>
      %355 = tpu.reciprocal %354 {approx = true} : vector<8x1xf32> -> vector<8x1xf32>
      %c5_222 = arith.constant 5 : index
      %c0_223 = arith.constant 0 : index
      %c0_224 = arith.constant 0 : index
      %356 = vector.load %arg8[%c5_222, %c0_223, %c0_224] : memref<8x8x8xf32, #tpu.memory_space<vmem>>, vector<1x8x8xf32>
      %357 = vector.shape_cast %356 : vector<1x8x8xf32> to vector<8x8xf32>
      %358 = vector.broadcast %355 : vector<8x1xf32> to vector<8x8xf32>
      %359 = arith.mulf %357, %358 : vector<8x8xf32>
      %c0_225 = arith.constant 0 : index
      %c0_226 = arith.constant 0 : index
      %c40 = arith.constant 40 : index
      %360 = vector.load %arg5[%c0_225, %c0_226, %c40] : memref<1x8x64xf32, #tpu.memory_space<vmem>>, vector<1x8x8xf32>
      %361 = vector.shape_cast %360 : vector<1x8x8xf32> to vector<8x8xf32>
      %362 = vector.shape_cast %359 : vector<8x8xf32> to vector<1x8x8xf32>
      tpu.vector_store %arg5[%c0_225, %c0_226, %c40], %362 {strides = array<i32>} : memref<1x8x64xf32, #tpu.memory_space<vmem>>, vector<1x8x8xf32>,
      %c6_227 = arith.constant 6 : index
      %c0_228 = arith.constant 0 : index
      %c0_229 = arith.constant 0 : index
      %363 = vector.load %arg7[%c6_227, %c0_228, %c0_229] : memref<8x8x1xf32, #tpu.memory_space<vmem>>, vector<1x8x1xf32>
      %364 = vector.shape_cast %363 : vector<1x8x1xf32> to vector<8x1xf32>
      %365 = tpu.reciprocal %364 {approx = true} : vector<8x1xf32> -> vector<8x1xf32>
      %c6_230 = arith.constant 6 : index
      %c0_231 = arith.constant 0 : index
      %c0_232 = arith.constant 0 : index
      %366 = vector.load %arg8[%c6_230, %c0_231, %c0_232] : memref<8x8x8xf32, #tpu.memory_space<vmem>>, vector<1x8x8xf32>
      %367 = vector.shape_cast %366 : vector<1x8x8xf32> to vector<8x8xf32>
      %368 = vector.broadcast %365 : vector<8x1xf32> to vector<8x8xf32>
      %369 = arith.mulf %367, %368 : vector<8x8xf32>
      %c0_233 = arith.constant 0 : index
      %c0_234 = arith.constant 0 : index
      %c48 = arith.constant 48 : index
      %370 = vector.load %arg5[%c0_233, %c0_234, %c48] : memref<1x8x64xf32, #tpu.memory_space<vmem>>, vector<1x8x8xf32>
      %371 = vector.shape_cast %370 : vector<1x8x8xf32> to vector<8x8xf32>
      %372 = vector.shape_cast %369 : vector<8x8xf32> to vector<1x8x8xf32>
      tpu.vector_store %arg5[%c0_233, %c0_234, %c48], %372 {strides = array<i32>} : memref<1x8x64xf32, #tpu.memory_space<vmem>>, vector<1x8x8xf32>,
      %c7_235 = arith.constant 7 : index
      %c0_236 = arith.constant 0 : index
      %c0_237 = arith.constant 0 : index
      %373 = vector.load %arg7[%c7_235, %c0_236, %c0_237] : memref<8x8x1xf32, #tpu.memory_space<vmem>>, vector<1x8x1xf32>
      %374 = vector.shape_cast %373 : vector<1x8x1xf32> to vector<8x1xf32>
      %375 = tpu.reciprocal %374 {approx = true} : vector<8x1xf32> -> vector<8x1xf32>
      %c7_238 = arith.constant 7 : index
      %c0_239 = arith.constant 0 : index
      %c0_240 = arith.constant 0 : index
      %376 = vector.load %arg8[%c7_238, %c0_239, %c0_240] : memref<8x8x8xf32, #tpu.memory_space<vmem>>, vector<1x8x8xf32>
      %377 = vector.shape_cast %376 : vector<1x8x8xf32> to vector<8x8xf32>
      %378 = vector.broadcast %375 : vector<8x1xf32> to vector<8x8xf32>
      %379 = arith.mulf %377, %378 : vector<8x8xf32>
      %c0_241 = arith.constant 0 : index
      %c0_242 = arith.constant 0 : index
      %c56 = arith.constant 56 : index
      %380 = vector.load %arg5[%c0_241, %c0_242, %c56] : memref<1x8x64xf32, #tpu.memory_space<vmem>>, vector<1x8x8xf32>
      %381 = vector.shape_cast %380 : vector<1x8x8xf32> to vector<8x8xf32>
      %382 = vector.shape_cast %379 : vector<8x8xf32> to vector<1x8x8xf32>
      tpu.vector_store %arg5[%c0_241, %c0_242, %c56], %382 {strides = array<i32>} : memref<1x8x64xf32, #tpu.memory_space<vmem>>, vector<1x8x8xf32>,
    } else {
    }
    return
  }
  func.func @transform_0(%arg0: i32, %arg1: i32, %arg2: i32) -> (i32, i32, i32) {
    %c0_i32 = arith.constant 0 : i32
    %c0_i32_0 = arith.constant 0 : i32
    return %arg0, %arg1, %c0_i32 : i32, i32, i32
  }
  func.func @transform_1(%arg0: i32, %arg1: i32, %arg2: i32) -> (i32, i32, i32) {
    %c0_i32 = arith.constant 0 : i32
    %c0_i32_0 = arith.constant 0 : i32
    return %arg0, %arg2, %c0_i32 : i32, i32, i32
  }
  func.func @transform_2(%arg0: i32, %arg1: i32, %arg2: i32) -> (i32, i32, i32) {
    %c0_i32 = arith.constant 0 : i32
    %c0_i32_0 = arith.constant 0 : i32
    return %arg0, %arg1, %c0_i32 : i32, i32, i32
  }
}

module attributes {stable_mosaic.version = 11 : i64} {
  func.func @_linear_kernel(%arg0: i32, %arg1: i32, %arg2: i32, %arg3: memref<16x32xf32, #tpu.memory_space<vmem>>, %arg4: memref<32x128xbf16, #tpu.memory_space<vmem>>, %arg5: memref<1x128xf32, #tpu.memory_space<vmem>>, %arg6: memref<1x32xf32, #tpu.memory_space<vmem>>, %arg7: memref<1x32xf32, #tpu.memory_space<vmem>>, %arg8: memref<16x128xf32, #tpu.memory_space<vmem>>, %arg9: memref<16x32xbf16, #tpu.memory_space<vmem>>) attributes {dimension_semantics = [#tpu.dimension_semantics<parallel>, #tpu.dimension_semantics<arbitrary>, #tpu.dimension_semantics<arbitrary>], iteration_bounds = array<i64: 1, 1, 1>, scalar_prefetch = 0 : i64, scratch_operands = 1 : i64, tpu.core_type = #tpu.core_type<tc>, window_params = [{transform_indices = @transform_0, window_bounds = array<i64: 16, 32>}, {transform_indices = @transform_1, window_bounds = array<i64: 32, 128>}, {transform_indices = @transform_2, window_bounds = array<i64: 1, 128>}, {transform_indices = @transform_3, window_bounds = array<i64: 1, 32>}, {transform_indices = @transform_4, window_bounds = array<i64: 1, 32>}, {transform_indices = @transform_5, window_bounds = array<i64: 16, 128>}]} {
    %c0_i32 = arith.constant 0 : i32
    %0 = arith.cmpi eq, %arg1, %c0_i32 : i32
    %1 = arith.extui %0 : i1 to i32
    %c0_i32_0 = arith.constant 0 : i32
    %2 = arith.cmpi ne, %1, %c0_i32_0 : i32
    scf.if %2 {
      %c0_8 = arith.constant 0 : index
      %c0_9 = arith.constant 0 : index
      %10 = vector.load %arg3[%c0_8, %c0_9] : memref<16x32xf32, #tpu.memory_space<vmem>>, vector<16x32xf32>
      %cst_10 = arith.constant dense<0.000000e+00> : vector<16xf32>
      %11 = vector.multi_reduction <add>, %10, %cst_10 [1] : vector<16x32xf32> to vector<16xf32>
      %12 = vector.shape_cast %11 : vector<16xf32> to vector<16x1xf32>
      %cst_11 = arith.constant 3.200000e+01 : f32
      %13 = vector.broadcast %cst_11 : f32 to vector<16x1xf32>
      %14 = arith.divf %12, %13 : vector<16x1xf32>
      %15 = vector.broadcast %14 : vector<16x1xf32> to vector<16x32xf32>
      %16 = arith.subf %10, %15 : vector<16x32xf32>
      %17 = arith.mulf %16, %16 : vector<16x32xf32>
      %cst_12 = arith.constant dense<0.000000e+00> : vector<16xf32>
      %18 = vector.multi_reduction <add>, %17, %cst_12 [1] : vector<16x32xf32> to vector<16xf32>
      %19 = vector.shape_cast %18 : vector<16xf32> to vector<16x1xf32>
      %cst_13 = arith.constant 3.200000e+01 : f32
      %20 = vector.broadcast %cst_13 : f32 to vector<16x1xf32>
      %21 = arith.divf %19, %20 : vector<16x1xf32>
      %22 = vector.broadcast %14 : vector<16x1xf32> to vector<16x32xf32>
      %23 = arith.subf %10, %22 : vector<16x32xf32>
      %cst_14 = arith.constant 9.99999974E-6 : f32
      %24 = vector.broadcast %cst_14 : f32 to vector<16x1xf32>
      %25 = arith.addf %21, %24 : vector<16x1xf32>
      %26 = math.rsqrt %25 : vector<16x1xf32>
      %27 = vector.broadcast %26 : vector<16x1xf32> to vector<16x32xf32>
      %28 = arith.mulf %23, %27 : vector<16x32xf32>
      %c0_15 = arith.constant 0 : index
      %c0_16 = arith.constant 0 : index
      %29 = vector.load %arg6[%c0_15, %c0_16] : memref<1x32xf32, #tpu.memory_space<vmem>>, vector<1x32xf32>
      %30 = vector.broadcast %29 : vector<1x32xf32> to vector<16x32xf32>
      %31 = arith.mulf %28, %30 : vector<16x32xf32>
      %c0_17 = arith.constant 0 : index
      %c0_18 = arith.constant 0 : index
      %32 = vector.load %arg7[%c0_17, %c0_18] : memref<1x32xf32, #tpu.memory_space<vmem>>, vector<1x32xf32>
      %33 = vector.broadcast %32 : vector<1x32xf32> to vector<16x32xf32>
      %34 = arith.addf %31, %33 : vector<16x32xf32>
      %35 = arith.truncf %34 : vector<16x32xf32> to vector<16x32xbf16>
      %c0_19 = arith.constant 0 : index
      %c0_20 = arith.constant 0 : index
      %36 = vector.load %arg9[%c0_19, %c0_20] : memref<16x32xbf16, #tpu.memory_space<vmem>>, vector<16x32xbf16>
      tpu.vector_store %arg9[%c0_19, %c0_20], %35 {strides = array<i32>} : memref<16x32xbf16, #tpu.memory_space<vmem>>, vector<16x32xbf16>,
    } else {
    }
    %c0 = arith.constant 0 : index
    %c0_1 = arith.constant 0 : index
    %3 = vector.load %arg9[%c0, %c0_1] : memref<16x32xbf16, #tpu.memory_space<vmem>>, vector<16x32xbf16>
    %c0_2 = arith.constant 0 : index
    %c0_3 = arith.constant 0 : index
    %4 = vector.load %arg4[%c0_2, %c0_3] : memref<32x128xbf16, #tpu.memory_space<vmem>>, vector<32x128xbf16>
    %cst = arith.constant dense<0.000000e+00> : vector<16x128xf32>
    %5 = tpu.matmul %3, %4, %cst {dimension_numbers = #tpu.dot_dimension_numbers<[1], [0], [0], [1], [0, 0, 1, 1], [], []>} : vector<16x32xbf16>, vector<32x128xbf16>, vector<16x128xf32> -> vector<16x128xf32>
    %c0_4 = arith.constant 0 : index
    %c0_5 = arith.constant 0 : index
    %6 = vector.load %arg5[%c0_4, %c0_5] : memref<1x128xf32, #tpu.memory_space<vmem>>, vector<1x128xf32>
    %7 = vector.broadcast %6 : vector<1x128xf32> to vector<16x128xf32>
    %8 = arith.addf %5, %7 : vector<16x128xf32>
    %c0_6 = arith.constant 0 : index
    %c0_7 = arith.constant 0 : index
    %9 = vector.load %arg8[%c0_6, %c0_7] : memref<16x128xf32, #tpu.memory_space<vmem>>, vector<16x128xf32>
    tpu.vector_store %arg8[%c0_6, %c0_7], %8 {strides = array<i32>} : memref<16x128xf32, #tpu.memory_space<vmem>>, vector<16x128xf32>,
    return
  }
  func.func @transform_0(%arg0: i32, %arg1: i32, %arg2: i32) -> (i32, i32) {
    %c0_i32 = arith.constant 0 : i32
    return %arg0, %arg2 : i32, i32
  }
  func.func @transform_1(%arg0: i32, %arg1: i32, %arg2: i32) -> (i32, i32) {
    %c0_i32 = arith.constant 0 : i32
    return %arg2, %arg1 : i32, i32
  }
  func.func @transform_2(%arg0: i32, %arg1: i32, %arg2: i32) -> (i32, i32) {
    %c0_i32 = arith.constant 0 : i32
    %c0_i32_0 = arith.constant 0 : i32
    return %c0_i32, %arg1 : i32, i32
  }
  func.func @transform_3(%arg0: i32, %arg1: i32, %arg2: i32) -> (i32, i32) {
    %c0_i32 = arith.constant 0 : i32
    %c0_i32_0 = arith.constant 0 : i32
    return %c0_i32, %arg2 : i32, i32
  }
  func.func @transform_4(%arg0: i32, %arg1: i32, %arg2: i32) -> (i32, i32) {
    %c0_i32 = arith.constant 0 : i32
    %c0_i32_0 = arith.constant 0 : i32
    return %c0_i32, %arg2 : i32, i32
  }
  func.func @transform_5(%arg0: i32, %arg1: i32, %arg2: i32) -> (i32, i32) {
    %c0_i32 = arith.constant 0 : i32
    return %arg0, %arg1 : i32, i32
  }
}

module attributes {stable_mosaic.version = 11 : i64} {
  func.func @_linear_kernel(%arg0: i32, %arg1: i32, %arg2: i32, %arg3: memref<16x128xf32, #tpu.memory_space<vmem>>, %arg4: memref<128x32xbf16, #tpu.memory_space<vmem>>, %arg5: memref<1x32xf32, #tpu.memory_space<vmem>>, %arg6: memref<16x32xf32, #tpu.memory_space<vmem>>, %arg7: memref<16x32xf32, #tpu.memory_space<vmem>>) attributes {dimension_semantics = [#tpu.dimension_semantics<parallel>, #tpu.dimension_semantics<parallel>, #tpu.dimension_semantics<arbitrary>], iteration_bounds = array<i64: 1, 1, 1>, scalar_prefetch = 0 : i64, scratch_operands = 0 : i64, tpu.core_type = #tpu.core_type<tc>, window_params = [{transform_indices = @transform_0, window_bounds = array<i64: 16, 128>}, {transform_indices = @transform_1, window_bounds = array<i64: 128, 32>}, {transform_indices = @transform_2, window_bounds = array<i64: 1, 32>}, {transform_indices = @transform_3, window_bounds = array<i64: 16, 32>}, {transform_indices = @transform_4, window_bounds = array<i64: 16, 32>}]} {
    %c0 = arith.constant 0 : index
    %c0_0 = arith.constant 0 : index
    %0 = vector.load %arg3[%c0, %c0_0] : memref<16x128xf32, #tpu.memory_space<vmem>>, vector<16x128xf32>
    %1 = arith.truncf %0 : vector<16x128xf32> to vector<16x128xbf16>
    %c0_1 = arith.constant 0 : index
    %c0_2 = arith.constant 0 : index
    %2 = vector.load %arg4[%c0_1, %c0_2] : memref<128x32xbf16, #tpu.memory_space<vmem>>, vector<128x32xbf16>
    %cst = arith.constant dense<0.000000e+00> : vector<16x32xf32>
    %3 = tpu.matmul %1, %2, %cst {dimension_numbers = #tpu.dot_dimension_numbers<[1], [0], [0], [1], [0, 0, 1, 1], [], []>} : vector<16x128xbf16>, vector<128x32xbf16>, vector<16x32xf32> -> vector<16x32xf32>
    %c0_3 = arith.constant 0 : index
    %c0_4 = arith.constant 0 : index
    %4 = vector.load %arg5[%c0_3, %c0_4] : memref<1x32xf32, #tpu.memory_space<vmem>>, vector<1x32xf32>
    %5 = vector.broadcast %4 : vector<1x32xf32> to vector<16x32xf32>
    %6 = arith.addf %3, %5 : vector<16x32xf32>
    %c0_5 = arith.constant 0 : index
    %c0_6 = arith.constant 0 : index
    %7 = vector.load %arg6[%c0_5, %c0_6] : memref<16x32xf32, #tpu.memory_space<vmem>>, vector<16x32xf32>
    %8 = arith.addf %6, %7 : vector<16x32xf32>
    %c0_7 = arith.constant 0 : index
    %c0_8 = arith.constant 0 : index
    %9 = vector.load %arg7[%c0_7, %c0_8] : memref<16x32xf32, #tpu.memory_space<vmem>>, vector<16x32xf32>
    tpu.vector_store %arg7[%c0_7, %c0_8], %8 {strides = array<i32>} : memref<16x32xf32, #tpu.memory_space<vmem>>, vector<16x32xf32>,
    return
  }
  func.func @transform_0(%arg0: i32, %arg1: i32, %arg2: i32) -> (i32, i32) {
    %c0_i32 = arith.constant 0 : i32
    return %arg0, %arg2 : i32, i32
  }
  func.func @transform_1(%arg0: i32, %arg1: i32, %arg2: i32) -> (i32, i32) {
    %c0_i32 = arith.constant 0 : i32
    return %arg2, %arg1 : i32, i32
  }
  func.func @transform_2(%arg0: i32, %arg1: i32, %arg2: i32) -> (i32, i32) {
    %c0_i32 = arith.constant 0 : i32
    %c0_i32_0 = arith.constant 0 : i32
    return %c0_i32, %arg1 : i32, i32
  }
  func.func @transform_3(%arg0: i32, %arg1: i32, %arg2: i32) -> (i32, i32) {
    %c0_i32 = arith.constant 0 : i32
    return %arg0, %arg1 : i32, i32
  }
  func.func @transform_4(%arg0: i32, %arg1: i32, %arg2: i32) -> (i32, i32) {
    %c0_i32 = arith.constant 0 : i32
    return %arg0, %arg1 : i32, i32
  }
}

</mosaic_0001>

<bundles_post_ra>
// kernel: basic_transformer.9
= control target key start
LH: loop header
LB: loop body
LE: loop exit
PB: predicated region body
PF: predicated region fallthrough
CT: control target
= control target key end

     0   :  { %vm27_vm0 = vcmask 261120   ;;  %v210_v4 = vmov 32.0   ;;  %vm93_vm6 = vcmask 257024   ;;  %vm166_vm9 = vcmask 523264   ;;  %s298_s0 = inlined_call_operand.vmem [shape: f32[16,32], index: 0, kind: input, shape index: {}]   ;;  %s299_s3 = inlined_call_operand.vmem [shape: f32[1,32], index: 3, kind: input, shape index: {}]   ;;  %s300_s4 = inlined_call_operand.vmem [shape: f32[1,32], index: 4, kind: input, shape index: {}]   ;;  %s301_s1 = inlined_call_operand.vmem [shape: bf16[32,192], index: 1, kind: input, shape index: {}]   ;;  %s302_s2 = inlined_call_operand.vmem [shape: f32[1,192], index: 2, kind: input, shape index: {}]   ;;  %s303_s5 = inlined_call_operand.vmem [shape: f32[16,192], index: 5, kind: output, shape index: {}]  }
   0x1   :  { %v25_v0 = vld [vmem:[%s298_s0] sm:$0xff]  ;;  %v26_v2 = vld [vmem:[%s298_s0 + $0x8] sm:$0xff]  ;;  %204 = vrcp.f32 %v210_v4  ;;  %v188_v24 = vld [vmem:[%s301_s1 + $0x10] sm:$0xf] }
   0x2   :  { %v28_v1 = vsel %vm27_vm0, %v25_v0, 0.0  ;;  %v31_v3 = vsel %vm27_vm0, %v26_v2, 0.0  ;;  %v200_v25 = vld [vmem:[%s301_s1 + $0x14] sm:$0xf0]  ;;  %v199_v26 = vld [vmem:[%s301_s1 + $0x14] sm:$0xf] }
   0x3   :  { %29 = vadd.xlane.f32.xlu0 %v28_v1  ;;  %v189_v27 = vor.u32 %v200_v25, %v188_v24  ;;  %v190_v28 = vld [vmem:[%s301_s1 + $0x18] sm:$0xf0]  ;;  %v180_v29 = vld [vmem:[%s301_s1] sm:$0xf]  ;;  %v198_v30 = vld [vmem:[%s301_s1 + $0x4] sm:$0xf0] }
   0x4   :  { %v193_v32 = vor.u32 %v199_v26, %v190_v28  ;;  %v197_v33 = vld [vmem:[%s301_s1 + $0x4] sm:$0xf]  ;;  %v182_v34 = vld [vmem:[%s301_s1 + $0x8] sm:$0xf0]  ;;  %v181_v36 = vor.u32 %v198_v30, %v180_v29  ;;  %v202_v47 = vld [vmem:[%s299_s3] ss:$0 sm:$0xff] }
   0x5   :  { %143 = vmatpush.bf16.msra.mxu0 %v189_v27  ;;  %v185_v37 = vor.u32 %v197_v33, %v182_v34  ;;  %v203_v50 = vld [vmem:[%s300_s4] ss:$0 sm:$0xff] }
   0x6   :  { %157 = vmatpush.bf16.msra.mxu1 %v193_v32 }
   0x7   :  { %v205_v5 = vpop.eup %204 }
   0x8   :  { %v35_v6 = vmul.f32 32.0, %v205_v5  ;;  %vm39_vm1 = vweird.f32 %v205_v5 }
   0x9   :  { %144 = vmatpush.bf16.msra.mxu0 %v181_v36 }
   0xa   :  { %v36_v7 = vsub.f32 1.0, %v35_v6  ;;  %158 = vmatpush.bf16.msra.mxu1 %v185_v37 }
   0xb   :  { %32 = vadd.xlane.f32.xlu0 %v31_v3 }
   0xc   :  { %v37_v8 = vmul.f32 %v205_v5, %v36_v7 }
   0xe   :  { %v38_v9 = vadd.f32 %v205_v5, %v37_v8 }
  0x10   :  { %v40_v10 = vsel %vm39_vm1, %v205_v5, %v38_v9 }
  0x76   :  { %v30_v11 = vpop.xlane.xlu0 %29 }
  0x77   :  { %v41_v12 = vmul.f32 %v40_v10, %v30_v11 }
  0x79   :  { %v43_v13 = vsub.f32 %v25_v0, %v41_v12  ;;  %v102_v0 = vld [vmem:[%s302_s2] sm:$0x3] }
  0x7a   :  { %v104_v1 = vperm.slane %v102_v0, 0 }
  0x7b   :  { %v45_v14 = vmul.f32 %v43_v13, %v43_v13 }
  0x7d   :  { %v47_v15 = vsel %vm27_vm0, %v45_v14, 0.0 }
  0x7e   :  { %48 = vadd.xlane.f32.xlu1 %v47_v15  ;;  %v33_v16 = vpop.xlane.xlu0 %32 }
  0x7f   :  { %v42_v17 = vmul.f32 %v40_v10, %v33_v16 }
  0x81   :  { %v44_v18 = vsub.f32 %v26_v2, %v42_v17  ;;  %v105_v2 = vperm.slane %v102_v0, 1 }
  0x83   :  { %v46_v19 = vmul.f32 %v44_v18, %v44_v18 }
  0x85   :  { %v50_v20 = vsel %vm27_vm0, %v46_v19, 0.0 }
  0x86   :  { %51 = vadd.xlane.f32.xlu1 %v50_v20 }
  0xf1   :  { %v49_v21 = vpop.xlane.xlu1 %48 }
  0xf2   :  { %v53_v22 = vmul.f32 %v49_v21, %v40_v10 }
  0xf4   :  { %v55_v23 = vadd.f32 1e-05, %v53_v22 }
  0xf6   :  { %206 = vrsqrt.f32 %v55_v23  ;;  %vm63_vm3 = vweird.f32 %v55_v23 }
  0xf9   :  { %v52_v31 = vpop.xlane.xlu1 %51 }
  0xfa   :  { %v54_v35 = vmul.f32 %v52_v31, %v40_v10 }
  0xfc   :  { %v207_v38 = vpop.eup %206  ;;  %v56_v39 = vadd.f32 1e-05, %v54_v35 }
  0xfd   :  { %v58_v40 = vmul.f32 %v207_v38, %v55_v23  ;;  %vm64_vm2 = vweird.f32 %v207_v38 }
  0xfe   :  { %208 = vrsqrt.f32 %v56_v39  ;;  %vm65_vm4 = vmor %vm63_vm3, %vm64_vm2  ;;  %vm73_vm7 = vweird.f32 %v56_v39 }
  0xff   :  { %v59_v41 = vmul.f32 %v207_v38, %v58_v40 }
 0x101   :  { %v60_v42 = vmul.f32 0.5, %v59_v41 }
 0x103   :  { %v61_v43 = vsub.f32 1.5, %v60_v42 }
 0x104   :  { %v209_v44 = vpop.eup %208 }
 0x105   :  { %v62_v45 = vmul.f32 %v207_v38, %v61_v43  ;;  %v68_v46 = vmul.f32 %v209_v44, %v56_v39  ;;  %vm74_vm5 = vweird.f32 %v209_v44 }
 0x106   :  { %vm75_vm8 = vmor %vm73_vm7, %vm74_vm5 }
 0x107   :  { %v66_v48 = vsel %vm65_vm4, %v207_v38, %v62_v45  ;;  %v69_v49 = vmul.f32 %v209_v44, %v68_v46 }
 0x108   :  { %v77_v51 = vmul.f32 %v66_v48, %v43_v13 }
 0x109   :  { %v70_v52 = vmul.f32 0.5, %v69_v49 }
 0x10a   :  { %v83_v53 = vmul.f32 %v202_v47, %v77_v51 }
 0x10b   :  { %v71_v54 = vsub.f32 1.5, %v70_v52 }
 0x10c   :  { %v89_v55 = vadd.f32 %v203_v50, %v83_v53 }
 0x10d   :  { %v72_v56 = vmul.f32 %v209_v44, %v71_v54 }
 0x10e   :  { %v91_v57 = vpack.c.bf16 %v89_v55, %v89_v55 }
 0x10f   :  { %v76_v58 = vsel %vm75_vm8, %v209_v44, %v72_v56 }
 0x110   :  { %94 = vst.msk [vmem:[#allocation2] sm:$0xf] %vm93_vm6, %v91_v57  ;;  %v78_v59 = vmul.f32 %v76_v58, %v44_v18 }
 0x112   :  { %v84_v60 = vmul.f32 %v202_v47, %v78_v59 }
 0x114   :  { %v90_v61 = vadd.f32 %v203_v50, %v84_v60 }
 0x116   :  { %v92_v62 = vpack.c.bf16 %v90_v61, %v90_v61 }
 0x118   :  { %95 = vst.msk [vmem:[#allocation2 + $0x4] sm:$0xf] %vm93_vm6, %v92_v62 }
 0x11f   :  { %v196_v63 = vld [vmem:[#allocation2] sm:$0xff] }
 0x120   :  { %194 = vmatmul.msk.bf16.vlgmr.msra.gmra.mxu0 %vm27_vm0, %v196_v63  ;;  %195 = vmatmul.msk.bf16.vlgmr.msra.gmra.mxu1 %vm27_vm0, %v196_v63 }
 0x19d   :  { %v146_v3 = vpop.f32.mrf.mxu0  ;;  %v160_v4 = vpop.f32.mrf.mxu1 }
 0x19e   :  { %v147_v5 = vadd.f32 %v146_v3, %v104_v1  ;;  %v161_v6 = vadd.f32 %v160_v4, %v105_v2 }
 0x1a0   :  { %165 = vst [vmem:[%s303_s5] sm:$0xff] %v147_v5 }
 0x1a1   :  { %167 = vst.msk [vmem:[%s303_s5 + $0x8] sm:$0xff] %vm166_vm9, %v161_v6 }
 0x1a5   :  { %v148_v7 = vpop.f32.mrf.mxu0  ;;  %v162_v8 = vpop.f32.mrf.mxu1 }
 0x1a6   :  { %v149_v9 = vadd.f32 %v148_v7, %v104_v1  ;;  %v163_v10 = vadd.f32 %v162_v8, %v105_v2 }
 0x1a8   :  { %168 = vst [vmem:[%s303_s5 + $0x10] sm:$0xff] %v149_v9 }
 0x1a9   :  { %169 = vst.msk [vmem:[%s303_s5 + $0x18] sm:$0xff] %vm166_vm9, %v163_v10 }

// kernel: basic_transformer.13
= control target key start
LH: loop header
LB: loop body
LE: loop exit
PB: predicated region body
PF: predicated region fallthrough
CT: control target
= control target key end

     0   :  { %vm41_vm0 = vcmask 261120   ;;  %s143_s1 = inlined_call_operand.vmem [shape: bf16[32,128], index: 1, kind: input, shape index: {}]   ;;  %s144_s0 = inlined_call_operand.vmem [shape: f32[32,32], index: 0, kind: input, shape index: {}]   ;;  %s145_s2 = inlined_call_operand.vmem [shape: f32[1,128], index: 2, kind: input, shape index: {}]   ;;  %s146_s3 = inlined_call_operand.vmem [shape: f32[32,128], index: 3, kind: output, shape index: {}]  }
   0x1   :  { %v86_v0 = vld [vmem:[%s143_s1 + $0x8] sm:$0xff]  ;;  %v85_v1 = vld [vmem:[%s143_s1] sm:$0xff]  ;;  %v17_v4 = vld [vmem:[%s144_s0 + $0x10] sm:$0xff] }
   0x2   :  { %v15_v2 = vld [vmem:[%s144_s0] sm:$0xff]  ;;  %v16_v3 = vld [vmem:[%s144_s0 + $0x8] sm:$0xff]  ;;  %54 = vmatpush.bf16.msra.mxu0 %v86_v0  ;;  %87 = vmatpush.bf16.msra.mxu1 %v86_v0  ;;  %v18_v5 = vld [vmem:[%s144_s0 + $0x18] sm:$0xff] }
   0x3   :  { %v19_v6 = vpack.c.bf16 %v16_v3, %v15_v2  ;;  %v20_v7 = vpack.c.bf16 %v18_v5, %v17_v4  ;;  %v89_v8 = vld [vmem:[%s145_s2] ss:$0 sm:$0xff] }
   0x6   :  { %55 = vmatpush.bf16.msra.mxu0 %v85_v1  ;;  %88 = vmatpush.bf16.msra.mxu1 %v85_v1 }
   0x9   :  { %83 = vmatmul.msk.bf16.vlgmr.msra.gmra.mxu0 %vm41_vm0, %v19_v6  ;;  %84 = vmatmul.msk.bf16.vlgmr.msra.gmra.mxu1 %vm41_vm0, %v20_v7 }
  0x86   :  { %v57_v9 = vpop.f32.mrf.mxu0  ;;  %v62_v10 = vpop.f32.mrf.mxu1 }
  0x87   :  { %v58_v11 = vadd.f32 %v89_v8, %v57_v9  ;;  %v63_v12 = vadd.f32 %v89_v8, %v62_v10 }
  0x89   :  { %67 = vst [vmem:[%s146_s3] sm:$0xff] %v58_v11 }
  0x8a   :  { %69 = vst [vmem:[%s146_s3 + $0x10] sm:$0xff] %v63_v12 }
  0x8e   :  { %v59_v13 = vpop.f32.mrf.mxu0  ;;  %v64_v14 = vpop.f32.mrf.mxu1 }
  0x8f   :  { %v60_v15 = vadd.f32 %v89_v8, %v59_v13  ;;  %v65_v16 = vadd.f32 %v89_v8, %v64_v14 }
  0x91   :  { %68 = vst [vmem:[%s146_s3 + $0x8] sm:$0xff] %v60_v15 }
  0x92   :  { %70 = vst [vmem:[%s146_s3 + $0x18] sm:$0xff] %v65_v16 }

// kernel: basic_transformer.11
= control target key start
LH: loop header
LB: loop body
LE: loop exit
PB: predicated region body
PF: predicated region fallthrough
CT: control target
= control target key end

     0   :  { %vm57_vm0 = vcmask 523264   ;;  %vm79_vm1 = vcmask 261120   ;;  %s166_s1 = inlined_call_operand.vmem [shape: bf16[64,32], index: 1, kind: input, shape index: {}]   ;;  %s167_s2 = inlined_call_operand.vmem [shape: f32[1,32], index: 2, kind: input, shape index: {}]   ;;  %s168_s0 = inlined_call_operand.vmem [shape: f32[16,64], index: 0, kind: input, shape index: {}]   ;;  %s169_s3 = inlined_call_operand.vmem [shape: f32[16,32], index: 3, kind: input, shape index: {}, may-alias: {3,4}]   ;;  %s170_s4 = inlined_call_operand.vmem [shape: f32[16,32], index: 4, kind: output, shape index: {}, may-alias: {3,4}]  }
   0x1   :  { %v106_v0 = vld [vmem:[%s166_s1 + $0x18] sm:$0xff]  ;;  %v105_v1 = vld [vmem:[%s166_s1 + $0x10] sm:$0xff]  ;;  %v104_v2 = vld [vmem:[%s166_s1 + $0x8] sm:$0xff] }
   0x2   :  { %65 = vmatpush.bf16.msra.mxu0 %v106_v0  ;;  %v103_v3 = vld [vmem:[%s166_s1] sm:$0xff]  ;;  %v19_v5 = vld [vmem:[%s168_s0 + $0x8] sm:$0xff] }
   0x3   :  { %v18_v4 = vld [vmem:[%s168_s0] sm:$0xff] }
   0x4   :  { %v20_v6 = vpack.c.bf16 %v19_v5, %v18_v4  ;;  %v107_v7 = vld [vmem:[%s167_s2] ss:$0 sm:$0xff] }
   0x5   :  { %v75_v9 = vld [vmem:[%s169_s3] sm:$0xff] }
   0x6   :  { %66 = vmatpush.bf16.msra.mxu0 %v105_v1 }
   0xa   :  { %67 = vmatpush.bf16.msra.mxu0 %v104_v2 }
   0xe   :  { %68 = vmatpush.bf16.msra.mxu0 %v103_v3 }
  0x11   :  { %102 = vmatmul.msk.bf16.vlgmr.msra.gmra.mxu0 %vm57_vm0, %v20_v6 }
  0x8e   :  { %v70_v8 = vpop.f32.mrf.mxu0 }
  0x8f   :  { %v71_v10 = vadd.f32 %v107_v7, %v70_v8 }
  0x91   :  { %v77_v11 = vadd.f32 %v75_v9, %v71_v10 }
  0x93   :  { %80 = vst.msk [vmem:[%s170_s4] sm:$0xff] %vm79_vm1, %v77_v11 }
  0x96   :  { %v72_v12 = vpop.f32.mrf.mxu0 }
  0x97   :  { %v73_v14 = vadd.f32 %v107_v7, %v72_v12 }
  0x9a   :  { %v76_v13 = vld [vmem:[%s169_s3 + $0x8] sm:$0xff] }
  0x9b   :  { %v78_v15 = vadd.f32 %v76_v13, %v73_v14 }
  0x9d   :  { %81 = vst.msk [vmem:[%s170_s4 + $0x8] sm:$0xff] %vm79_vm1, %v78_v15 }

// kernel: basic_transformer.12
= control target key start
LH: loop header
LB: loop body
LE: loop exit
PB: predicated region body
PF: predicated region fallthrough
CT: control target
= control target key end

     0   :  { %vm27_vm0 = vcmask 261120   ;;  %v174_v4 = vmov 32.0   ;;  %vm93_vm6 = vcmask 257024   ;;  %vm141_vm9 = vcmask 523264   ;;  %s237_s0 = inlined_call_operand.vmem [shape: f32[16,32], index: 0, kind: input, shape index: {}]   ;;  %s238_s3 = inlined_call_operand.vmem [shape: f32[1,32], index: 3, kind: input, shape index: {}]   ;;  %s239_s4 = inlined_call_operand.vmem [shape: f32[1,32], index: 4, kind: input, shape index: {}]   ;;  %s240_s2 = inlined_call_operand.vmem [shape: f32[1,64], index: 2, kind: input, shape index: {}]   ;;  %s241_s1 = inlined_call_operand.vmem [shape: bf16[32,64], index: 1, kind: input, shape index: {}]   ;;  %s242_s5 = inlined_call_operand.vmem [shape: f32[16,64], index: 5, kind: output, shape index: {}]  }
   0x1   :  { %v25_v0 = vld [vmem:[%s237_s0] sm:$0xff]  ;;  %v26_v2 = vld [vmem:[%s237_s0 + $0x8] sm:$0xff]  ;;  %168 = vrcp.f32 %v174_v4 }
   0x2   :  { %v28_v1 = vsel %vm27_vm0, %v25_v0, 0.0  ;;  %v31_v3 = vsel %vm27_vm0, %v26_v2, 0.0  ;;  %v163_v24 = vld [vmem:[%s241_s1 + $0x8] sm:$0xff]  ;;  %v162_v27 = vld [vmem:[%s241_s1] sm:$0xff] }
   0x3   :  { %29 = vadd.xlane.f32.xlu0 %v28_v1  ;;  %133 = vmatpush.bf16.msra.mxu0 %v163_v24  ;;  %v165_v37 = vld [vmem:[%s238_s3] ss:$0 sm:$0xff] }
   0x4   :  { %v166_v40 = vld [vmem:[%s239_s4] ss:$0 sm:$0xff] }
   0x5   :  { %v167_v54 = vld [vmem:[%s240_s2] ss:$0 sm:$0xff] }
   0x7   :  { %v169_v5 = vpop.eup %168  ;;  %134 = vmatpush.bf16.msra.mxu0 %v162_v27 }
   0x8   :  { %v35_v6 = vmul.f32 32.0, %v169_v5  ;;  %vm39_vm1 = vweird.f32 %v169_v5 }
   0xa   :  { %v36_v7 = vsub.f32 1.0, %v35_v6 }
   0xb   :  { %32 = vadd.xlane.f32.xlu0 %v31_v3 }
   0xc   :  { %v37_v8 = vmul.f32 %v169_v5, %v36_v7 }
   0xe   :  { %v38_v9 = vadd.f32 %v169_v5, %v37_v8 }
  0x10   :  { %v40_v10 = vsel %vm39_vm1, %v169_v5, %v38_v9 }
  0x76   :  { %v30_v11 = vpop.xlane.xlu0 %29 }
  0x77   :  { %v41_v12 = vmul.f32 %v40_v10, %v30_v11 }
  0x79   :  { %v43_v13 = vsub.f32 %v25_v0, %v41_v12 }
  0x7b   :  { %v45_v14 = vmul.f32 %v43_v13, %v43_v13 }
  0x7d   :  { %v47_v15 = vsel %vm27_vm0, %v45_v14, 0.0 }
  0x7e   :  { %48 = vadd.xlane.f32.xlu1 %v47_v15  ;;  %v33_v16 = vpop.xlane.xlu0 %32 }
  0x7f   :  { %v42_v17 = vmul.f32 %v40_v10, %v33_v16 }
  0x81   :  { %v44_v18 = vsub.f32 %v26_v2, %v42_v17 }
  0x83   :  { %v46_v19 = vmul.f32 %v44_v18, %v44_v18 }
  0x85   :  { %v50_v20 = vsel %vm27_vm0, %v46_v19, 0.0 }
  0x86   :  { %51 = vadd.xlane.f32.xlu1 %v50_v20 }
  0xf1   :  { %v49_v21 = vpop.xlane.xlu1 %48 }
  0xf2   :  { %v53_v22 = vmul.f32 %v49_v21, %v40_v10 }
  0xf4   :  { %v55_v23 = vadd.f32 1e-05, %v53_v22 }
  0xf6   :  { %170 = vrsqrt.f32 %v55_v23  ;;  %vm63_vm3 = vweird.f32 %v55_v23 }
  0xf9   :  { %v52_v25 = vpop.xlane.xlu1 %51 }
  0xfa   :  { %v54_v26 = vmul.f32 %v52_v25, %v40_v10 }
  0xfc   :  { %v171_v28 = vpop.eup %170  ;;  %v56_v29 = vadd.f32 1e-05, %v54_v26 }
  0xfd   :  { %v58_v30 = vmul.f32 %v171_v28, %v55_v23  ;;  %vm64_vm2 = vweird.f32 %v171_v28 }
  0xfe   :  { %172 = vrsqrt.f32 %v56_v29  ;;  %vm65_vm4 = vmor %vm63_vm3, %vm64_vm2  ;;  %vm73_vm7 = vweird.f32 %v56_v29 }
  0xff   :  { %v59_v31 = vmul.f32 %v171_v28, %v58_v30 }
 0x101   :  { %v60_v32 = vmul.f32 0.5, %v59_v31 }
 0x103   :  { %v61_v33 = vsub.f32 1.5, %v60_v32 }
 0x104   :  { %v173_v34 = vpop.eup %172 }
 0x105   :  { %v62_v35 = vmul.f32 %v171_v28, %v61_v33  ;;  %v68_v36 = vmul.f32 %v173_v34, %v56_v29  ;;  %vm74_vm5 = vweird.f32 %v173_v34 }
 0x106   :  { %vm75_vm8 = vmor %vm73_vm7, %vm74_vm5 }
 0x107   :  { %v66_v38 = vsel %vm65_vm4, %v171_v28, %v62_v35  ;;  %v69_v39 = vmul.f32 %v173_v34, %v68_v36 }
 0x108   :  { %v77_v41 = vmul.f32 %v66_v38, %v43_v13 }
 0x109   :  { %v70_v42 = vmul.f32 0.5, %v69_v39 }
 0x10a   :  { %v83_v43 = vmul.f32 %v165_v37, %v77_v41 }
 0x10b   :  { %v71_v44 = vsub.f32 1.5, %v70_v42 }
 0x10c   :  { %v89_v45 = vadd.f32 %v166_v40, %v83_v43 }
 0x10d   :  { %v72_v46 = vmul.f32 %v173_v34, %v71_v44 }
 0x10e   :  { %v91_v47 = vpack.c.bf16 %v89_v45, %v89_v45 }
 0x10f   :  { %v76_v48 = vsel %vm75_vm8, %v173_v34, %v72_v46 }
 0x110   :  { %94 = vst.msk [vmem:[#allocation2] sm:$0xf] %vm93_vm6, %v91_v47  ;;  %v78_v49 = vmul.f32 %v76_v48, %v44_v18 }
 0x112   :  { %v84_v50 = vmul.f32 %v165_v37, %v78_v49 }
 0x114   :  { %v90_v51 = vadd.f32 %v166_v40, %v84_v50 }
 0x116   :  { %v92_v52 = vpack.c.bf16 %v90_v51, %v90_v51 }
 0x118   :  { %95 = vst.msk [vmem:[#allocation2 + $0x4] sm:$0xf] %vm93_vm6, %v92_v52 }
 0x11f   :  { %v161_v53 = vld [vmem:[#allocation2] sm:$0xff] }
 0x120   :  { %160 = vmatmul.msk.bf16.vlgmr.msra.gmra.mxu0 %vm27_vm0, %v161_v53 }
 0x19d   :  { %v136_v55 = vpop.f32.mrf.mxu0 }
 0x19e   :  { %v137_v56 = vadd.f32 %v167_v54, %v136_v55 }
 0x1a0   :  { %142 = vst.msk [vmem:[%s242_s5] sm:$0xff] %vm141_vm9, %v137_v56 }
 0x1a5   :  { %v138_v57 = vpop.f32.mrf.mxu0 }
 0x1a6   :  { %v139_v58 = vadd.f32 %v167_v54, %v138_v57 }
 0x1a8   :  { %143 = vst.msk [vmem:[%s242_s5 + $0x8] sm:$0xff] %vm141_vm9, %v139_v58 }

// kernel: basic_transformer.10
= control target key start
LH: loop header
LB: loop body
LE: loop exit
PB: predicated region body
PF: predicated region fallthrough
CT: control target
= control target key end

     0   :  { %s1276_s9 = smov 0   ;;  %s1278_s10 = smov 0   ;;  %s1559_s0 = inlined_call_operand.vmem [shape: f32[2,8,64], index: 0, kind: input, shape index: {}]   ;;  %s1560_s1 = inlined_call_operand.vmem [shape: f32[2,8,128], index: 1, kind: input, shape index: {}]   ;;  %s1561_s2 = inlined_call_operand.vmem [shape: f32[2,8,64], index: 2, kind: output, shape index: {}]  }
   0x1   :  { %s1280_s11 = smov 0  }
   0x2 LB: > { %s31_s12 = sadd.s32 1, %s1237_s10  ;;  %p1104_p0 = scmp.ge.s32.totalorder %s1241_s11, 1  ;;  %s1241_s11 = sphi %s1280_s11, %s12_s11   ;;  %s1237_s10 = sphi %s1278_s10, %s1563_s10   ;;  %s1233_s9 = sphi %s1276_s9, %s1562_s9  }
   0x3   : > { %p33_p1 = scmp.ge.s32.totalorder %s31_s12, 2  ;;  %p151_p2 = scmp.lt.s32.totalorder %s1241_s11, 3 }
   0x5   : > { %s1565_s12 = smov (%p33_p1, %s31_s12), 0  ;;  %p152_p3 = pnand %p1104_p0, %p151_p2 }
   0x6   : > { %p184_p4 = scmp.lt.s32.totalorder (!%p152_p3), %s1233_s9, 1  ;;  %s1243_s20 = smov (!%p152_p3), 96  }
   0x7   : > { %155 = sbr.rel (%p152_p3) target bundleno = 1639 (0x667), region = 28  ;;  %s1245_s21 = smov (!%p152_p3), 64  }
   0x8   : > { %s1246_s22 = smov (!%p152_p3), 56   ;;  %s1247_s23 = smov (!%p152_p3), 120  }
   0x9   : > { %s1248_s24 = smov (!%p152_p3), 104   ;;  %s1251_s25 = smov (!%p152_p3), 112  }
   0xa   : > { %s1252_s26 = smov (!%p152_p3), 80   ;;  %s1253_s27 = smov (!%p152_p3), 48  }
   0xb   : > { %s1254_s28 = smov (!%p152_p3), 88   ;;  %s1255_s29 = smov (!%p152_p3), 72  }
   0xc   : > { %s1567_s9 = smov (!%p184_p4, %s1233_s9), 1  ;;  %vm227_vm0 = vcmask 64512   ;;  %vm210_vm1 = vcmask 7168   ;;  %v1244_v7 = vmov -inf   ;;  %v1249_v13 = vmov 0   ;;  %s1256_s30 = smov 40  }
   0xd   : > { %s1294_s13 = sshll.u32 %s1567_s9, 3  ;;  %211 = vst.msk [vmem:[#allocation2] sm:$0xff] %vm210_vm1, %v1244_v7  ;;  %1168 = vset.pattern.permute.xlu0 %v1249_v13  ;;  %1169 = vset.pattern.permute.xlu1 %v1249_v13  ;;  %v1250_v14 = vmov 0.0   ;;  %vm300_vm2 = vcmask 1043456   ;;  %s1257_s3 = smov 24   ;;  %vm916_vm3 = vcmask 130112  }
   0xe   : > { %s197_s16 = scalar_lea.vmem %s1560_s1, %s1294_s13  ;;  %s190_s19 = scalar_lea.vmem %s1559_s0, %s1294_s13  ;;  %212 = vst.msk [vmem:[#allocation2 + $0x8] sm:$0xff] %vm210_vm1, %v1244_v7  ;;  %1170 = vset.pattern.permute.xlu2 %v1249_v13  ;;  %vm931_vm4 = vcmask 195712   ;;  %vm946_vm5 = vcmask 261312   ;;  %vm961_vm6 = vcmask 326912   ;;  %vm976_vm7 = vcmask 392512  }
   0xf   : > { %v238_v0 = vld [vmem:[%s197_s16] sm:$0xff]  ;;  %213 = vst.msk [vmem:[#allocation2 + $0x10] sm:$0xff] %vm210_vm1, %v1244_v7  ;;  %s1258_s4 = smov 32   ;;  %s1259_s5 = smov 8   ;;  %vm991_vm8 = vcmask 458112   ;;  %vm1006_vm9 = vcmask 523712  }
  0x10   : > { %v239_v1 = vpack.c.bf16 %v238_v0, %v238_v0  ;;  %v236_v3 = vld [vmem:[%s190_s19] sm:$0xff]  ;;  %214 = vst.msk [vmem:[#allocation2 + $0x18] sm:$0xff] %vm210_vm1, %v1244_v7  ;;  %s1260_s6 = smov 16   ;;  %s1497_s9 = scalar_lea.vmem %s1561_s2, %s1294_s13 }
  0x11   : > { %v237_v4 = vpack.c.bf16 %v236_v3, %v236_v3  ;;  %215 = vst.msk [vmem:[#allocation2 + $0x20] sm:$0xff] %vm210_vm1, %v1244_v7 }
  0x12   : > { %v245_v2 = vsel %vm227_vm0, %v239_v1, 0  ;;  %216 = vst.msk [vmem:[#allocation2 + $0x28] sm:$0xff] %vm210_vm1, %v1244_v7  ;;  %v293_v8 = vunpack.c.l.b16 %v239_v1 }
  0x13   : > { %254 = vmatpush.bf16.xpose.msra.mxu0 %v245_v2  ;;  %v321_v5 = vunpack.c.l.b16 %v237_v4  ;;  %217 = vst.msk [vmem:[#allocation2 + $0x30] sm:$0xff] %vm210_vm1, %v1244_v7 }
  0x14   : > { %218 = vst.msk [vmem:[#allocation2 + $0x38] sm:$0xff] %vm210_vm1, %v1244_v7  ;;  %v1318_v9 = vpack.c.b16 %v293_v8, %v293_v8  ;;  %v260_v15 = vld [vmem:[#allocation2] sm:$0xff] }
  0x15   : > { %v1306_v6 = vpack.c.b16 %v321_v5, %v321_v5  ;;  %228 = vst.msk [vmem:[#allocation4] sm:$0xff] %vm227_vm0, %v1250_v14  ;;  %v347_v13 = vld [vmem:[#allocation2 + $0x8] sm:$0xff] }
  0x16   : > { %295 = vrot.lane.b32.xlu2 %v1318_v9, %s1245_s21  ;;  %219 = vst.msk [vmem:[#allocation3] sm:$0xff] %vm210_vm1, %v1250_v14 }
  0x17   : > { %566 = vrot.lane.b32.xlu1 %v1306_v6, %s1243_s20  ;;  %220 = vst.msk [vmem:[#allocation3 + $0x8] sm:$0xff] %vm210_vm1, %v1250_v14  ;;  %v509_v7 = vld [vmem:[#allocation2 + $0x18] sm:$0xff] }
  0x18   : > { %221 = vst.msk [vmem:[#allocation3 + $0x10] sm:$0xff] %vm210_vm1, %v1250_v14 }
  0x19   : > { %222 = vst.msk [vmem:[#allocation3 + $0x18] sm:$0xff] %vm210_vm1, %v1250_v14 }
  0x1a   : > { %1108 = vmatmul.msk.bf16.vlgmr.msra.gmra.mxu0 %vm227_vm0, %v237_v4  ;;  %223 = vst.msk [vmem:[#allocation3 + $0x20] sm:$0xff] %vm210_vm1, %v1250_v14 }
  0x1b   : > { %224 = vst.msk [vmem:[#allocation3 + $0x28] sm:$0xff] %vm210_vm1, %v1250_v14 }
  0x1c   : > { %225 = vst.msk [vmem:[#allocation3 + $0x30] sm:$0xff] %vm210_vm1, %v1250_v14  ;;  %v284_v49 = vld [vmem:[#allocation4] sm:$0xff] }
  0x1d   : > { %226 = vst.msk [vmem:[#allocation3 + $0x38] sm:$0xff] %vm210_vm1, %v1250_v14 }
  0x1e   : > { %323 = vrot.lane.b32.xlu2 %v1306_v6, %s1247_s23  ;;  %229 = vst.msk [vmem:[#allocation4 + $0x8] sm:$0xff] %vm227_vm0, %v1250_v14 }
  0x1f   : > { %380 = vrot.lane.b32.xlu1 %v1318_v9, %s1246_s22  ;;  %230 = vst.msk [vmem:[#allocation4 + $0x10] sm:$0xff] %vm227_vm0, %v1250_v14 }
  0x20   : > { %231 = vst.msk [vmem:[#allocation4 + $0x18] sm:$0xff] %vm227_vm0, %v1250_v14 }
  0x21   : > { %232 = vst.msk [vmem:[#allocation4 + $0x20] sm:$0xff] %vm227_vm0, %v1250_v14 }
  0x22   : > { %233 = vst.msk [vmem:[#allocation4 + $0x28] sm:$0xff] %vm227_vm0, %v1250_v14 }
  0x23   : > { %234 = vst.msk [vmem:[#allocation4 + $0x30] sm:$0xff] %vm227_vm0, %v1250_v14 }
  0x24   : > { %235 = vst.msk [vmem:[#allocation4 + $0x38] sm:$0xff] %vm227_vm0, %v1250_v14 }
  0x26   : > { %325 = vrot.lane.b32.xlu2 %v1318_v9, %s1247_s23 }
  0x2e   : > { %485 = vrot.lane.b32.xlu2 %v1306_v6, %s1248_s24 }
  0x36   : > { %730 = vrot.lane.b32.xlu2 %v1318_v9, %s1252_s26 }
  0x3e   : > { %728 = vrot.lane.b32.xlu2 %v1306_v6, %s1252_s26 }
  0x46   : > { %461 = vrot.lane.b32.xlu2 %v1318_v9, %s1253_s27 }
  0x70   : > { %v296_v21 = vpop.permute.xlu2 %295 }
  0x71   : > { %v302_v25 = vsel %vm300_vm2, %v296_v21, 0 }
  0x72   : > { %311 = vmatpush.bf16.msra.mxu1 %v302_v25 }
  0x78   : > { %v324_v22 = vpop.permute.xlu2 %323 }
  0x80   : > { %v326_v23 = vpop.permute.xlu2 %325 }
  0x81   : > { %v331_v24 = vsel %vm227_vm0, %v326_v23, 0 }
  0x82   : > { %340 = vmatpush.bf16.xpose.msra.mxu2 %v331_v24 }
  0x88   : > { %v486_v35 = vpop.permute.xlu2 %485 }
  0x89   : > { %1110 = vmatmul.msk.bf16.vlgmr.msra.gmra.mxu2 %vm227_vm0, %v324_v22  ;;  %v567_v41 = vpop.permute.xlu1 %566  ;;  %v1411_v22 = vld [vmem:[#allocation2 + $0x28] sm:$0xff] }
  0x90   : > { %v731_v46 = vpop.permute.xlu2 %730 }
  0x91   : > { %v381_v45 = vpop.permute.xlu1 %380  ;;  %v736_v48 = vsel %vm227_vm0, %v731_v46, 0 }
  0x92   : > { %v386_v47 = vsel %vm300_vm2, %v381_v45, 0 }
  0x93   : > { %395 = vmatpush.bf16.msra.mxu3 %v386_v47 }
  0x97   : > { %v1323_v10 = vpop.f32.mrf.mxu0 }
  0x98   : > { %v261_v11 = vsel %vm227_vm0, %v1323_v10, -inf  ;;  %v729_v51 = vpop.permute.xlu2 %728 }
  0x99   : > { %262 = vmax.xlane.f32.xlu0 %v261_v11 }
  0x9f   : > { %v258_v12 = vpop.f32.mrf.mxu0 }
  0xa0   : > { %v462_v55 = vpop.permute.xlu2 %461 }
  0xa1   : > { %v467_v56 = vsel %vm300_vm2, %v462_v55, 0 }
  0xa2   : > { %476 = vmatpush.bf16.msrb.mxu3 %v467_v56 }
 0x10c   : > { %v263_v16 = vpop.xlane.xlu0 %262  ;;  %v1384_v43 = vpop.f32.mrf.mxu2 }
 0x10d   : > { %v264_v17 = vmax.f32 %v260_v15, %v263_v16  ;;  %v348_v62 = vsel %vm227_vm0, %v1384_v43, -inf }
 0x10f   : > { %v265_v18 = vsub.f32 %v260_v15, %v264_v17  ;;  %319 = vst.msk [vmem:[#allocation2] sm:$0xff] %vm210_vm1, %v264_v17  ;;  %270 = vperm.xlu0 %1168, %v264_v17  }
 0x111   : > { %v266_v19 = vmul.f32 1.442695, %v265_v18 }
 0x113   : > { %1171 = vpow2.f32 %v266_v19 }
 0x114   : > { %v344_v44 = vpop.f32.mrf.mxu2 }
 0x117   : > { %406 = vrot.lane.b32.xlu0 %v1318_v9, %s1251_s25 }
 0x119   : > { %v1349_v20 = vpop.eup %1171 }
 0x11a   : > { %287 = vperm.xlu1 %1169, %v1349_v20  }
 0x11f   : > { %487 = vrot.lane.b32.xlu0 %v1318_v9, %s1248_s24 }
 0x127   : > { %404 = vrot.lane.b32.xlu0 %v1306_v6, %s1251_s25 }
 0x12f   : > { %568 = vrot.lane.b32.xlu0 %v1318_v9, %s1243_s20 }
 0x137   : > { %649 = vrot.lane.b32.xlu0 %v1318_v9, %s1254_s28 }
 0x13f   : > { %647 = vrot.lane.b32.xlu0 %v1306_v6, %s1254_s28 }
 0x147   : > { %811 = vrot.lane.b32.xlu0 %v1318_v9, %s1255_s29 }
 0x14f   : > { %809 = vrot.lane.b32.xlu0 %v1306_v6, %s1255_s29 }
 0x157   : > { %542 = vrot.lane.b32.xlu0 %v1318_v9, %s1256_s30 }
 0x181   : > { %v271_v26 = vpop.permute.xlu0 %270 }
 0x182   : > { %v273_v27 = vsub.f32 %v1323_v10, %v271_v26 }
 0x184   : > { %v274_v28 = vmul.f32 1.442695, %v273_v27 }
 0x186   : > { %1173 = vpow2.f32 %v274_v28 }
 0x189   : > { %v407_v29 = vpop.permute.xlu0 %406 }
 0x18a   : > { %v412_v30 = vsel %vm227_vm0, %v407_v29, 0 }
 0x18b   : > { %421 = vmatpush.bf16.xpose.msrb.mxu1 %v412_v30 }
 0x18c   : > { %v1368_v31 = vpop.eup %1173  ;;  %v288_v50 = vpop.permute.xlu1 %287 }
 0x18d   : > { %v291_v32 = vpack.c.bf16 %v1368_v31, %v1368_v31  ;;  %v290_v52 = vmul.f32 %v288_v50, %v284_v49  ;;  %v278_v26 = vsel %vm227_vm0, %v1368_v31, 0.0  ;;  %v276_v50 = vld [vmem:[#allocation3] sm:$0xff] }
 0x18f   : > { %1109 = vmatmul.msk.bf16.vlgmr.msra.gmra.mxu1 %vm227_vm0, %v291_v32 }
 0x191   : > { %v488_v33 = vpop.permute.xlu0 %487 }
 0x192   : > { %v493_v34 = vsel %vm227_vm0, %v488_v33, 0 }
 0x193   : > { %502 = vmatpush.bf16.xpose.msrb.mxu0 %v493_v34 }
 0x199   : > { %v405_v36 = vpop.permute.xlu0 %404 }
 0x19a   : > { %1114 = vmatmul.msk.bf16.vlgmr.msrb.gmra.mxu0 %vm227_vm0, %v486_v35 }
 0x19f   : > { %1112 = vmatmul.msk.bf16.vlgmr.msrb.gmra.mxu1 %vm227_vm0, %v405_v36 }
 0x1a1   : > { %v569_v37 = vpop.permute.xlu0 %568 }
 0x1a2   : > { %v574_v38 = vsel %vm227_vm0, %v569_v37, 0 }
 0x1a3   : > { %583 = vmatpush.bf16.xpose.msra.mxu1 %v574_v38 }
 0x1a9   : > { %v650_v39 = vpop.permute.xlu0 %649 }
 0x1aa   : > { %v655_v40 = vsel %vm227_vm0, %v650_v39, 0 }
 0x1ab   : > { %664 = vmatpush.bf16.xpose.msra.mxu0 %v655_v40  ;;  %745 = vmatpush.bf16.xpose.msrb.mxu1 %v736_v48 }
 0x1af   : > { %1116 = vmatmul.msk.bf16.vlgmr.msra.gmra.mxu1 %vm227_vm0, %v567_v41 }
 0x1b1   : > { %v648_v42 = vpop.permute.xlu0 %647 }
 0x1b2   : > { %1118 = vmatmul.msk.bf16.vlgmr.msra.gmra.mxu0 %vm227_vm0, %v648_v42 }
 0x1b9   : > { %v812_v3 = vpop.permute.xlu0 %811 }
 0x1ba   : > { %v817_v4 = vsel %vm227_vm0, %v812_v3, 0 }
 0x1bb   : > { %826 = vmatpush.bf16.xpose.msrb.mxu0 %v817_v4 }
 0x1bf   : > { %1120 = vmatmul.msk.bf16.vlgmr.msrb.gmra.mxu1 %vm227_vm0, %v729_v51 }
 0x1c1   : > { %v810_v5 = vpop.permute.xlu0 %809 }
 0x1c2   : > { %1122 = vmatmul.msk.bf16.vlgmr.msrb.gmra.mxu0 %vm227_vm0, %v810_v5 }
 0x1c9   : > { %v543_v28 = vpop.permute.xlu0 %542 }
 0x1ca   : > { %v548_v29 = vsel %vm300_vm2, %v543_v28, 0  ;;  %v372_v28 = vld [vmem:[#allocation4 + $0x8] sm:$0xff] }
 0x1cb   : > { %557 = vmatpush.bf16.msrb.mxu2 %v548_v29 }
 0x20c   : > { %v313_v53 = vpop.f32.mrf.mxu1 }
 0x20d   : > { %v317_v54 = vadd.f32 %v313_v53, %v290_v52  ;;  %v277_v52 = vmul.f32 %v1349_v20, %v276_v50 }
 0x20f   : > { %318 = vst.msk [vmem:[#allocation4] sm:$0xff] %vm227_vm0, %v317_v54 }
 0x214   : > { %v315_v57 = vpop.f32.mrf.mxu1 }
 0x217   : > { %v504_v58 = vpop.f32.mrf.mxu0 }
 0x218   : > { %v510_v59 = vsel %vm227_vm0, %v504_v58, -inf }
 0x219   : > { %511 = vmax.xlane.f32.xlu2 %v510_v59 }
 0x21c   : > { %v1392_v60 = vpop.f32.mrf.mxu1 }
 0x21d   : > { %v429_v25 = vsel %vm227_vm0, %v1392_v60, -inf }
 0x21f   : > { %v506_v61 = vpop.f32.mrf.mxu0 }
 0x221   : > { %349 = vmax.xlane.f32.xlu2 %v348_v62 }
 0x224   : > { %v425_v63 = vpop.f32.mrf.mxu1 }
 0x22c   : > { %v1402_v6 = vpop.f32.mrf.mxu1 }
 0x22d   : > { %v591_v27 = vsel %vm227_vm0, %v1402_v6, -inf }
 0x22f   : > { %v1396_v0 = vpop.f32.mrf.mxu0 }
 0x230   : > { %v672_v1 = vsel %vm227_vm0, %v1396_v0, -inf }
 0x231   : > { %673 = vmax.xlane.f32.xlu2 %v672_v1 }
 0x234   : > { %v587_v8 = vpop.f32.mrf.mxu1 }
 0x237   : > { %v668_v2 = vpop.f32.mrf.mxu0 }
 0x238   : > { %v526_v2 = vld [vmem:[#allocation3 + $0x18] sm:$0xff] }
 0x23c   : > { %v1406_v17 = vpop.f32.mrf.mxu1 }
 0x23d   : > { %v753_v1 = vsel %vm227_vm0, %v1406_v17, -inf }
 0x23f   : > { %v1425_v30 = vpop.f32.mrf.mxu0 }
 0x240   : > { %v834_v45 = vsel %vm227_vm0, %v1425_v30, -inf }
 0x244   : > { %v749_v19 = vpop.f32.mrf.mxu1 }
 0x247   : > { %v830_v35 = vpop.f32.mrf.mxu0 }
 0x28c   : > { %v512_v10 = vpop.xlane.xlu2 %511 }
 0x28d   : > { %v513_v11 = vmax.f32 %v509_v7, %v512_v10 }
 0x28f   : > { %v514_v12 = vsub.f32 %v509_v7, %v513_v11  ;;  %565 = vst.msk [vmem:[#allocation2 + $0x18] sm:$0xff] %vm210_vm1, %v513_v11  ;;  %519 = vperm.xlu0 %1168, %v513_v11   ;;  %v364_v7 = vld [vmem:[#allocation3 + $0x8] sm:$0xff] }
 0x291   : > { %v515_v46 = vmul.f32 1.442695, %v514_v12 }
 0x294   : > { %v350_v14 = vpop.xlane.xlu2 %349 }
 0x295   : > { %v351_v15 = vmax.f32 %v347_v13, %v350_v14 }
 0x297   : > { %v352_v16 = vsub.f32 %v347_v13, %v351_v15  ;;  %403 = vst.msk [vmem:[#allocation2 + $0x8] sm:$0xff] %vm210_vm1, %v351_v15  ;;  %357 = vperm.xlu1 %1169, %v351_v15  }
 0x299   : > { %v353_v18 = vmul.f32 1.442695, %v352_v16 }
 0x29b   : > { %1175 = vpow2.f32 %v353_v18  ;;  %v833_v18 = vld [vmem:[#allocation2 + $0x38] sm:$0xff] }
 0x2a1   : > { %v1408_v21 = vpop.eup %1175 }
 0x2a2   : > { %375 = vperm.xlu2 %1170, %v1408_v21   ;;  %v365_v10 = vmul.f32 %v1408_v21, %v364_v7  ;;  %v688_v7 = vld [vmem:[#allocation3 + $0x28] sm:$0xff] }
 0x2a4   : > { %v674_v23 = vpop.xlane.xlu2 %673 }
 0x2a5   : > { %v1414_v24 = vmax.f32 %v1411_v22, %v674_v23 }
 0x2a7   : > { %727 = vst.msk [vmem:[#allocation2 + $0x28] sm:$0xff] %vm210_vm1, %v1414_v24 }
 0x2b9   : > { %430 = vmax.xlane.f32.xlu0 %v429_v25 }
 0x2c1   : > { %279 = vadd.xlane.f32.xlu1 %v278_v26 }
 0x2cb   : > { %592 = vmax.xlane.f32.xlu2 %v591_v27 }
 0x2fc   : > { %v376_v56 = vpop.permute.xlu2 %375 }
 0x301   : > { %v520_v32 = vpop.permute.xlu0 %519 }
 0x302   : > { %v522_v33 = vsub.f32 %v504_v58, %v520_v32  ;;  %v590_v58 = vld [vmem:[#allocation2 + $0x20] sm:$0xff] }
 0x304   : > { %v523_v34 = vmul.f32 1.442695, %v522_v33 }
 0x306   : > { %1177 = vpow2.f32 %v523_v34 }
 0x309   : > { %v358_v36 = vpop.permute.xlu1 %357 }
 0x30a   : > { %v360_v37 = vsub.f32 %v1384_v43, %v358_v36  ;;  %v428_v43 = vld [vmem:[#allocation2 + $0x10] sm:$0xff] }
 0x30c   : > { %v1178_v31 = vpop.eup %1177  ;;  %v361_v38 = vmul.f32 1.442695, %v360_v37 }
 0x30d   : > { %v528_v39 = vsel %vm227_vm0, %v1178_v31, 0.0  ;;  %v541_v40 = vpack.c.bf16 %v1178_v31, %v1178_v31 }
 0x30e   : > { %1179 = vpow2.f32 %v361_v38  ;;  %529 = vadd.xlane.f32.xlu1 %v528_v39  ;;  %v534_v38 = vld [vmem:[#allocation4 + $0x18] sm:$0xff] }
 0x30f   : > { %1115 = vmatmul.msk.bf16.vlgmr.msrb.gmra.mxu2 %vm227_vm0, %v541_v40  ;;  %1181 = vpow2.f32 %v515_v46 }
 0x314   : > { %v1180_v41 = vpop.eup %1179 }
 0x315   : > { %v366_v42 = vsel %vm227_vm0, %v1180_v41, 0.0  ;;  %v379_v44 = vpack.c.bf16 %v1180_v41, %v1180_v41  ;;  %v1182_v55 = vpop.eup %1181 }
 0x316   : > { %367 = vadd.xlane.f32.xlu1 %v366_v42  ;;  %v527_v3 = vmul.f32 %v1182_v55, %v526_v2 }
 0x317   : > { %1111 = vmatmul.msk.bf16.vlgmr.msra.gmra.mxu3 %vm227_vm0, %v379_v44 }
 0x31e   : > { %835 = vmax.xlane.f32.xlu1 %v834_v45 }
 0x32c   : > { %v431_v47 = vpop.xlane.xlu0 %430 }
 0x32d   : > { %v432_v48 = vmax.f32 %v428_v43, %v431_v47 }
 0x32f   : > { %v433_v49 = vsub.f32 %v428_v43, %v432_v48  ;;  %484 = vst.msk [vmem:[#allocation2 + $0x10] sm:$0xff] %vm210_vm1, %v432_v48  ;;  %438 = vperm.xlu2 %1170, %v432_v48  }
 0x331   : > { %v434_v51 = vmul.f32 1.442695, %v433_v49 }
 0x333   : > { %1183 = vpow2.f32 %v434_v51 }
 0x334   : > { %v280_v53 = vpop.xlane.xlu1 %279 }
 0x335   : > { %v281_v54 = vadd.f32 %v280_v53, %v277_v52  ;;  %v1471_v52 = vld [vmem:[#allocation2 + $0x30] sm:$0xff] }
 0x337   : > { %283 = vst.msk [vmem:[#allocation3] sm:$0xff] %vm210_vm1, %v281_v54  ;;  %537 = vperm.xlu1 %1169, %v1182_v55  }
 0x339   : > { %v1437_v57 = vpop.eup %1183 }
 0x33a   : > { %456 = vperm.xlu2 %1170, %v1437_v57  }
 0x33e   : > { %v593_v59 = vpop.xlane.xlu2 %592  ;;  %v893_v8 = vld [vmem:[#allocation3] sm:$0xff] }
 0x33f   : > { %v594_v61 = vmax.f32 %v590_v58, %v593_v59  ;;  %704 = vrot.lane.b32.xlu1 %v1318_v9, %s1257_s3  ;;  %v676_v59 = vsub.f32 %v1411_v22, %v1414_v24 }
 0x341   : > { %v595_v62 = vsub.f32 %v590_v58, %v594_v61  ;;  %646 = vst.msk [vmem:[#allocation2 + $0x20] sm:$0xff] %vm210_vm1, %v594_v61  ;;  %600 = vperm.xlu0 %1168, %v594_v61   ;;  %v677_v61 = vmul.f32 1.442695, %v676_v59 }
 0x342   : > { %681 = vperm.xlu2 %1170, %v1414_v24  }
 0x343   : > { %v596_v20 = vmul.f32 1.442695, %v595_v62 }
 0x345   : > { %1185 = vpow2.f32 %v596_v20 }
 0x346   : > { %1187 = vrcp.f32 %v893_v8 }
 0x34b   : > { %v1444_v63 = vpop.eup %1185 }
 0x34c   : > { %618 = vperm.xlu2 %1170, %v1444_v63   ;;  %v1188_v16 = vpop.eup %1187 }
 0x36b   : > { %754 = vmax.xlane.f32.xlu0 %v753_v1 }
 0x37f   : > { %623 = vrot.lane.b32.xlu0 %v1318_v9, %s1258_s4 }
 0x381   : > { %v530_v4 = vpop.xlane.xlu1 %529 }
 0x382   : > { %v531_v5 = vadd.f32 %v530_v4, %v527_v3 }
 0x384   : > { %532 = vst.msk [vmem:[#allocation3 + $0x18] sm:$0xff] %vm210_vm1, %v531_v5  ;;  %v453_v5 = vld [vmem:[#allocation4 + $0x10] sm:$0xff] }
 0x387   : > { %866 = vrot.lane.b32.xlu0 %v1318_v9, %s1259_s5 }
 0x389   : > { %v368_v11 = vpop.xlane.xlu1 %367  ;;  %v439_v12 = vpop.permute.xlu2 %438 }
 0x38a   : > { %v369_v13 = vadd.f32 %v368_v11, %v365_v10  ;;  %v441_v14 = vsub.f32 %v1392_v60, %v439_v12  ;;  %v378_v60 = vmul.f32 %v376_v56, %v372_v28 }
 0x38b   : > { %v933_v49 = vld [vmem:[#allocation3 + $0x18] sm:$0xff] }
 0x38c   : > { %370 = vst.msk [vmem:[#allocation3 + $0x8] sm:$0xff] %vm210_vm1, %v369_v13  ;;  %v442_v15 = vmul.f32 1.442695, %v441_v14 }
 0x38e   : > { %1189 = vpow2.f32 %v442_v15  ;;  %v445_v15 = vld [vmem:[#allocation3 + $0x10] sm:$0xff] }
 0x38f   : > { %898 = vperm.xlu0 %1168, %v1188_v16  }
 0x391   : > { %v836_v19 = vpop.xlane.xlu1 %835 }
 0x392   : > { %v559_v23 = vpop.f32.mrf.mxu2  ;;  %v837_v25 = vmax.f32 %v833_v18, %v836_v19 }
 0x394   : > { %v1190_v26 = vpop.eup %1189  ;;  %v1457_v27 = vpop.permute.xlu2 %456  ;;  %889 = vst.msk [vmem:[#allocation2 + $0x38] sm:$0xff] %vm210_vm1, %v837_v25  ;;  %v838_v46 = vsub.f32 %v833_v18, %v837_v25  ;;  %v446_v18 = vmul.f32 %v1437_v57, %v445_v15 }
 0x395   : > { %v460_v21 = vpack.c.bf16 %v1190_v26, %v1190_v26  ;;  %v447_v44 = vsel %vm227_vm0, %v1190_v26, 0.0  ;;  %v459_v8 = vmul.f32 %v1457_v27, %v453_v5 }
 0x396   : > { %v839_v47 = vmul.f32 1.442695, %v838_v46  ;;  %v615_v46 = vld [vmem:[#allocation4 + $0x20] sm:$0xff] }
 0x397   : > { %1113 = vmatmul.msk.bf16.vlgmr.msrb.gmra.mxu3 %vm227_vm0, %v460_v21 }
 0x39a   : > { %v397_v29 = vpop.f32.mrf.mxu3  ;;  %v561_v32 = vpop.f32.mrf.mxu2 }
 0x39b   : > { %v401_v33 = vadd.f32 %v397_v29, %v378_v60 }
 0x39c   : > { %v682_v34 = vpop.permute.xlu2 %681 }
 0x39d   : > { %402 = vst.msk [vmem:[#allocation4 + $0x8] sm:$0xff] %vm227_vm0, %v401_v33  ;;  %v684_v35 = vsub.f32 %v1396_v0, %v682_v34 }
 0x39f   : > { %v685_v36 = vmul.f32 1.442695, %v684_v35 }
 0x3a1   : > { %1191 = vpow2.f32 %v685_v36 }
 0x3a2   : > { %v399_v37 = vpop.f32.mrf.mxu3  ;;  %1193 = vpow2.f32 %v839_v47 }
 0x3a3   : > { %1195 = vrcp.f32 %v933_v49 }
 0x3a6   : > { %v619_v26 = vpop.permute.xlu2 %618 }
 0x3a7   : > { %v1192_v31 = vpop.eup %1191  ;;  %v621_v49 = vmul.f32 %v619_v26, %v615_v46 }
 0x3a8   : > { %v690_v39 = vsel %vm227_vm0, %v1192_v31, 0.0  ;;  %v703_v0 = vpack.c.bf16 %v1192_v31, %v1192_v31  ;;  %v1468_v48 = vpop.eup %1193 }
 0x3a9   : > { %691 = vadd.xlane.f32.xlu1 %v690_v39  ;;  %v538_v40 = vpop.permute.xlu1 %537  ;;  %v1196_v50 = vpop.eup %1195 }
 0x3aa   : > { %v540_v41 = vmul.f32 %v538_v40, %v534_v38 }
 0x3ac   : > { %v563_v42 = vadd.f32 %v559_v23, %v540_v41 }
 0x3ae   : > { %564 = vst.msk [vmem:[#allocation4 + $0x18] sm:$0xff] %vm227_vm0, %v563_v42 }
 0x3b1   : > { %448 = vadd.xlane.f32.xlu1 %v447_v44  ;;  %v705_v45 = vpop.permute.xlu1 %704 }
 0x3b2   : > { %v710_v43 = vsel %vm300_vm2, %v705_v45, 0 }
 0x3b3   : > { %719 = vmatpush.bf16.msra.mxu2 %v710_v43  ;;  %v601_v51 = vpop.permute.xlu0 %600  ;;  %v903_v43 = vld [vmem:[#allocation3 + $0x8] sm:$0xff] }
 0x3b4   : > { %v603_v56 = vsub.f32 %v1402_v6, %v601_v51 }
 0x3b6   : > { %1119 = vmatmul.msk.bf16.vlgmr.msra.gmra.mxu2 %vm227_vm0, %v703_v0  ;;  %v604_v58 = vmul.f32 1.442695, %v603_v56  ;;  %v850_v56 = vld [vmem:[#allocation3 + $0x38] sm:$0xff] }
 0x3b8   : > { %1197 = vpow2.f32 %v604_v58  ;;  %v607_v58 = vld [vmem:[#allocation3 + $0x20] sm:$0xff] }
 0x3b9   : > { %1199 = vpow2.f32 %v677_v61  ;;  %v608_v59 = vmul.f32 %v1444_v63, %v607_v58 }
 0x3be   : > { %v1484_v62 = vpop.eup %1197 }
 0x3bf   : > { %v622_v6 = vpack.c.bf16 %v1484_v62, %v1484_v62  ;;  %v1200_v22 = vpop.eup %1199  ;;  %v609_v44 = vsel %vm227_vm0, %v1484_v62, 0.0 }
 0x3c0   : > { %v689_v12 = vmul.f32 %v1200_v22, %v688_v7  ;;  %v905_v7 = vld [vmem:[#allocation4 + $0x8] sm:$0xff] }
 0x3ca   : > { %861 = vperm.xlu1 %1169, %v1468_v48  }
 0x3d2   : > { %938 = vperm.xlu1 %1169, %v1196_v50  }
 0x3de   : > { %v755_v53 = vpop.xlane.xlu0 %754 }
 0x3df   : > { %v1474_v54 = vmax.f32 %v1471_v52, %v755_v53 }
 0x3e1   : > { %v757_v55 = vsub.f32 %v1471_v52, %v1474_v54  ;;  %808 = vst.msk [vmem:[#allocation2 + $0x30] sm:$0xff] %vm210_vm1, %v1474_v54  ;;  %762 = vperm.xlu2 %1170, %v1474_v54   ;;  %v851_v52 = vmul.f32 %v1468_v48, %v850_v56 }
 0x3e3   : > { %v758_v45 = vmul.f32 1.442695, %v757_v55 }
 0x3e9   : > { %843 = vperm.xlu2 %1170, %v837_v25  }
 0x3f1   : > { %v624_v20 = vpop.permute.xlu0 %623  ;;  %785 = vrot.lane.b32.xlu2 %v1318_v9, %s1260_s6  ;;  %v895_v9 = vld [vmem:[#allocation4] sm:$0xff] }
 0x3f2   : > { %v629_v1 = vsel %vm300_vm2, %v624_v20, 0  ;;  %v858_v20 = vld [vmem:[#allocation4 + $0x38] sm:$0xff] }
 0x3f3   : > { %638 = vmatpush.bf16.msra.mxu3 %v629_v1 }
 0x3f6   : > { %1117 = vmatmul.msk.bf16.vlgmr.msra.gmra.mxu3 %vm227_vm0, %v622_v6  ;;  %v777_v6 = vld [vmem:[#allocation4 + $0x30] sm:$0xff] }
 0x3f9   : > { %v867_v24 = vpop.permute.xlu0 %866  ;;  %699 = vperm.xlu2 %1170, %v1200_v22  }
 0x3fa   : > { %v872_v2 = vsel %vm300_vm2, %v867_v24, 0 }
 0x3fb   : > { %881 = vmatpush.bf16.msrb.mxu2 %v872_v2 }
 0x401   : > { %v899_v3 = vpop.permute.xlu0 %898 }
 0x402   : > { %v901_v4 = vmul.f32 %v899_v3, %v895_v9 }
 0x404   : > { %902 = vst.msk [vmem:[%s1497_s9] sm:$0xff] %vm227_vm0, %v901_v4 }
 0x41a   : > { %v478_v10 = vpop.f32.mrf.mxu3 }
 0x41b   : > { %v482_v11 = vadd.f32 %v478_v10, %v459_v8 }
 0x41c   : > { %v692_v13 = vpop.xlane.xlu1 %691 }
 0x41d   : > { %483 = vst.msk [vmem:[#allocation4 + $0x10] sm:$0xff] %vm227_vm0, %v482_v11  ;;  %v693_v14 = vadd.f32 %v692_v13, %v689_v12 }
 0x41f   : > { %694 = vst.msk [vmem:[#allocation3 + $0x28] sm:$0xff] %vm210_vm1, %v693_v14  ;;  %v935_v14 = vld [vmem:[#allocation4 + $0x18] sm:$0xff] }
 0x422   : > { %v480_v16 = vpop.f32.mrf.mxu3 }
 0x424   : > { %v449_v19 = vpop.xlane.xlu1 %448 }
 0x425   : > { %v450_v23 = vadd.f32 %v449_v19, %v446_v18 }
 0x426   : > { %v963_v18 = vld [vmem:[#allocation3 + $0x28] sm:$0xff] }
 0x427   : > { %451 = vst.msk [vmem:[#allocation3 + $0x10] sm:$0xff] %vm210_vm1, %v450_v23 }
 0x42e   : > { %v918_v25 = vld [vmem:[#allocation3 + $0x10] sm:$0xff] }
 0x42f   : > { %1201 = vrcp.f32 %v918_v25  ;;  %v920_v25 = vld [vmem:[#allocation4 + $0x10] sm:$0xff] }
 0x435   : > { %v1202_v27 = vpop.eup %1201 }
 0x436   : > { %923 = vperm.xlu1 %1169, %v1202_v27  }
 0x439   : > { %v721_v21 = vpop.f32.mrf.mxu2 }
 0x43b   : > { %v763_v28 = vpop.permute.xlu2 %762 }
 0x43c   : > { %v765_v60 = vsub.f32 %v1406_v17, %v763_v28  ;;  %v862_v1 = vpop.permute.xlu1 %861 }
 0x43d   : > { %v864_v22 = vmul.f32 %v862_v1, %v858_v20 }
 0x43e   : > { %v766_v29 = vmul.f32 1.442695, %v765_v60 }
 0x440   : > { %1203 = vpow2.f32 %v766_v29  ;;  %v769_v29 = vld [vmem:[#allocation3 + $0x30] sm:$0xff] }
 0x441   : > { %v723_v32 = vpop.f32.mrf.mxu2 }
 0x443   : > { %v844_v33 = vpop.permute.xlu2 %843 }
 0x444   : > { %v846_v34 = vsub.f32 %v1425_v30, %v844_v33  ;;  %v696_v30 = vld [vmem:[#allocation4 + $0x28] sm:$0xff]  ;;  %v939_v13 = vpop.permute.xlu1 %938 }
 0x445   : > { %v941_v15 = vmul.f32 %v939_v13, %v935_v14 }
 0x446   : > { %v847_v57 = vmul.f32 1.442695, %v846_v34  ;;  %v1508_v35 = vpop.eup %1203 }
 0x447   : > { %v784_v38 = vpack.c.bf16 %v1508_v35, %v1508_v35  ;;  %v771_v16 = vsel %vm227_vm0, %v1508_v35, 0.0 }
 0x448   : > { %1205 = vpow2.f32 %v847_v57 }
 0x449   : > { %1207 = vpow2.f32 %v758_v45 }
 0x44a   : > { %1209 = vrcp.f32 %v903_v43 }
 0x44b   : > { %v786_v36 = vpop.permute.xlu2 %785 }
 0x44c   : > { %v791_v37 = vsel %vm300_vm2, %v786_v36, 0 }
 0x44d   : > { %800 = vmatpush.bf16.msrb.mxu3 %v791_v37 }
 0x44e   : > { %v1206_v31 = vpop.eup %1205 }
 0x44f   : > { %v865_v39 = vpack.c.bf16 %v1206_v31, %v1206_v31  ;;  %v852_v17 = vsel %vm227_vm0, %v1206_v31, 0.0  ;;  %v1522_v0 = vpop.eup %1207 }
 0x450   : > { %853 = vadd.xlane.f32.xlu2 %v852_v17  ;;  %1121 = vmatmul.msk.bf16.vlgmr.msrb.gmra.mxu3 %vm227_vm0, %v784_v38  ;;  %v1210_v47 = vpop.eup %1209  ;;  %v770_v32 = vmul.f32 %v1522_v0, %v769_v29 }
 0x451   : > { %1123 = vmatmul.msk.bf16.vlgmr.msrb.gmra.mxu2 %vm227_vm0, %v865_v39 }
 0x453   : > { %v700_v40 = vpop.permute.xlu2 %699 }
 0x454   : > { %v702_v41 = vmul.f32 %v700_v40, %v696_v30 }
 0x456   : > { %v725_v42 = vadd.f32 %v721_v21, %v702_v41 }
 0x458   : > { %726 = vst.msk [vmem:[#allocation4 + $0x28] sm:$0xff] %vm227_vm0, %v725_v42  ;;  %610 = vadd.xlane.f32.xlu2 %v609_v44 }
 0x45f   : > { %v965_v36 = vld [vmem:[#allocation4 + $0x28] sm:$0xff] }
 0x470   : > { %780 = vperm.xlu2 %1170, %v1522_v0  }
 0x478   : > { %908 = vperm.xlu2 %1170, %v1210_v47  }
 0x479   : > { %v640_v50 = vpop.f32.mrf.mxu3 }
 0x47a   : > { %v644_v51 = vadd.f32 %v640_v50, %v621_v49 }
 0x47c   : > { %645 = vst.msk [vmem:[#allocation4 + $0x20] sm:$0xff] %vm227_vm0, %v644_v51 }
 0x481   : > { %v642_v53 = vpop.f32.mrf.mxu3 }
 0x483   : > { %v950_v39 = vld [vmem:[#allocation4 + $0x20] sm:$0xff] }
 0x4a8   : > { %v924_v23 = vpop.permute.xlu1 %923 }
 0x4a9   : > { %v926_v26 = vmul.f32 %v924_v23, %v920_v25 }
 0x4c3   : > { %v854_v54 = vpop.xlane.xlu2 %853 }
 0x4c4   : > { %v855_v55 = vadd.f32 %v854_v54, %v851_v52 }
 0x4c6   : > { %856 = vst.msk [vmem:[#allocation3 + $0x38] sm:$0xff] %vm210_vm1, %v855_v55 }
 0x4cb   : > { %v611_v61 = vpop.xlane.xlu2 %610 }
 0x4cc   : > { %v612_v62 = vadd.f32 %v611_v61, %v608_v59 }
 0x4cd   : > { %v993_v27 = vld [vmem:[#allocation3 + $0x38] sm:$0xff] }
 0x4ce   : > { %613 = vst.msk [vmem:[#allocation3 + $0x20] sm:$0xff] %vm210_vm1, %v612_v62 }
 0x4d3   : > { %v802_v24 = vpop.f32.mrf.mxu3  ;;  %v781_v2 = vpop.permute.xlu2 %780 }
 0x4d4   : > { %v783_v9 = vmul.f32 %v781_v2, %v777_v6  ;;  %v883_v3 = vpop.f32.mrf.mxu2 }
 0x4d5   : > { %v887_v48 = vadd.f32 %v883_v3, %v864_v22  ;;  %v948_v4 = vld [vmem:[#allocation3 + $0x20] sm:$0xff] }
 0x4d6   : > { %v806_v5 = vadd.f32 %v802_v24, %v783_v9  ;;  %1211 = vrcp.f32 %v948_v4 }
 0x4d7   : > { %888 = vst.msk [vmem:[#allocation4 + $0x38] sm:$0xff] %vm227_vm0, %v887_v48  ;;  %1213 = vrcp.f32 %v963_v18 }
 0x4d8   : > { %807 = vst.msk [vmem:[#allocation4 + $0x30] sm:$0xff] %vm227_vm0, %v806_v5  ;;  %1215 = vrcp.f32 %v993_v27 }
 0x4db   : > { %v804_v63 = vpop.f32.mrf.mxu3  ;;  %v909_v8 = vpop.permute.xlu2 %908 }
 0x4dc   : > { %v1212_v10 = vpop.eup %1211  ;;  %v911_v11 = vmul.f32 %v909_v8, %v905_v7  ;;  %v885_v12 = vpop.f32.mrf.mxu2 }
 0x4dd   : > { %953 = vperm.xlu2 %1170, %v1212_v10   ;;  %v1214_v19 = vpop.eup %1213 }
 0x4de   : > { %913 = vrot.lane.b32.xlu0 %v911_v11, %s1259_s5  ;;  %v1216_v21 = vpop.eup %1215  ;;  %v995_v40 = vld [vmem:[#allocation4 + $0x38] sm:$0xff] }
 0x4df   : > { %v980_v44 = vld [vmem:[#allocation4 + $0x30] sm:$0xff] }
 0x4e6   : > { %943 = vrot.lane.b32.xlu0 %v941_v15, %s1257_s3 }
 0x510   : > { %772 = vadd.xlane.f32.xlu0 %v771_v16 }
 0x524   : > { %968 = vperm.xlu0 %1168, %v1214_v19  }
 0x52c   : > { %928 = vrot.lane.b32.xlu0 %v926_v26, %s1260_s6 }
 0x534   : > { %998 = vperm.xlu0 %1168, %v1216_v21  }
 0x537   : > { %v954_v38 = vpop.permute.xlu2 %953 }
 0x538   : > { %v956_v17 = vmul.f32 %v954_v38, %v950_v39 }
 0x550   : > { %v914_v28 = vpop.permute.xlu0 %913 }
 0x551   : > { %917 = vst.msk [vmem:[%s1497_s9] sm:$0xff] %vm916_vm3, %v914_v28 }
 0x558   : > { %v944_v60 = vpop.permute.xlu0 %943 }
 0x583   : > { %v773_v33 = vpop.xlane.xlu0 %772 }
 0x584   : > { %v774_v34 = vadd.f32 %v773_v33, %v770_v32 }
 0x586   : > { %775 = vst.msk [vmem:[#allocation3 + $0x30] sm:$0xff] %vm210_vm1, %v774_v34 }
 0x58d   : > { %v978_v57 = vld [vmem:[#allocation3 + $0x30] sm:$0xff] }
 0x58e   : > { %1217 = vrcp.f32 %v978_v57 }
 0x594   : > { %v1218_v35 = vpop.eup %1217 }
 0x595   : > { %983 = vperm.xlu1 %1169, %v1218_v35  }
 0x596   : > { %v969_v37 = vpop.permute.xlu0 %968 }
 0x597   : > { %v971_v31 = vmul.f32 %v969_v37, %v965_v36 }
 0x599   : > { %973 = vrot.lane.b32.xlu2 %v971_v31, %s1256_s30 }
 0x59d   : > { %958 = vrot.lane.b32.xlu1 %v956_v17, %s1258_s4 }
 0x59e   : > { %v929_v30 = vpop.permute.xlu0 %928 }
 0x59f   : > { %932 = vst.msk [vmem:[%s1497_s9] sm:$0xff] %vm931_vm4, %v929_v30 }
 0x5a0   : > { %947 = vst.msk [vmem:[%s1497_s9] sm:$0xff] %vm946_vm5, %v944_v60 }
 0x5a6   : > { %v999_v41 = vpop.permute.xlu0 %998 }
 0x5a7   : > { %v1001_v42 = vmul.f32 %v999_v41, %v995_v40 }
 0x5a9   : > { %1003 = vrot.lane.b32.xlu1 %v1001_v42, %s1246_s22 }
 0x5f3   : > { %v974_v46 = vpop.permute.xlu2 %973 }
 0x607   : > { %v984_v45 = vpop.permute.xlu1 %983 }
 0x608   : > { %v986_v43 = vmul.f32 %v984_v45, %v980_v44 }
 0x60a   : > { %988 = vrot.lane.b32.xlu2 %v986_v43, %s1253_s27 }
 0x60f   : > { %v959_v0 = vpop.permute.xlu1 %958 }
 0x610   : > { %962 = vst.msk [vmem:[%s1497_s9] sm:$0xff] %vm961_vm6, %v959_v0 }
 0x611   : > { %977 = vst.msk [vmem:[%s1497_s9] sm:$0xff] %vm976_vm7, %v974_v46 }
 0x61b   : > { %v1004_v49 = vpop.permute.xlu1 %1003 }
 0x664   : > { %v989_v47 = vpop.permute.xlu2 %988 }
 0x665   : > { %992 = vst.msk [vmem:[%s1497_s9] sm:$0xff] %vm991_vm8, %v989_v47 }
 0x666   : > { %1007 = vst.msk [vmem:[%s1497_s9] sm:$0xff] %vm1006_vm9, %v1004_v49 }
 0x667 PF: > { %s12_s11 = sadd.s32 1, %s1241_s11   ;;  %s1562_s9 = smov %s1237_s10 }
 0x668   : > { %p9_p5 = scmp.ge.s32.totalorder %s12_s11, 4   ;;  %s1563_s10 = smov %s1565_s12 }
 0x66a   :  { %11 = sbr.rel (!%p9_p5) target bundleno = 2 (0x2), region = 90 }

// kernel: basic_transformer.16
= control target key start
LH: loop header
LB: loop body
LE: loop exit
PB: predicated region body
PF: predicated region fallthrough
CT: control target
= control target key end

     0   :  { %vm27_vm0 = vcmask 261120   ;;  %v173_v4 = vmov 32.0   ;;  %vm93_vm6 = vcmask 257024   ;;  %s236_s0 = inlined_call_operand.vmem [shape: f32[16,32], index: 0, kind: input, shape index: {}]   ;;  %s237_s3 = inlined_call_operand.vmem [shape: f32[1,32], index: 3, kind: input, shape index: {}]   ;;  %s238_s4 = inlined_call_operand.vmem [shape: f32[1,32], index: 4, kind: input, shape index: {}]   ;;  %s239_s2 = inlined_call_operand.vmem [shape: f32[1,128], index: 2, kind: input, shape index: {}]   ;;  %s240_s1 = inlined_call_operand.vmem [shape: bf16[32,128], index: 1, kind: input, shape index: {}]   ;;  %s241_s5 = inlined_call_operand.vmem [shape: f32[16,128], index: 5, kind: output, shape index: {}]  }
   0x1   :  { %v25_v0 = vld [vmem:[%s236_s0] sm:$0xff]  ;;  %v26_v2 = vld [vmem:[%s236_s0 + $0x8] sm:$0xff]  ;;  %167 = vrcp.f32 %v173_v4 }
   0x2   :  { %v28_v1 = vsel %vm27_vm0, %v25_v0, 0.0  ;;  %v31_v3 = vsel %vm27_vm0, %v26_v2, 0.0  ;;  %v162_v24 = vld [vmem:[%s240_s1 + $0x8] sm:$0xff]  ;;  %v161_v27 = vld [vmem:[%s240_s1] sm:$0xff] }
   0x3   :  { %29 = vadd.xlane.f32.xlu0 %v28_v1  ;;  %133 = vmatpush.bf16.msra.mxu0 %v162_v24  ;;  %v164_v37 = vld [vmem:[%s237_s3] ss:$0 sm:$0xff] }
   0x4   :  { %v165_v40 = vld [vmem:[%s238_s4] ss:$0 sm:$0xff] }
   0x5   :  { %v166_v54 = vld [vmem:[%s239_s2] ss:$0 sm:$0xff] }
   0x7   :  { %v168_v5 = vpop.eup %167  ;;  %134 = vmatpush.bf16.msra.mxu0 %v161_v27 }
   0x8   :  { %v35_v6 = vmul.f32 32.0, %v168_v5  ;;  %vm39_vm1 = vweird.f32 %v168_v5 }
   0xa   :  { %v36_v7 = vsub.f32 1.0, %v35_v6 }
   0xb   :  { %32 = vadd.xlane.f32.xlu0 %v31_v3 }
   0xc   :  { %v37_v8 = vmul.f32 %v168_v5, %v36_v7 }
   0xe   :  { %v38_v9 = vadd.f32 %v168_v5, %v37_v8 }
  0x10   :  { %v40_v10 = vsel %vm39_vm1, %v168_v5, %v38_v9 }
  0x76   :  { %v30_v11 = vpop.xlane.xlu0 %29 }
  0x77   :  { %v41_v12 = vmul.f32 %v40_v10, %v30_v11 }
  0x79   :  { %v43_v13 = vsub.f32 %v25_v0, %v41_v12 }
  0x7b   :  { %v45_v14 = vmul.f32 %v43_v13, %v43_v13 }
  0x7d   :  { %v47_v15 = vsel %vm27_vm0, %v45_v14, 0.0 }
  0x7e   :  { %48 = vadd.xlane.f32.xlu1 %v47_v15  ;;  %v33_v16 = vpop.xlane.xlu0 %32 }
  0x7f   :  { %v42_v17 = vmul.f32 %v40_v10, %v33_v16 }
  0x81   :  { %v44_v18 = vsub.f32 %v26_v2, %v42_v17 }
  0x83   :  { %v46_v19 = vmul.f32 %v44_v18, %v44_v18 }
  0x85   :  { %v50_v20 = vsel %vm27_vm0, %v46_v19, 0.0 }
  0x86   :  { %51 = vadd.xlane.f32.xlu1 %v50_v20 }
  0xf1   :  { %v49_v21 = vpop.xlane.xlu1 %48 }
  0xf2   :  { %v53_v22 = vmul.f32 %v49_v21, %v40_v10 }
  0xf4   :  { %v55_v23 = vadd.f32 1e-05, %v53_v22 }
  0xf6   :  { %169 = vrsqrt.f32 %v55_v23  ;;  %vm63_vm3 = vweird.f32 %v55_v23 }
  0xf9   :  { %v52_v25 = vpop.xlane.xlu1 %51 }
  0xfa   :  { %v54_v26 = vmul.f32 %v52_v25, %v40_v10 }
  0xfc   :  { %v170_v28 = vpop.eup %169  ;;  %v56_v29 = vadd.f32 1e-05, %v54_v26 }
  0xfd   :  { %v58_v30 = vmul.f32 %v170_v28, %v55_v23  ;;  %vm64_vm2 = vweird.f32 %v170_v28 }
  0xfe   :  { %171 = vrsqrt.f32 %v56_v29  ;;  %vm65_vm4 = vmor %vm63_vm3, %vm64_vm2  ;;  %vm73_vm7 = vweird.f32 %v56_v29 }
  0xff   :  { %v59_v31 = vmul.f32 %v170_v28, %v58_v30 }
 0x101   :  { %v60_v32 = vmul.f32 0.5, %v59_v31 }
 0x103   :  { %v61_v33 = vsub.f32 1.5, %v60_v32 }
 0x104   :  { %v172_v34 = vpop.eup %171 }
 0x105   :  { %v62_v35 = vmul.f32 %v170_v28, %v61_v33  ;;  %v68_v36 = vmul.f32 %v172_v34, %v56_v29  ;;  %vm74_vm5 = vweird.f32 %v172_v34 }
 0x106   :  { %vm75_vm8 = vmor %vm73_vm7, %vm74_vm5 }
 0x107   :  { %v66_v38 = vsel %vm65_vm4, %v170_v28, %v62_v35  ;;  %v69_v39 = vmul.f32 %v172_v34, %v68_v36 }
 0x108   :  { %v77_v41 = vmul.f32 %v66_v38, %v43_v13 }
 0x109   :  { %v70_v42 = vmul.f32 0.5, %v69_v39 }
 0x10a   :  { %v83_v43 = vmul.f32 %v164_v37, %v77_v41 }
 0x10b   :  { %v71_v44 = vsub.f32 1.5, %v70_v42 }
 0x10c   :  { %v89_v45 = vadd.f32 %v165_v40, %v83_v43 }
 0x10d   :  { %v72_v46 = vmul.f32 %v172_v34, %v71_v44 }
 0x10e   :  { %v91_v47 = vpack.c.bf16 %v89_v45, %v89_v45 }
 0x10f   :  { %v76_v48 = vsel %vm75_vm8, %v172_v34, %v72_v46 }
 0x110   :  { %94 = vst.msk [vmem:[#allocation2] sm:$0xf] %vm93_vm6, %v91_v47  ;;  %v78_v49 = vmul.f32 %v76_v48, %v44_v18 }
 0x112   :  { %v84_v50 = vmul.f32 %v164_v37, %v78_v49 }
 0x114   :  { %v90_v51 = vadd.f32 %v165_v40, %v84_v50 }
 0x116   :  { %v92_v52 = vpack.c.bf16 %v90_v51, %v90_v51 }
 0x118   :  { %95 = vst.msk [vmem:[#allocation2 + $0x4] sm:$0xf] %vm93_vm6, %v92_v52 }
 0x11f   :  { %v160_v53 = vld [vmem:[#allocation2] sm:$0xff] }
 0x120   :  { %159 = vmatmul.msk.bf16.vlgmr.msra.gmra.mxu0 %vm27_vm0, %v160_v53 }
 0x19d   :  { %v136_v55 = vpop.f32.mrf.mxu0 }
 0x19e   :  { %v137_v56 = vadd.f32 %v166_v54, %v136_v55 }
 0x1a0   :  { %141 = vst [vmem:[%s241_s5] sm:$0xff] %v137_v56 }
 0x1a5   :  { %v138_v57 = vpop.f32.mrf.mxu0 }
 0x1a6   :  { %v139_v58 = vadd.f32 %v166_v54, %v138_v57 }
 0x1a8   :  { %142 = vst [vmem:[%s241_s5 + $0x8] sm:$0xff] %v139_v58 }

// kernel: basic_transformer.17
= control target key start
LH: loop header
LB: loop body
LE: loop exit
PB: predicated region body
PF: predicated region fallthrough
CT: control target
= control target key end

     0   :  { %vm106_vm0 = vcmask 261120   ;;  %s224_s1 = inlined_call_operand.vmem [shape: bf16[128,32], index: 1, kind: input, shape index: {}]   ;;  %s225_s2 = inlined_call_operand.vmem [shape: f32[1,32], index: 2, kind: input, shape index: {}]   ;;  %s226_s0 = inlined_call_operand.vmem [shape: f32[16,128], index: 0, kind: input, shape index: {}]   ;;  %s227_s3 = inlined_call_operand.vmem [shape: f32[16,32], index: 3, kind: input, shape index: {}, may-alias: {3,4}]   ;;  %s228_s4 = inlined_call_operand.vmem [shape: f32[16,32], index: 4, kind: output, shape index: {}, may-alias: {3,4}]  }
   0x1   :  { %v152_v0 = vld [vmem:[%s224_s1 + $0x38] sm:$0xff]  ;;  %v151_v1 = vld [vmem:[%s224_s1 + $0x30] sm:$0xff]  ;;  %v150_v2 = vld [vmem:[%s224_s1 + $0x28] sm:$0xff] }
   0x2   :  { %88 = vmatpush.bf16.msra.mxu0 %v152_v0  ;;  %v149_v3 = vld [vmem:[%s224_s1 + $0x20] sm:$0xff]  ;;  %v148_v4 = vld [vmem:[%s224_s1 + $0x18] sm:$0xff]  ;;  %v147_v5 = vld [vmem:[%s224_s1 + $0x10] sm:$0xff] }
   0x3   :  { %v146_v6 = vld [vmem:[%s224_s1 + $0x8] sm:$0xff]  ;;  %v145_v7 = vld [vmem:[%s224_s1] sm:$0xff] }
   0x4   :  { %v17_v8 = vld [vmem:[%s226_s0] sm:$0xff]  ;;  %v18_v9 = vld [vmem:[%s226_s0 + $0x8] sm:$0xff] }
   0x5   :  { %v19_v10 = vpack.c.bf16 %v18_v9, %v17_v8  ;;  %v153_v11 = vld [vmem:[%s225_s2] ss:$0 sm:$0xff] }
   0x6   :  { %89 = vmatpush.bf16.msra.mxu0 %v151_v1  ;;  %v102_v13 = vld [vmem:[%s227_s3] sm:$0xff] }
   0xa   :  { %90 = vmatpush.bf16.msra.mxu0 %v150_v2 }
   0xe   :  { %91 = vmatpush.bf16.msra.mxu0 %v149_v3 }
  0x12   :  { %92 = vmatpush.bf16.msra.mxu0 %v148_v4 }
  0x16   :  { %93 = vmatpush.bf16.msra.mxu0 %v147_v5 }
  0x1a   :  { %94 = vmatpush.bf16.msra.mxu0 %v146_v6 }
  0x1e   :  { %95 = vmatpush.bf16.msra.mxu0 %v145_v7 }
  0x21   :  { %96 = vmatmul.bf16.vlgmr.msra.gmra.mxu0 %v19_v10 }
  0x9e   :  { %v97_v12 = vpop.f32.mrf.mxu0 }
  0x9f   :  { %v98_v14 = vadd.f32 %v153_v11, %v97_v12 }
  0xa1   :  { %v104_v15 = vadd.f32 %v102_v13, %v98_v14 }
  0xa3   :  { %107 = vst.msk [vmem:[%s228_s4] sm:$0xff] %vm106_vm0, %v104_v15 }
  0xa6   :  { %v99_v16 = vpop.f32.mrf.mxu0 }
  0xa7   :  { %v100_v18 = vadd.f32 %v153_v11, %v99_v16 }
  0xaa   :  { %v103_v17 = vld [vmem:[%s227_s3 + $0x8] sm:$0xff] }
  0xab   :  { %v105_v19 = vadd.f32 %v103_v17, %v100_v18 }
  0xad   :  { %108 = vst.msk [vmem:[%s228_s4 + $0x8] sm:$0xff] %vm106_vm0, %v105_v19 }

// kernel: basic_transformer.14
= control target key start
LH: loop header
LB: loop body
LE: loop exit
PB: predicated region body
PF: predicated region fallthrough
CT: control target
= control target key end

     0   :  { %s1277_s9 = smov 0   ;;  %s1279_s10 = smov 0   ;;  %s1551_s0 = inlined_call_operand.vmem [shape: f32[2,8,64], index: 0, kind: input, shape index: {}]   ;;  %s1552_s1 = inlined_call_operand.vmem [shape: f32[2,16,128], index: 1, kind: input, shape index: {}]   ;;  %s1553_s2 = inlined_call_operand.vmem [shape: f32[2,8,64], index: 2, kind: output, shape index: {}]  }
   0x1   :  { %s1281_s11 = smov 0  }
   0x2 LB: > { %s31_s12 = sadd.s32 1, %s1238_s10  ;;  %p1103_p0 = scmp.ge.s32.totalorder %s1242_s11, 1  ;;  %s1242_s11 = sphi %s1281_s11, %s12_s11   ;;  %s1238_s10 = sphi %s1279_s10, %s1555_s10   ;;  %s1234_s9 = sphi %s1277_s9, %s1554_s9  }
   0x3   : > { %p33_p1 = scmp.ge.s32.totalorder %s31_s12, 2  ;;  %p154_p2 = scmp.lt.s32.totalorder %s1242_s11, 3 }
   0x5   : > { %s1557_s12 = smov (%p33_p1, %s31_s12), 0  ;;  %p155_p3 = pnand %p1103_p0, %p154_p2 }
   0x6   : > { %p189_p4 = scmp.lt.s32.totalorder (!%p155_p3), %s1234_s9, 1  ;;  %s1244_s21 = smov (!%p155_p3), 96  }
   0x7   : > { %158 = sbr.rel (%p155_p3) target bundleno = 1643 (0x66b), region = 28  ;;  %s1246_s22 = smov (!%p155_p3), 64  }
   0x8   : > { %s1247_s23 = smov (!%p155_p3), 56   ;;  %s1248_s24 = smov (!%p155_p3), 120  }
   0x9   : > { %s1249_s25 = smov (!%p155_p3), 104   ;;  %s1252_s26 = smov (!%p155_p3), 112  }
   0xa   : > { %s1253_s27 = smov (!%p155_p3), 80   ;;  %s1254_s28 = smov (!%p155_p3), 48  }
   0xb   : > { %s1255_s29 = smov (!%p155_p3), 88   ;;  %s1256_s30 = smov (!%p155_p3), 72  }
   0xc   : > { %s1559_s9 = smov (!%p189_p4, %s1234_s9), 1  ;;  %vm235_vm0 = vcmask 64512   ;;  %vm218_vm1 = vcmask 7168   ;;  %v1245_v12 = vmov -inf   ;;  %vm276_vm2 = vcmask 130048   ;;  %s1257_s3 = smov 40  }
   0xd   : > { %s1126_s13 = sshll.u32 %s1559_s9, 4  ;;  %s1104_s17 = sshll.u32 %s1559_s9, 3  ;;  %219 = vst.msk [vmem:[#allocation2] sm:$0xff] %vm218_vm1, %v1245_v12  ;;  %v1250_v16 = vmov 0   ;;  %v1251_v17 = vmov 0.0   ;;  %vm912_vm3 = vcmask 130112  }
   0xe   : > { %s204_s16 = scalar_lea.vmem %s1552_s1, %s1126_s13  ;;  %s195_s20 = scalar_lea.vmem %s1551_s0, %s1104_s17  ;;  %220 = vst.msk [vmem:[#allocation2 + $0x8] sm:$0xff] %vm218_vm1, %v1245_v12  ;;  %1169 = vset.pattern.permute.xlu0 %v1250_v16  ;;  %1170 = vset.pattern.permute.xlu1 %v1250_v16  ;;  %vm927_vm4 = vcmask 195712   ;;  %vm942_vm5 = vcmask 261312   ;;  %vm957_vm6 = vcmask 326912   ;;  %vm972_vm7 = vcmask 392512  }
   0xf   : > { %v246_v0 = vld [vmem:[%s204_s16] sm:$0xff]  ;;  %v247_v1 = vld [vmem:[%s204_s16 + $0x8] sm:$0xff]  ;;  %221 = vst.msk [vmem:[#allocation2 + $0x10] sm:$0xff] %vm218_vm1, %v1245_v12  ;;  %1171 = vset.pattern.permute.xlu2 %v1250_v16  ;;  %s1258_s4 = smov 24   ;;  %s1259_s5 = smov 32   ;;  %vm987_vm8 = vcmask 458112  }
  0x10   : > { %v248_v2 = vpack.c.bf16 %v246_v0, %v246_v0  ;;  %v249_v3 = vpack.c.bf16 %v247_v1, %v247_v1  ;;  %v244_v8 = vld [vmem:[%s195_s20] sm:$0xff]  ;;  %222 = vst.msk [vmem:[#allocation2 + $0x18] sm:$0xff] %vm218_vm1, %v1245_v12  ;;  %s1260_s6 = smov 8   ;;  %s1261_s7 = smov 16   ;;  %vm1002_vm9 = vcmask 523712  }
  0x11   : > { %v245_v9 = vpack.c.bf16 %v244_v8, %v244_v8  ;;  %223 = vst.msk [vmem:[#allocation2 + $0x20] sm:$0xff] %vm218_vm1, %v1245_v12  ;;  %s1491_s14 = scalar_lea.vmem %s1553_s2, %s1104_s17 }
  0x12   : > { %v252_v4 = vunpack.c.l.b16 %v248_v2  ;;  %v253_v5 = vunpack.c.l.b16 %v249_v3  ;;  %224 = vst.msk [vmem:[#allocation2 + $0x28] sm:$0xff] %vm218_vm1, %v1245_v12 }
  0x13   : > { %v331_v10 = vunpack.c.l.b16 %v245_v9  ;;  %225 = vst.msk [vmem:[#allocation2 + $0x30] sm:$0xff] %vm218_vm1, %v1245_v12 }
  0x14   : > { %v1302_v6 = vpack.c.b16 %v253_v5, %v252_v4  ;;  %226 = vst.msk [vmem:[#allocation2 + $0x38] sm:$0xff] %vm218_vm1, %v1245_v12  ;;  %v275_v19 = vld [vmem:[#allocation2] sm:$0xff] }
  0x15   : > { %v1312_v11 = vpack.c.b16 %v331_v10, %v331_v10  ;;  %236 = vst.msk [vmem:[#allocation4] sm:$0xff] %vm235_vm0, %v1251_v17 }
  0x16   : > { %v260_v7 = vsel %vm235_vm0, %v1302_v6, 0  ;;  %308 = vrot.lane.b32.xlu2 %v1302_v6, %s1246_s22  ;;  %227 = vst.msk [vmem:[#allocation3] sm:$0xff] %vm218_vm1, %v1251_v17 }
  0x17   : > { %269 = vmatpush.bf16.xpose.msra.mxu0 %v260_v7  ;;  %570 = vrot.lane.b32.xlu1 %v1312_v11, %s1244_s21  ;;  %228 = vst.msk [vmem:[#allocation3 + $0x8] sm:$0xff] %vm218_vm1, %v1251_v17  ;;  %v515_v8 = vld [vmem:[#allocation2 + $0x18] sm:$0xff] }
  0x18   : > { %229 = vst.msk [vmem:[#allocation3 + $0x10] sm:$0xff] %vm218_vm1, %v1251_v17 }
  0x19   : > { %230 = vst.msk [vmem:[#allocation3 + $0x18] sm:$0xff] %vm218_vm1, %v1251_v17 }
  0x1a   : > { %231 = vst.msk [vmem:[#allocation3 + $0x20] sm:$0xff] %vm218_vm1, %v1251_v17 }
  0x1b   : > { %232 = vst.msk [vmem:[#allocation3 + $0x28] sm:$0xff] %vm218_vm1, %v1251_v17 }
  0x1c   : > { %233 = vst.msk [vmem:[#allocation3 + $0x30] sm:$0xff] %vm218_vm1, %v1251_v17  ;;  %v300_v50 = vld [vmem:[#allocation4] sm:$0xff] }
  0x1d   : > { %234 = vst.msk [vmem:[#allocation3 + $0x38] sm:$0xff] %vm218_vm1, %v1251_v17 }
  0x1e   : > { %1108 = vmatmul.msk.bf16.vlgmr.msra.gmra.mxu0 %vm235_vm0, %v245_v9  ;;  %333 = vrot.lane.b32.xlu2 %v1312_v11, %s1248_s24  ;;  %237 = vst.msk [vmem:[#allocation4 + $0x8] sm:$0xff] %vm235_vm0, %v1251_v17 }
  0x1f   : > { %390 = vrot.lane.b32.xlu1 %v1302_v6, %s1247_s23  ;;  %238 = vst.msk [vmem:[#allocation4 + $0x10] sm:$0xff] %vm235_vm0, %v1251_v17 }
  0x20   : > { %239 = vst.msk [vmem:[#allocation4 + $0x18] sm:$0xff] %vm235_vm0, %v1251_v17 }
  0x21   : > { %240 = vst.msk [vmem:[#allocation4 + $0x20] sm:$0xff] %vm235_vm0, %v1251_v17 }
  0x22   : > { %241 = vst.msk [vmem:[#allocation4 + $0x28] sm:$0xff] %vm235_vm0, %v1251_v17 }
  0x23   : > { %242 = vst.msk [vmem:[#allocation4 + $0x30] sm:$0xff] %vm235_vm0, %v1251_v17 }
  0x24   : > { %243 = vst.msk [vmem:[#allocation4 + $0x38] sm:$0xff] %vm235_vm0, %v1251_v17 }
  0x26   : > { %335 = vrot.lane.b32.xlu2 %v1302_v6, %s1248_s24 }
  0x2e   : > { %491 = vrot.lane.b32.xlu2 %v1312_v11, %s1249_s25 }
  0x36   : > { %730 = vrot.lane.b32.xlu2 %v1302_v6, %s1253_s27 }
  0x3e   : > { %728 = vrot.lane.b32.xlu2 %v1312_v11, %s1253_s27 }
  0x46   : > { %469 = vrot.lane.b32.xlu2 %v1302_v6, %s1254_s28 }
  0x70   : > { %v309_v18 = vpop.permute.xlu2 %308 }
  0x71   : > { %321 = vmatpush.bf16.msra.mxu1 %v309_v18 }
  0x78   : > { %v334_v25 = vpop.permute.xlu2 %333 }
  0x80   : > { %v336_v26 = vpop.permute.xlu2 %335 }
  0x81   : > { %v341_v28 = vsel %vm235_vm0, %v336_v26, 0 }
  0x82   : > { %350 = vmatpush.bf16.xpose.msra.mxu2 %v341_v28 }
  0x88   : > { %v492_v39 = vpop.permute.xlu2 %491 }
  0x89   : > { %v571_v27 = vpop.permute.xlu1 %570  ;;  %1110 = vmatmul.msk.bf16.vlgmr.msra.gmra.mxu2 %vm235_vm0, %v334_v25 }
  0x90   : > { %v731_v48 = vpop.permute.xlu2 %730 }
  0x91   : > { %v391_v29 = vpop.permute.xlu1 %390  ;;  %v736_v49 = vsel %vm235_vm0, %v731_v48, 0 }
  0x92   : > { %403 = vmatpush.bf16.msra.mxu3 %v391_v29 }
  0x98   : > { %v729_v52 = vpop.permute.xlu2 %728 }
  0x9b   : > { %v1327_v13 = vpop.f32.mrf.mxu0 }
  0x9c   : > { %v277_v14 = vsel %vm276_vm2, %v1327_v13, -inf }
  0x9d   : > { %278 = vmax.xlane.f32.xlu0 %v277_v14 }
  0xa0   : > { %v470_v56 = vpop.permute.xlu2 %469 }
  0xa1   : > { %482 = vmatpush.bf16.msrb.mxu3 %v470_v56 }
  0xa3   : > { %v273_v15 = vpop.f32.mrf.mxu0 }
 0x10c   : > { %v1387_v46 = vpop.f32.mrf.mxu2 }
 0x10d   : > { %v358_v62 = vsel %vm276_vm2, %v1387_v46, -inf }
 0x110   : > { %v279_v20 = vpop.xlane.xlu0 %278 }
 0x111   : > { %v280_v21 = vmax.f32 %v275_v19, %v279_v20 }
 0x113   : > { %v281_v22 = vsub.f32 %v275_v19, %v280_v21  ;;  %329 = vst.msk [vmem:[#allocation2] sm:$0xff] %vm218_vm1, %v280_v21  ;;  %286 = vperm.xlu0 %1169, %v280_v21   ;;  %v1412_v21 = vld [vmem:[#allocation2 + $0x28] sm:$0xff] }
 0x114   : > { %v354_v47 = vpop.f32.mrf.mxu2 }
 0x115   : > { %v282_v23 = vmul.f32 1.442695, %v281_v22 }
 0x117   : > { %1172 = vpow2.f32 %v282_v23 }
 0x11b   : > { %414 = vrot.lane.b32.xlu0 %v1302_v6, %s1252_s26 }
 0x11d   : > { %v1353_v24 = vpop.eup %1172 }
 0x11e   : > { %303 = vperm.xlu1 %1170, %v1353_v24  }
 0x123   : > { %493 = vrot.lane.b32.xlu0 %v1302_v6, %s1249_s25 }
 0x12b   : > { %412 = vrot.lane.b32.xlu0 %v1312_v11, %s1252_s26 }
 0x133   : > { %572 = vrot.lane.b32.xlu0 %v1302_v6, %s1244_s21 }
 0x13b   : > { %651 = vrot.lane.b32.xlu0 %v1302_v6, %s1255_s29 }
 0x143   : > { %649 = vrot.lane.b32.xlu0 %v1312_v11, %s1255_s29 }
 0x14b   : > { %809 = vrot.lane.b32.xlu0 %v1302_v6, %s1256_s30 }
 0x153   : > { %807 = vrot.lane.b32.xlu0 %v1312_v11, %s1256_s30 }
 0x15b   : > { %548 = vrot.lane.b32.xlu0 %v1302_v6, %s1257_s3 }
 0x185   : > { %v287_v30 = vpop.permute.xlu0 %286 }
 0x186   : > { %v289_v31 = vsub.f32 %v1327_v13, %v287_v30  ;;  %v357_v13 = vld [vmem:[#allocation2 + $0x8] sm:$0xff] }
 0x188   : > { %v290_v32 = vmul.f32 1.442695, %v289_v31 }
 0x18a   : > { %1174 = vpow2.f32 %v290_v32 }
 0x18d   : > { %v415_v33 = vpop.permute.xlu0 %414 }
 0x18e   : > { %v420_v34 = vsel %vm235_vm0, %v415_v33, 0 }
 0x18f   : > { %429 = vmatpush.bf16.xpose.msrb.mxu1 %v420_v34 }
 0x190   : > { %v1371_v35 = vpop.eup %1174  ;;  %v304_v51 = vpop.permute.xlu1 %303 }
 0x191   : > { %v307_v36 = vpack.c.bf16 %v1371_v35, %v1371_v35  ;;  %v306_v53 = vmul.f32 %v304_v51, %v300_v50 }
 0x193   : > { %1109 = vmatmul.msk.bf16.vlgmr.msra.gmra.mxu1 %vm276_vm2, %v307_v36 }
 0x195   : > { %v494_v37 = vpop.permute.xlu0 %493 }
 0x196   : > { %v499_v38 = vsel %vm235_vm0, %v494_v37, 0 }
 0x197   : > { %508 = vmatpush.bf16.xpose.msrb.mxu0 %v499_v38 }
 0x19d   : > { %v413_v40 = vpop.permute.xlu0 %412 }
 0x19e   : > { %1114 = vmatmul.msk.bf16.vlgmr.msrb.gmra.mxu0 %vm235_vm0, %v492_v39 }
 0x1a3   : > { %1112 = vmatmul.msk.bf16.vlgmr.msrb.gmra.mxu1 %vm235_vm0, %v413_v40 }
 0x1a5   : > { %v573_v41 = vpop.permute.xlu0 %572 }
 0x1a6   : > { %v578_v42 = vsel %vm235_vm0, %v573_v41, 0 }
 0x1a7   : > { %587 = vmatpush.bf16.xpose.msra.mxu1 %v578_v42 }
 0x1ad   : > { %v652_v43 = vpop.permute.xlu0 %651 }
 0x1ae   : > { %v657_v44 = vsel %vm235_vm0, %v652_v43, 0 }
 0x1af   : > { %666 = vmatpush.bf16.xpose.msra.mxu0 %v657_v44  ;;  %745 = vmatpush.bf16.xpose.msrb.mxu1 %v736_v49  ;;  %v436_v44 = vld [vmem:[#allocation2 + $0x10] sm:$0xff]  ;;  %v292_v49 = vld [vmem:[#allocation3] sm:$0xff] }
 0x1b0   : > { %v293_v51 = vmul.f32 %v1353_v24, %v292_v49 }
 0x1b3   : > { %1116 = vmatmul.msk.bf16.vlgmr.msra.gmra.mxu1 %vm235_vm0, %v571_v27  ;;  %v294_v27 = vsel %vm276_vm2, %v1371_v35, 0.0 }
 0x1b5   : > { %v650_v45 = vpop.permute.xlu0 %649 }
 0x1b6   : > { %1118 = vmatmul.msk.bf16.vlgmr.msra.gmra.mxu0 %vm235_vm0, %v650_v45 }
 0x1bd   : > { %v810_v3 = vpop.permute.xlu0 %809 }
 0x1be   : > { %v815_v4 = vsel %vm235_vm0, %v810_v3, 0 }
 0x1bf   : > { %824 = vmatpush.bf16.xpose.msrb.mxu0 %v815_v4 }
 0x1c3   : > { %1120 = vmatmul.msk.bf16.vlgmr.msrb.gmra.mxu1 %vm235_vm0, %v729_v52 }
 0x1c5   : > { %v808_v5 = vpop.permute.xlu0 %807 }
 0x1c6   : > { %1122 = vmatmul.msk.bf16.vlgmr.msrb.gmra.mxu0 %vm235_vm0, %v808_v5  ;;  %v374_v5 = vld [vmem:[#allocation3 + $0x8] sm:$0xff] }
 0x1cd   : > { %v549_v23 = vpop.permute.xlu0 %548 }
 0x1ce   : > { %561 = vmatpush.bf16.msrb.mxu2 %v549_v23 }
 0x210   : > { %v323_v54 = vpop.f32.mrf.mxu1 }
 0x211   : > { %v327_v55 = vadd.f32 %v323_v54, %v306_v53 }
 0x213   : > { %328 = vst.msk [vmem:[#allocation4] sm:$0xff] %vm235_vm0, %v327_v55 }
 0x218   : > { %v325_v57 = vpop.f32.mrf.mxu1 }
 0x219   : > { %v594_v57 = vld [vmem:[#allocation2 + $0x20] sm:$0xff] }
 0x21b   : > { %v510_v58 = vpop.f32.mrf.mxu0 }
 0x21c   : > { %v516_v59 = vsel %vm276_vm2, %v510_v58, -inf }
 0x21d   : > { %517 = vmax.xlane.f32.xlu2 %v516_v59 }
 0x220   : > { %v1393_v60 = vpop.f32.mrf.mxu1 }
 0x221   : > { %v437_v26 = vsel %vm276_vm2, %v1393_v60, -inf }
 0x223   : > { %v512_v61 = vpop.f32.mrf.mxu0 }
 0x225   : > { %359 = vmax.xlane.f32.xlu2 %v358_v62 }
 0x228   : > { %v433_v63 = vpop.f32.mrf.mxu1 }
 0x230   : > { %v1403_v7 = vpop.f32.mrf.mxu1 }
 0x231   : > { %v595_v28 = vsel %vm276_vm2, %v1403_v7, -inf }
 0x233   : > { %v1397_v0 = vpop.f32.mrf.mxu0 }
 0x234   : > { %v674_v1 = vsel %vm276_vm2, %v1397_v0, -inf }
 0x235   : > { %675 = vmax.xlane.f32.xlu2 %v674_v1  ;;  %v532_v1 = vld [vmem:[#allocation3 + $0x18] sm:$0xff] }
 0x238   : > { %v591_v9 = vpop.f32.mrf.mxu1 }
 0x23b   : > { %v670_v2 = vpop.f32.mrf.mxu0 }
 0x240   : > { %v1407_v17 = vpop.f32.mrf.mxu1 }
 0x241   : > { %v753_v63 = vsel %vm276_vm2, %v1407_v17, -inf }
 0x243   : > { %v1425_v29 = vpop.f32.mrf.mxu0 }
 0x244   : > { %v832_v43 = vsel %vm276_vm2, %v1425_v29, -inf }
 0x248   : > { %v749_v19 = vpop.f32.mrf.mxu1 }
 0x24b   : > { %v828_v33 = vpop.f32.mrf.mxu0 }
 0x290   : > { %v518_v10 = vpop.xlane.xlu2 %517 }
 0x291   : > { %v519_v11 = vmax.f32 %v515_v8, %v518_v10 }
 0x293   : > { %v520_v12 = vsub.f32 %v515_v8, %v519_v11  ;;  %569 = vst.msk [vmem:[#allocation2 + $0x18] sm:$0xff] %vm218_vm1, %v519_v11  ;;  %525 = vperm.xlu0 %1169, %v519_v11  }
 0x295   : > { %v521_v45 = vmul.f32 1.442695, %v520_v12 }
 0x298   : > { %v360_v14 = vpop.xlane.xlu2 %359 }
 0x299   : > { %v361_v15 = vmax.f32 %v357_v13, %v360_v14 }
 0x29b   : > { %v362_v16 = vsub.f32 %v357_v13, %v361_v15  ;;  %411 = vst.msk [vmem:[#allocation2 + $0x8] sm:$0xff] %vm218_vm1, %v361_v15  ;;  %367 = vperm.xlu1 %1170, %v361_v15  }
 0x29d   : > { %v363_v18 = vmul.f32 1.442695, %v362_v16  ;;  %v831_v16 = vld [vmem:[#allocation2 + $0x38] sm:$0xff] }
 0x29f   : > { %1176 = vpow2.f32 %v363_v18 }
 0x2a5   : > { %v1409_v20 = vpop.eup %1176 }
 0x2a6   : > { %385 = vperm.xlu2 %1171, %v1409_v20   ;;  %v375_v9 = vmul.f32 %v1409_v20, %v374_v5 }
 0x2a8   : > { %v676_v22 = vpop.xlane.xlu2 %675 }
 0x2a9   : > { %v1415_v25 = vmax.f32 %v1412_v21, %v676_v22 }
 0x2ab   : > { %727 = vst.msk [vmem:[#allocation2 + $0x28] sm:$0xff] %vm218_vm1, %v1415_v25 }
 0x2bd   : > { %438 = vmax.xlane.f32.xlu0 %v437_v26 }
 0x2c5   : > { %295 = vadd.xlane.f32.xlu1 %v294_v27  ;;  %v382_v27 = vld [vmem:[#allocation4 + $0x8] sm:$0xff] }
 0x2cf   : > { %596 = vmax.xlane.f32.xlu2 %v595_v28 }
 0x300   : > { %v386_v55 = vpop.permute.xlu2 %385 }
 0x305   : > { %v526_v30 = vpop.permute.xlu0 %525 }
 0x306   : > { %v528_v31 = vsub.f32 %v510_v58, %v526_v30 }
 0x308   : > { %v529_v32 = vmul.f32 1.442695, %v528_v31 }
 0x30a   : > { %1178 = vpow2.f32 %v529_v32 }
 0x30d   : > { %v368_v34 = vpop.permute.xlu1 %367 }
 0x30e   : > { %v370_v36 = vsub.f32 %v1387_v46, %v368_v34 }
 0x310   : > { %v1179_v37 = vpop.eup %1178  ;;  %v371_v38 = vmul.f32 1.442695, %v370_v36 }
 0x311   : > { %v534_v39 = vsel %vm276_vm2, %v1179_v37, 0.0  ;;  %v547_v35 = vpack.c.bf16 %v1179_v37, %v1179_v37 }
 0x312   : > { %1180 = vpow2.f32 %v371_v38  ;;  %535 = vadd.xlane.f32.xlu1 %v534_v39  ;;  %v540_v38 = vld [vmem:[#allocation4 + $0x18] sm:$0xff] }
 0x313   : > { %1115 = vmatmul.msk.bf16.vlgmr.msrb.gmra.mxu2 %vm276_vm2, %v547_v35  ;;  %1182 = vpow2.f32 %v521_v45 }
 0x318   : > { %v1181_v40 = vpop.eup %1180 }
 0x319   : > { %v376_v41 = vsel %vm276_vm2, %v1181_v40, 0.0  ;;  %v389_v42 = vpack.c.bf16 %v1181_v40, %v1181_v40  ;;  %v1183_v54 = vpop.eup %1182 }
 0x31a   : > { %377 = vadd.xlane.f32.xlu1 %v376_v41  ;;  %v533_v2 = vmul.f32 %v1183_v54, %v532_v1 }
 0x31b   : > { %1111 = vmatmul.msk.bf16.vlgmr.msra.gmra.mxu3 %vm276_vm2, %v389_v42 }
 0x322   : > { %833 = vmax.xlane.f32.xlu1 %v832_v43 }
 0x330   : > { %v439_v46 = vpop.xlane.xlu0 %438 }
 0x331   : > { %v440_v47 = vmax.f32 %v436_v44, %v439_v46 }
 0x333   : > { %v441_v48 = vsub.f32 %v436_v44, %v440_v47  ;;  %490 = vst.msk [vmem:[#allocation2 + $0x10] sm:$0xff] %vm218_vm1, %v440_v47  ;;  %446 = vperm.xlu2 %1171, %v440_v47  }
 0x335   : > { %v442_v50 = vmul.f32 1.442695, %v441_v48 }
 0x337   : > { %1184 = vpow2.f32 %v442_v50  ;;  %v1470_v50 = vld [vmem:[#allocation2 + $0x30] sm:$0xff] }
 0x338   : > { %v296_v52 = vpop.xlane.xlu1 %295 }
 0x339   : > { %v297_v53 = vadd.f32 %v296_v52, %v293_v51 }
 0x33b   : > { %299 = vst.msk [vmem:[#allocation3] sm:$0xff] %vm218_vm1, %v297_v53  ;;  %543 = vperm.xlu1 %1170, %v1183_v54  }
 0x33d   : > { %v1437_v56 = vpop.eup %1184 }
 0x33e   : > { %464 = vperm.xlu2 %1171, %v1437_v56  }
 0x342   : > { %v597_v58 = vpop.xlane.xlu2 %596  ;;  %v889_v8 = vld [vmem:[#allocation3] sm:$0xff] }
 0x343   : > { %v598_v59 = vmax.f32 %v594_v57, %v597_v58  ;;  %706 = vrot.lane.b32.xlu1 %v1302_v6, %s1258_s4 }
 0x345   : > { %v599_v61 = vsub.f32 %v594_v57, %v598_v59  ;;  %648 = vst.msk [vmem:[#allocation2 + $0x20] sm:$0xff] %vm218_vm1, %v598_v59  ;;  %604 = vperm.xlu0 %1169, %v598_v59   ;;  %v678_v57 = vsub.f32 %v1412_v21, %v1415_v25  ;;  %v891_v21 = vld [vmem:[#allocation4] sm:$0xff] }
 0x346   : > { %683 = vperm.xlu2 %1171, %v1415_v25  }
 0x347   : > { %v600_v24 = vmul.f32 1.442695, %v599_v61  ;;  %v679_v58 = vmul.f32 1.442695, %v678_v57  ;;  %v856_v57 = vld [vmem:[#allocation4 + $0x38] sm:$0xff] }
 0x349   : > { %1186 = vpow2.f32 %v600_v24 }
 0x34a   : > { %1188 = vrcp.f32 %v889_v8 }
 0x34f   : > { %v1444_v62 = vpop.eup %1186 }
 0x350   : > { %622 = vperm.xlu2 %1171, %v1444_v62   ;;  %v1189_v15 = vpop.eup %1188 }
 0x36f   : > { %754 = vmax.xlane.f32.xlu0 %v753_v63 }
 0x383   : > { %627 = vrot.lane.b32.xlu0 %v1302_v6, %s1259_s5 }
 0x385   : > { %v536_v3 = vpop.xlane.xlu1 %535 }
 0x386   : > { %v537_v4 = vadd.f32 %v536_v3, %v533_v2  ;;  %v690_v2 = vld [vmem:[#allocation3 + $0x28] sm:$0xff] }
 0x388   : > { %538 = vst.msk [vmem:[#allocation3 + $0x18] sm:$0xff] %vm218_vm1, %v537_v4 }
 0x38b   : > { %864 = vrot.lane.b32.xlu0 %v1302_v6, %s1260_s6 }
 0x38d   : > { %v378_v10 = vpop.xlane.xlu1 %377  ;;  %v447_v11 = vpop.permute.xlu2 %446 }
 0x38e   : > { %v379_v12 = vadd.f32 %v378_v10, %v375_v9  ;;  %v449_v13 = vsub.f32 %v1393_v60, %v447_v11  ;;  %v388_v60 = vmul.f32 %v386_v55, %v382_v27  ;;  %v453_v11 = vld [vmem:[#allocation3 + $0x10] sm:$0xff] }
 0x38f   : > { %v929_v47 = vld [vmem:[#allocation3 + $0x18] sm:$0xff] }
 0x390   : > { %380 = vst.msk [vmem:[#allocation3 + $0x8] sm:$0xff] %vm218_vm1, %v379_v12  ;;  %v450_v14 = vmul.f32 1.442695, %v449_v13  ;;  %v454_v13 = vmul.f32 %v1437_v56, %v453_v11 }
 0x392   : > { %1190 = vpow2.f32 %v450_v14 }
 0x393   : > { %894 = vperm.xlu0 %1169, %v1189_v15  }
 0x395   : > { %v834_v18 = vpop.xlane.xlu1 %833 }
 0x396   : > { %v563_v19 = vpop.f32.mrf.mxu2  ;;  %v835_v22 = vmax.f32 %v831_v16, %v834_v18 }
 0x398   : > { %v1191_v23 = vpop.eup %1190  ;;  %v1457_v26 = vpop.permute.xlu2 %464  ;;  %885 = vst.msk [vmem:[#allocation2 + $0x38] sm:$0xff] %vm218_vm1, %v835_v22 }
 0x399   : > { %v468_v20 = vpack.c.bf16 %v1191_v23, %v1191_v23  ;;  %v455_v42 = vsel %vm276_vm2, %v1191_v23, 0.0 }
 0x39b   : > { %1113 = vmatmul.msk.bf16.vlgmr.msrb.gmra.mxu3 %vm276_vm2, %v468_v20 }
 0x39e   : > { %v405_v28 = vpop.f32.mrf.mxu3  ;;  %v565_v30 = vpop.f32.mrf.mxu2 }
 0x39f   : > { %v409_v31 = vadd.f32 %v405_v28, %v388_v60 }
 0x3a0   : > { %v684_v32 = vpop.permute.xlu2 %683 }
 0x3a1   : > { %410 = vst.msk [vmem:[#allocation4 + $0x8] sm:$0xff] %vm235_vm0, %v409_v31  ;;  %v686_v33 = vsub.f32 %v1397_v0, %v684_v32  ;;  %v836_v0 = vsub.f32 %v831_v16, %v835_v22 }
 0x3a3   : > { %v687_v34 = vmul.f32 1.442695, %v686_v33  ;;  %v837_v45 = vmul.f32 1.442695, %v836_v0 }
 0x3a5   : > { %1192 = vpow2.f32 %v687_v34 }
 0x3a6   : > { %v407_v36 = vpop.f32.mrf.mxu3  ;;  %1194 = vpow2.f32 %v837_v45 }
 0x3a7   : > { %1196 = vrcp.f32 %v929_v47  ;;  %v698_v36 = vld [vmem:[#allocation4 + $0x28] sm:$0xff] }
 0x3aa   : > { %v623_v18 = vpop.permute.xlu2 %622 }
 0x3ab   : > { %v1193_v37 = vpop.eup %1192 }
 0x3ac   : > { %v692_v39 = vsel %vm276_vm2, %v1193_v37, 0.0  ;;  %v705_v44 = vpack.c.bf16 %v1193_v37, %v1193_v37  ;;  %v1467_v46 = vpop.eup %1194 }
 0x3ad   : > { %693 = vadd.xlane.f32.xlu1 %v692_v39  ;;  %v544_v35 = vpop.permute.xlu1 %543  ;;  %v1197_v48 = vpop.eup %1196 }
 0x3ae   : > { %v546_v40 = vmul.f32 %v544_v35, %v540_v38 }
 0x3b0   : > { %v567_v41 = vadd.f32 %v563_v19, %v546_v40  ;;  %v899_v40 = vld [vmem:[#allocation3 + $0x8] sm:$0xff] }
 0x3b2   : > { %568 = vst.msk [vmem:[#allocation4 + $0x18] sm:$0xff] %vm235_vm0, %v567_v41 }
 0x3b5   : > { %456 = vadd.xlane.f32.xlu1 %v455_v42  ;;  %v707_v43 = vpop.permute.xlu1 %706  ;;  %v619_v42 = vld [vmem:[#allocation4 + $0x20] sm:$0xff] }
 0x3b6   : > { %719 = vmatpush.bf16.msra.mxu2 %v707_v43 }
 0x3b7   : > { %v605_v49 = vpop.permute.xlu0 %604 }
 0x3b8   : > { %v607_v54 = vsub.f32 %v1403_v7, %v605_v49 }
 0x3b9   : > { %1119 = vmatmul.msk.bf16.vlgmr.msra.gmra.mxu2 %vm276_vm2, %v705_v44  ;;  %v625_v44 = vmul.f32 %v623_v18, %v619_v42 }
 0x3ba   : > { %v608_v55 = vmul.f32 1.442695, %v607_v54 }
 0x3bc   : > { %1198 = vpow2.f32 %v608_v55 }
 0x3bd   : > { %1200 = vpow2.f32 %v679_v58 }
 0x3c2   : > { %v1199_v59 = vpop.eup %1198 }
 0x3c3   : > { %v626_v24 = vpack.c.bf16 %v1199_v59, %v1199_v59  ;;  %v1201_v7 = vpop.eup %1200  ;;  %v613_v39 = vsel %vm276_vm2, %v1199_v59, 0.0  ;;  %v777_v59 = vld [vmem:[#allocation4 + $0x30] sm:$0xff] }
 0x3c4   : > { %v691_v8 = vmul.f32 %v1201_v7, %v690_v2 }
 0x3ce   : > { %859 = vperm.xlu1 %1170, %v1467_v46  }
 0x3d6   : > { %934 = vperm.xlu1 %1170, %v1197_v48   ;;  %v848_v48 = vld [vmem:[#allocation3 + $0x38] sm:$0xff] }
 0x3d7   : > { %v849_v49 = vmul.f32 %v1467_v46, %v848_v48 }
 0x3e2   : > { %v755_v51 = vpop.xlane.xlu0 %754 }
 0x3e3   : > { %v1473_v52 = vmax.f32 %v1470_v50, %v755_v51 }
 0x3e5   : > { %v757_v53 = vsub.f32 %v1470_v50, %v1473_v52  ;;  %806 = vst.msk [vmem:[#allocation2 + $0x30] sm:$0xff] %vm218_vm1, %v1473_v52  ;;  %762 = vperm.xlu2 %1171, %v1473_v52   ;;  %v611_v52 = vld [vmem:[#allocation3 + $0x20] sm:$0xff] }
 0x3e7   : > { %v758_v35 = vmul.f32 1.442695, %v757_v53  ;;  %v612_v53 = vmul.f32 %v1444_v62, %v611_v52 }
 0x3ed   : > { %841 = vperm.xlu2 %1171, %v835_v22  }
 0x3f5   : > { %v628_v61 = vpop.permute.xlu0 %627  ;;  %785 = vrot.lane.b32.xlu2 %v1302_v6, %s1261_s7  ;;  %v461_v6 = vld [vmem:[#allocation4 + $0x10] sm:$0xff] }
 0x3f6   : > { %640 = vmatpush.bf16.msra.mxu3 %v628_v61  ;;  %v467_v3 = vmul.f32 %v1457_v26, %v461_v6  ;;  %v901_v6 = vld [vmem:[#allocation4 + $0x8] sm:$0xff] }
 0x3f9   : > { %1117 = vmatmul.msk.bf16.vlgmr.msra.gmra.mxu3 %vm276_vm2, %v626_v24 }
 0x3fd   : > { %v865_v63 = vpop.permute.xlu0 %864  ;;  %701 = vperm.xlu2 %1171, %v1201_v7  }
 0x3fe   : > { %877 = vmatpush.bf16.msrb.mxu2 %v865_v63 }
 0x405   : > { %v895_v25 = vpop.permute.xlu0 %894 }
 0x406   : > { %v897_v1 = vmul.f32 %v895_v25, %v891_v21 }
 0x408   : > { %898 = vst.msk [vmem:[%s1491_s14] sm:$0xff] %vm235_vm0, %v897_v1 }
 0x41e   : > { %v484_v4 = vpop.f32.mrf.mxu3 }
 0x41f   : > { %v488_v5 = vadd.f32 %v484_v4, %v467_v3 }
 0x420   : > { %v694_v9 = vpop.xlane.xlu1 %693 }
 0x421   : > { %489 = vst.msk [vmem:[#allocation4 + $0x10] sm:$0xff] %vm235_vm0, %v488_v5  ;;  %v695_v10 = vadd.f32 %v694_v9, %v691_v8  ;;  %v931_v9 = vld [vmem:[#allocation4 + $0x18] sm:$0xff] }
 0x423   : > { %696 = vst.msk [vmem:[#allocation3 + $0x28] sm:$0xff] %vm218_vm1, %v695_v10 }
 0x426   : > { %v486_v12 = vpop.f32.mrf.mxu3 }
 0x428   : > { %v457_v14 = vpop.xlane.xlu1 %456 }
 0x429   : > { %v458_v15 = vadd.f32 %v457_v14, %v454_v13 }
 0x42a   : > { %v959_v12 = vld [vmem:[#allocation3 + $0x28] sm:$0xff] }
 0x42b   : > { %459 = vst.msk [vmem:[#allocation3 + $0x10] sm:$0xff] %vm218_vm1, %v458_v15  ;;  %v916_v15 = vld [vmem:[#allocation4 + $0x10] sm:$0xff] }
 0x432   : > { %v914_v16 = vld [vmem:[#allocation3 + $0x10] sm:$0xff] }
 0x433   : > { %1202 = vrcp.f32 %v914_v16 }
 0x439   : > { %v1203_v19 = vpop.eup %1202 }
 0x43a   : > { %919 = vperm.xlu1 %1170, %v1203_v19  }
 0x43c   : > { %v721_v22 = vpop.f32.mrf.mxu2 }
 0x43f   : > { %v763_v23 = vpop.permute.xlu2 %762 }
 0x440   : > { %v765_v26 = vsub.f32 %v1407_v17, %v763_v23  ;;  %v860_v58 = vpop.permute.xlu1 %859 }
 0x441   : > { %v862_v24 = vmul.f32 %v860_v58, %v856_v57 }
 0x442   : > { %v766_v20 = vmul.f32 1.442695, %v765_v26  ;;  %v769_v26 = vld [vmem:[#allocation3 + $0x30] sm:$0xff] }
 0x444   : > { %v723_v27 = vpop.f32.mrf.mxu2  ;;  %1204 = vpow2.f32 %v766_v20 }
 0x447   : > { %v842_v60 = vpop.permute.xlu2 %841 }
 0x448   : > { %v844_v28 = vsub.f32 %v1425_v29, %v842_v60  ;;  %v935_v8 = vpop.permute.xlu1 %934 }
 0x449   : > { %v937_v10 = vmul.f32 %v935_v8, %v931_v9 }
 0x44a   : > { %v845_v56 = vmul.f32 1.442695, %v844_v28  ;;  %v1502_v30 = vpop.eup %1204 }
 0x44b   : > { %v784_v32 = vpack.c.bf16 %v1502_v30, %v1502_v30  ;;  %v771_v11 = vsel %vm276_vm2, %v1502_v30, 0.0 }
 0x44c   : > { %1206 = vpow2.f32 %v845_v56 }
 0x44d   : > { %1208 = vpow2.f32 %v758_v35 }
 0x44e   : > { %1210 = vrcp.f32 %v899_v40 }
 0x44f   : > { %v786_v31 = vpop.permute.xlu2 %785 }
 0x450   : > { %798 = vmatpush.bf16.msrb.mxu3 %v786_v31 }
 0x452   : > { %v1207_v33 = vpop.eup %1206 }
 0x453   : > { %v863_v34 = vpack.c.bf16 %v1207_v33, %v1207_v33  ;;  %1121 = vmatmul.msk.bf16.vlgmr.msrb.gmra.mxu3 %vm276_vm2, %v784_v32  ;;  %v850_v17 = vsel %vm276_vm2, %v1207_v33, 0.0  ;;  %v1514_v41 = vpop.eup %1208 }
 0x454   : > { %851 = vadd.xlane.f32.xlu2 %v850_v17  ;;  %v1211_v43 = vpop.eup %1210  ;;  %v770_v20 = vmul.f32 %v1514_v41, %v769_v26 }
 0x455   : > { %1123 = vmatmul.msk.bf16.vlgmr.msrb.gmra.mxu2 %vm276_vm2, %v863_v34 }
 0x457   : > { %v702_v29 = vpop.permute.xlu2 %701 }
 0x458   : > { %v704_v37 = vmul.f32 %v702_v29, %v698_v36 }
 0x45a   : > { %v725_v38 = vadd.f32 %v721_v22, %v704_v37 }
 0x45c   : > { %726 = vst.msk [vmem:[#allocation4 + $0x28] sm:$0xff] %vm235_vm0, %v725_v38  ;;  %614 = vadd.xlane.f32.xlu2 %v613_v39 }
 0x463   : > { %v961_v30 = vld [vmem:[#allocation4 + $0x28] sm:$0xff] }
 0x474   : > { %780 = vperm.xlu2 %1171, %v1514_v41  }
 0x47c   : > { %v642_v0 = vpop.f32.mrf.mxu3  ;;  %904 = vperm.xlu2 %1171, %v1211_v43  }
 0x47d   : > { %v646_v45 = vadd.f32 %v642_v0, %v625_v44 }
 0x47f   : > { %647 = vst.msk [vmem:[#allocation4 + $0x20] sm:$0xff] %vm235_vm0, %v646_v45 }
 0x484   : > { %v644_v47 = vpop.f32.mrf.mxu3 }
 0x486   : > { %v946_v34 = vld [vmem:[#allocation4 + $0x20] sm:$0xff] }
 0x4ac   : > { %v920_v14 = vpop.permute.xlu1 %919 }
 0x4ad   : > { %v922_v16 = vmul.f32 %v920_v14, %v916_v15 }
 0x4c7   : > { %v852_v50 = vpop.xlane.xlu2 %851 }
 0x4c8   : > { %v853_v51 = vadd.f32 %v852_v50, %v849_v49 }
 0x4ca   : > { %854 = vst.msk [vmem:[#allocation3 + $0x38] sm:$0xff] %vm218_vm1, %v853_v51 }
 0x4cf   : > { %v615_v54 = vpop.xlane.xlu2 %614 }
 0x4d0   : > { %v616_v55 = vadd.f32 %v615_v54, %v612_v53 }
 0x4d1   : > { %v989_v18 = vld [vmem:[#allocation3 + $0x38] sm:$0xff] }
 0x4d2   : > { %617 = vst.msk [vmem:[#allocation3 + $0x20] sm:$0xff] %vm218_vm1, %v616_v55 }
 0x4d6   : > { %v800_v61 = vpop.f32.mrf.mxu3 }
 0x4d7   : > { %v781_v7 = vpop.permute.xlu2 %780 }
 0x4d8   : > { %v783_v63 = vmul.f32 %v781_v7, %v777_v59  ;;  %v879_v21 = vpop.f32.mrf.mxu2 }
 0x4d9   : > { %v883_v46 = vadd.f32 %v879_v21, %v862_v24  ;;  %v944_v25 = vld [vmem:[#allocation3 + $0x20] sm:$0xff] }
 0x4da   : > { %v804_v1 = vadd.f32 %v800_v61, %v783_v63  ;;  %1212 = vrcp.f32 %v944_v25 }
 0x4db   : > { %884 = vst.msk [vmem:[#allocation4 + $0x38] sm:$0xff] %vm235_vm0, %v883_v46  ;;  %1214 = vrcp.f32 %v959_v12 }
 0x4dc   : > { %805 = vst.msk [vmem:[#allocation4 + $0x30] sm:$0xff] %vm235_vm0, %v804_v1  ;;  %1216 = vrcp.f32 %v989_v18 }
 0x4de   : > { %v802_v62 = vpop.f32.mrf.mxu3 }
 0x4df   : > { %v905_v2 = vpop.permute.xlu2 %904 }
 0x4e0   : > { %v1213_v3 = vpop.eup %1212  ;;  %v907_v4 = vmul.f32 %v905_v2, %v901_v6  ;;  %v881_v5 = vpop.f32.mrf.mxu2 }
 0x4e1   : > { %949 = vperm.xlu2 %1171, %v1213_v3   ;;  %v1215_v13 = vpop.eup %1214 }
 0x4e2   : > { %909 = vrot.lane.b32.xlu0 %v907_v4, %s1260_s6  ;;  %v1217_v19 = vpop.eup %1216  ;;  %v991_v29 = vld [vmem:[#allocation4 + $0x38] sm:$0xff] }
 0x4e3   : > { %v976_v39 = vld [vmem:[#allocation4 + $0x30] sm:$0xff] }
 0x4ea   : > { %939 = vrot.lane.b32.xlu0 %v937_v10, %s1258_s4 }
 0x514   : > { %772 = vadd.xlane.f32.xlu0 %v771_v11 }
 0x528   : > { %964 = vperm.xlu0 %1169, %v1215_v13  }
 0x530   : > { %924 = vrot.lane.b32.xlu0 %v922_v16, %s1261_s7 }
 0x538   : > { %994 = vperm.xlu0 %1169, %v1217_v19  }
 0x53b   : > { %v950_v33 = vpop.permute.xlu2 %949 }
 0x53c   : > { %v952_v17 = vmul.f32 %v950_v33, %v946_v34 }
 0x554   : > { %v910_v22 = vpop.permute.xlu0 %909 }
 0x555   : > { %913 = vst.msk [vmem:[%s1491_s14] sm:$0xff] %vm912_vm3, %v910_v22 }
 0x55c   : > { %v940_v23 = vpop.permute.xlu0 %939 }
 0x587   : > { %v773_v27 = vpop.xlane.xlu0 %772 }
 0x588   : > { %v774_v60 = vadd.f32 %v773_v27, %v770_v20 }
 0x58a   : > { %775 = vst.msk [vmem:[#allocation3 + $0x30] sm:$0xff] %vm218_vm1, %v774_v60 }
 0x591   : > { %v974_v28 = vld [vmem:[#allocation3 + $0x30] sm:$0xff] }
 0x592   : > { %1218 = vrcp.f32 %v974_v28 }
 0x598   : > { %v1219_v56 = vpop.eup %1218 }
 0x599   : > { %979 = vperm.xlu1 %1170, %v1219_v56  }
 0x59a   : > { %v965_v31 = vpop.permute.xlu0 %964 }
 0x59b   : > { %v967_v32 = vmul.f32 %v965_v31, %v961_v30 }
 0x59d   : > { %969 = vrot.lane.b32.xlu2 %v967_v32, %s1257_s3 }
 0x5a1   : > { %954 = vrot.lane.b32.xlu1 %v952_v17, %s1259_s5 }
 0x5a2   : > { %v925_v36 = vpop.permute.xlu0 %924 }
 0x5a3   : > { %928 = vst.msk [vmem:[%s1491_s14] sm:$0xff] %vm927_vm4, %v925_v36 }
 0x5a4   : > { %943 = vst.msk [vmem:[%s1491_s14] sm:$0xff] %vm942_vm5, %v940_v23 }
 0x5aa   : > { %v995_v37 = vpop.permute.xlu0 %994 }
 0x5ab   : > { %v997_v38 = vmul.f32 %v995_v37, %v991_v29 }
 0x5ad   : > { %999 = vrot.lane.b32.xlu1 %v997_v38, %s1247_s23 }
 0x5f7   : > { %v970_v42 = vpop.permute.xlu2 %969 }
 0x60b   : > { %v980_v35 = vpop.permute.xlu1 %979 }
 0x60c   : > { %v982_v40 = vmul.f32 %v980_v35, %v976_v39 }
 0x60e   : > { %984 = vrot.lane.b32.xlu2 %v982_v40, %s1254_s28 }
 0x613   : > { %v955_v41 = vpop.permute.xlu1 %954 }
 0x614   : > { %958 = vst.msk [vmem:[%s1491_s14] sm:$0xff] %vm957_vm6, %v955_v41 }
 0x615   : > { %973 = vst.msk [vmem:[%s1491_s14] sm:$0xff] %vm972_vm7, %v970_v42 }
 0x61f   : > { %v1000_v44 = vpop.permute.xlu1 %999 }
 0x668   : > { %v985_v43 = vpop.permute.xlu2 %984 }
 0x669   : > { %988 = vst.msk [vmem:[%s1491_s14] sm:$0xff] %vm987_vm8, %v985_v43 }
 0x66a   : > { %1003 = vst.msk [vmem:[%s1491_s14] sm:$0xff] %vm1002_vm9, %v1000_v44 }
 0x66b PF: > { %s12_s11 = sadd.s32 1, %s1242_s11   ;;  %s1554_s9 = smov %s1238_s10 }
 0x66c   : > { %p9_p5 = scmp.ge.s32.totalorder %s12_s11, 4   ;;  %s1555_s10 = smov %s1557_s12 }
 0x66e   :  { %11 = sbr.rel (!%p9_p5) target bundleno = 2 (0x2), region = 90 }

</bundles_post_ra>
